<compile_context>
chip_gen: v7x
topology: tpu7x:2x2x1
jax: 0.10.0
libtpu: 0.0.40
codegen_flags: <defaults>
</compile_context>

<pallas_src>
import jax
import jax.numpy as jnp
from jax import lax
from jax.experimental import pallas as pl
from jax.experimental.pallas import tpu as pltpu


# ------------------------------ Pallas kernel ------------------------------

def _fused_kernel(x_ref, bbw_ref, bbb_ref,
                  w0_ref, t0_ref,
                  wmid_ref, tmid_ref,
                  wtail_ref, ttail_ref,
                  outw_ref, outb_ref,
                  embeds_ref, logits_ref):
    """grid = (1,): whole forward in one step, all weights resident in VMEM.

    embeds = flatten(x) @ bb_w + bb_b
    act    = relu(embeds @ W0' + t0')                      # BN scale folded into W0'
    act    = relu(act @ Wmid'[l] + tmid'[l])  l=0..L_mid-1 # unrolled fori_loop
    tail   = relu(act @ Wtail' + ttail')
    logits = tail @ out_w + out_b
    """
    # Backbone: embeds = flatten(x) @ bb_w + bb_b   (f32 output, bf16 MXU operands)
    emb = jnp.dot(x_ref[...].astype(jnp.bfloat16), bbw_ref[...],
                  preferred_element_type=jnp.float32) + bbb_ref[...]
    embeds_ref[...] = emb

    # Head layer 0: feature_size -> H   (Linear + folded BN + ReLU)
    h0 = jnp.dot(emb.astype(jnp.bfloat16), w0_ref[...],
                 preferred_element_type=jnp.float32)
    act = jnp.maximum(h0 + t0_ref[...], 0.0).astype(jnp.bfloat16)

    # Uniform middle head layers: H -> H, fully unrolled (weights already resident).
    l_mid = wmid_ref.shape[0]

    def body(i, a):
        h = jnp.dot(a, wmid_ref[i], preferred_element_type=jnp.float32)
        return jnp.maximum(h + tmid_ref[i], 0.0).astype(jnp.bfloat16)

    act = lax.fori_loop(0, l_mid, body, act, unroll=True)

    # Tail head layer: H -> head_layers[-1]
    ht = jnp.dot(act, wtail_ref[...], preferred_element_type=jnp.float32)
    tail = jnp.maximum(ht + ttail_ref[...], 0.0).astype(jnp.bfloat16)

    # Final out projection -> logits
    logits_ref[...] = jnp.dot(tail, outw_ref[...],
                              preferred_element_type=jnp.float32) + outb_ref[...]


def pallas_projection_forward(x_flat_pad, p):
    """x_flat_pad: [Bp, in_features] f32 (Bp multiple of 16). Returns (embeds, logits)."""
    Bp, Din = x_flat_pad.shape
    F = p["bb_w"].shape[1]          # backbone feature_size
    H = p["w0"].shape[1]            # uniform head width
    L_mid = p["w_mid"].shape[0]     # number of uniform H->H layers
    Dt = p["w_tail"].shape[1]       # tail head width
    C = p["out_w"].shape[1]         # num_classes

    def const(*shape):              # whole array, resident in VMEM for the single step
        return pl.BlockSpec(shape, lambda i: (0,) * len(shape))

    embeds, logits = pl.pallas_call(
        _fused_kernel,
        out_shape=(jax.ShapeDtypeStruct((Bp, F), jnp.float32),
                   jax.ShapeDtypeStruct((Bp, C), jnp.float32)),
        grid_spec=pltpu.PrefetchScalarGridSpec(
            num_scalar_prefetch=0,
            grid=(1,),
            in_specs=[
                const(Bp, Din),        # x_flat
                const(Din, F),         # bb_w   (bf16)
                const(1, F),           # bb_b
                const(F, H),           # w0'    (bf16, BN scale folded)
                const(1, H),           # t0'    (bias + BN folded)
                const(L_mid, H, H),    # w_mid' (bf16, BN scale folded)
                const(L_mid, 1, H),    # t_mid'
                const(H, Dt),          # w_tail'(bf16, BN scale folded)
                const(1, Dt),          # t_tail'
                const(Dt, C),          # out_w  (bf16)
                const(1, C),           # out_b
            ],
            out_specs=[
                pl.BlockSpec((Bp, F), lambda i: (0, 0)),   # embeds
                pl.BlockSpec((Bp, C), lambda i: (0, 0)),   # logits
            ],
        ),
        compiler_params=pltpu.CompilerParams(
            dimension_semantics=("arbitrary",)),
    )(x_flat_pad, p["bb_w"], p["bb_b"],
      p["w0"], p["t0"],
      p["w_mid"], p["t_mid"],
      p["w_tail"], p["t_tail"],
      p["out_w"], p["out_b"])
    return embeds, logits


# --------------------------- parameter building ----------------------------

def init_projection_net_params(key, in_features, feature_size,
                               head_layers, num_classes):
    """Deterministic synthetic parameters for ProjectionNet (eval-mode BN folded)."""
    L = len(head_layers)
    assert L >= 3 and all(h == head_layers[0] for h in head_layers[:-1]), (
        "builder assumes uniform-width hidden head layers + one tail layer "
        "(matches the module default [512]*8 + [128])")
    H = head_layers[0]
    Dt = head_layers[-1]
    eps = 1e-5

    keys = iter(jax.random.split(key, 4 * L + 8))

    def lin(din, dout):
        w = jax.random.normal(next(keys), (din, dout), jnp.float32) / jnp.sqrt(din)
        b = jax.random.normal(next(keys), (1, dout), jnp.float32) * 0.01
        return w, b

    def bn(dout):
        gamma = 1.0 + 0.01 * jax.random.normal(next(keys), (dout,), jnp.float32)
        beta = 0.01 * jax.random.normal(next(keys), (dout,), jnp.float32)
        running_mean = jnp.zeros((dout,), jnp.float32)
        running_var = jnp.ones((dout,), jnp.float32)
        scale = gamma / jnp.sqrt(running_var + eps)
        shift = beta - running_mean * scale
        return scale, shift

    def fold(w, b, scale, shift):
        # relu(BN(x @ w + b)) == relu(x @ (w * scale) + (b * scale + shift))
        w_f = (w * scale[None, :]).astype(jnp.bfloat16)
        t_f = (b[0] * scale + shift)[None, :]
        return w_f, t_f

    p = {}
    # synthetic backbone: flatten(NCHW) -> Linear -> embeds
    bb_w, bb_b = lin(in_features, feature_size)
    p["bb_w"] = bb_w.astype(jnp.bfloat16)
    p["bb_b"] = bb_b

    # head layer 0: feature_size -> H
    w0, b0 = lin(feature_size, H)
    s0, t0 = bn(H)
    p["w0"], p["t0"] = fold(w0, b0, s0, t0)

    # uniform middle layers: head layers 1 .. L-2  (H -> H)
    L_mid = L - 2
    w_list, t_list = [], []
    for _ in range(L_mid):
        w, b = lin(H, H)
        s, t = bn(H)
        wf, tf = fold(w, b, s, t)
        w_list.append(wf)
        t_list.append(tf)
    p["w_mid"] = jnp.stack(w_list)          # (L_mid, H, H) bf16
    p["t_mid"] = jnp.stack(t_list)          # (L_mid, 1, H) f32

    # tail head layer: H -> head_layers[-1]
    wt, bt = lin(H, Dt)
    st, tt = bn(Dt)
    p["w_tail"], p["t_tail"] = fold(wt, bt, st, tt)

    # out: Linear(head_layers[-1], num_classes)
    ow, ob = lin(Dt, num_classes)
    p["out_w"] = ow.astype(jnp.bfloat16)
    p["out_b"] = ob
    return p


# ------------------------------ forward pass -------------------------------

@jax.jit
def projection_net_forward(params, x):
    """Returns (embeds, logits), matching ProjectionNet.forward (x is NCHW)."""
    B = x.shape[0]
    x_flat = x.reshape(B, -1).astype(jnp.float32)
    Bp = max(16, ((B + 15) // 16) * 16)     # pad batch to bf16 sublane-pack multiple
    x_pad = jnp.zeros((Bp, x_flat.shape[1]), jnp.float32).at[:B].set(x_flat)
    embeds_pad, logits_pad = pallas_projection_forward(x_pad, params)
    return embeds_pad[:B], logits_pad[:B]


def reference_forward(params, x):
    """Pure-JAX reference with the same bf16 weights/casts (numerical sanity check)."""
    B = x.shape[0]
    x_flat = x.reshape(B, -1).astype(jnp.float32)
    emb = jnp.dot(x_flat.astype(jnp.bfloat16), params["bb_w"],
                  preferred_element_type=jnp.float32) + params["bb_b"]
    a = jnp.maximum(jnp.dot(emb.astype(jnp.bfloat16), params["w0"],
                            preferred_element_type=jnp.float32) + params["t0"], 0.0)
    a = a.astype(jnp.bfloat16)
    for i in range(params["w_mid"].shape[0]):
        a = jnp.maximum(jnp.dot(a, params["w_mid"][i],
                                preferred_element_type=jnp.float32)
                        + params["t_mid"][i], 0.0).astype(jnp.bfloat16)
    t = jnp.maximum(jnp.dot(a, params["w_tail"],
                            preferred_element_type=jnp.float32)
                    + params["t_tail"], 0.0).astype(jnp.bfloat16)
    logits = jnp.dot(t, params["out_w"],
                     preferred_element_type=jnp.float32) + params["out_b"]
    return emb, logits


# ---------------------------------- main -----------------------------------

if __name__ == "__main__":
    key = jax.random.PRNGKey(0)
    k_param, k_input = jax.random.split(key)

    # small shapes: batch=2, channels=4, spatial=16x16, backbone feature_size=32
    B, C, H, W = 2, 4, 16, 16
    feature_size = 32
    head_layers = [512, 512, 512, 512, 512, 512, 512, 512, 128]  # module default
    num_classes = 2

    params = init_projection_net_params(
        k_param, in_features=C * H * W, feature_size=feature_size,
        head_layers=head_layers, num_classes=num_classes)

    x = jax.random.normal(k_input, (B, C, H, W), jnp.float32)  # NCHW

    embeds, logits = projection_net_forward(params, x)
    jax.block_until_ready((embeds, logits))

    assert embeds.shape == (B, feature_size)
    assert logits.shape == (B, num_classes)

    # correctness check against a pure-JAX reference using identical bf16 numerics
    ref_emb, ref_logits = reference_forward(params, x)
    assert float(jnp.max(jnp.abs(embeds - ref_emb))) < 1e-2
    assert float(jnp.max(jnp.abs(logits - ref_logits))) < 1e-2

    print("KERNEL_OK")
</pallas_src>

<mosaic_0001>
module attributes {stable_mosaic.version = 11 : i64} {
  func.func @_fused_kernel(%arg0: i32, %arg1: memref<16x1024xf32, #tpu.memory_space<vmem>>, %arg2: memref<1024x32xbf16, #tpu.memory_space<vmem>>, %arg3: memref<1x32xf32, #tpu.memory_space<vmem>>, %arg4: memref<32x512xbf16, #tpu.memory_space<vmem>>, %arg5: memref<1x512xf32, #tpu.memory_space<vmem>>, %arg6: memref<7x512x512xbf16, #tpu.memory_space<vmem>>, %arg7: memref<7x1x512xf32, #tpu.memory_space<vmem>>, %arg8: memref<512x128xbf16, #tpu.memory_space<vmem>>, %arg9: memref<1x128xf32, #tpu.memory_space<vmem>>, %arg10: memref<128x2xbf16, #tpu.memory_space<vmem>>, %arg11: memref<1x2xf32, #tpu.memory_space<vmem>>, %arg12: memref<16x32xf32, #tpu.memory_space<vmem>>, %arg13: memref<16x2xf32, #tpu.memory_space<vmem>>) attributes {dimension_semantics = [#tpu.dimension_semantics<arbitrary>], iteration_bounds = array<i64: 1>, scalar_prefetch = 0 : i64, scratch_operands = 0 : i64, tpu.core_type = #tpu.core_type<tc>, window_params = [{pipeline_mode = #tpu.pipeline_mode<synchronous>, transform_indices = @transform_0, window_bounds = array<i64: 16, 1024>}, {pipeline_mode = #tpu.pipeline_mode<synchronous>, transform_indices = @transform_1, window_bounds = array<i64: 1024, 32>}, {pipeline_mode = #tpu.pipeline_mode<synchronous>, transform_indices = @transform_2, window_bounds = array<i64: 1, 32>}, {pipeline_mode = #tpu.pipeline_mode<synchronous>, transform_indices = @transform_3, window_bounds = array<i64: 32, 512>}, {pipeline_mode = #tpu.pipeline_mode<synchronous>, transform_indices = @transform_4, window_bounds = array<i64: 1, 512>}, {pipeline_mode = #tpu.pipeline_mode<synchronous>, transform_indices = @transform_5, window_bounds = array<i64: 7, 512, 512>}, {pipeline_mode = #tpu.pipeline_mode<synchronous>, transform_indices = @transform_6, window_bounds = array<i64: 7, 1, 512>}, {pipeline_mode = #tpu.pipeline_mode<synchronous>, transform_indices = @transform_7, window_bounds = array<i64: 512, 128>}, {pipeline_mode = #tpu.pipeline_mode<synchronous>, transform_indices = @transform_8, window_bounds = array<i64: 1, 128>}, {pipeline_mode = #tpu.pipeline_mode<synchronous>, transform_indices = @transform_9, window_bounds = array<i64: 128, 2>}, {pipeline_mode = #tpu.pipeline_mode<synchronous>, transform_indices = @transform_10, window_bounds = array<i64: 1, 2>}, {pipeline_mode = #tpu.pipeline_mode<synchronous>, transform_indices = @transform_11, window_bounds = array<i64: 16, 32>}, {pipeline_mode = #tpu.pipeline_mode<synchronous>, transform_indices = @transform_12, window_bounds = array<i64: 16, 2>}]} {
    %c0 = arith.constant 0 : index
    %c0_0 = arith.constant 0 : index
    %0 = vector.load %arg1[%c0, %c0_0] : memref<16x1024xf32, #tpu.memory_space<vmem>>, vector<16x1024xf32>
    %1 = arith.truncf %0 : vector<16x1024xf32> to vector<16x1024xbf16>
    %c0_1 = arith.constant 0 : index
    %c0_2 = arith.constant 0 : index
    %2 = vector.load %arg2[%c0_1, %c0_2] : memref<1024x32xbf16, #tpu.memory_space<vmem>>, vector<1024x32xbf16>
    %cst = arith.constant dense<0.000000e+00> : vector<16x32xf32>
    %3 = tpu.matmul %1, %2, %cst {dimension_numbers = #tpu.dot_dimension_numbers<[1], [0], [0], [1], [0, 0, 1, 1], [], []>} : vector<16x1024xbf16>, vector<1024x32xbf16>, vector<16x32xf32> -> vector<16x32xf32>
    %c0_3 = arith.constant 0 : index
    %c0_4 = arith.constant 0 : index
    %4 = vector.load %arg3[%c0_3, %c0_4] : memref<1x32xf32, #tpu.memory_space<vmem>>, vector<1x32xf32>
    %5 = vector.broadcast %4 : vector<1x32xf32> to vector<16x32xf32>
    %6 = arith.addf %3, %5 : vector<16x32xf32>
    %c0_5 = arith.constant 0 : index
    %c0_6 = arith.constant 0 : index
    %7 = vector.load %arg12[%c0_5, %c0_6] : memref<16x32xf32, #tpu.memory_space<vmem>>, vector<16x32xf32>
    tpu.vector_store %arg12[%c0_5, %c0_6], %6 {strides = array<i32>} : memref<16x32xf32, #tpu.memory_space<vmem>>, vector<16x32xf32>,
    %8 = arith.truncf %6 : vector<16x32xf32> to vector<16x32xbf16>
    %c0_7 = arith.constant 0 : index
    %c0_8 = arith.constant 0 : index
    %9 = vector.load %arg4[%c0_7, %c0_8] : memref<32x512xbf16, #tpu.memory_space<vmem>>, vector<32x512xbf16>
    %cst_9 = arith.constant dense<0.000000e+00> : vector<16x512xf32>
    %10 = tpu.matmul %8, %9, %cst_9 {dimension_numbers = #tpu.dot_dimension_numbers<[1], [0], [0], [1], [0, 0, 1, 1], [], []>} : vector<16x32xbf16>, vector<32x512xbf16>, vector<16x512xf32> -> vector<16x512xf32>
    %c0_10 = arith.constant 0 : index
    %c0_11 = arith.constant 0 : index
    %11 = vector.load %arg5[%c0_10, %c0_11] : memref<1x512xf32, #tpu.memory_space<vmem>>, vector<1x512xf32>
    %12 = vector.broadcast %11 : vector<1x512xf32> to vector<16x512xf32>
    %13 = arith.addf %10, %12 : vector<16x512xf32>
    %cst_12 = arith.constant 0.000000e+00 : f32
    %14 = vector.broadcast %cst_12 : f32 to vector<16x512xf32>
    %15 = arith.maximumf %13, %14 : vector<16x512xf32>
    %16 = arith.truncf %15 : vector<16x512xf32> to vector<16x512xbf16>
    %c0_i32 = arith.constant 0 : i32
    %17 = arith.index_cast %c0_i32 : i32 to index
    %c0_13 = arith.constant 0 : index
    %c0_14 = arith.constant 0 : index
    %18 = vector.load %arg6[%17, %c0_13, %c0_14] : memref<7x512x512xbf16, #tpu.memory_space<vmem>>, vector<1x512x512xbf16>
    %19 = vector.shape_cast %18 : vector<1x512x512xbf16> to vector<512x512xbf16>
    %cst_15 = arith.constant dense<0.000000e+00> : vector<16x512xf32>
    %20 = tpu.matmul %16, %19, %cst_15 {dimension_numbers = #tpu.dot_dimension_numbers<[1], [0], [0], [1], [0, 0, 1, 1], [], []>} : vector<16x512xbf16>, vector<512x512xbf16>, vector<16x512xf32> -> vector<16x512xf32>
    %21 = arith.index_cast %c0_i32 : i32 to index
    %c0_16 = arith.constant 0 : index
    %c0_17 = arith.constant 0 : index
    %22 = vector.load %arg7[%21, %c0_16, %c0_17] : memref<7x1x512xf32, #tpu.memory_space<vmem>>, vector<1x1x512xf32>
    %23 = vector.shape_cast %22 : vector<1x1x512xf32> to vector<1x512xf32>
    %24 = vector.broadcast %23 : vector<1x512xf32> to vector<16x512xf32>
    %25 = arith.addf %20, %24 : vector<16x512xf32>
    %cst_18 = arith.constant 0.000000e+00 : f32
    %26 = vector.broadcast %cst_18 : f32 to vector<16x512xf32>
    %27 = arith.maximumf %25, %26 : vector<16x512xf32>
    %28 = arith.truncf %27 : vector<16x512xf32> to vector<16x512xbf16>
    %c1_i32 = arith.constant 1 : i32
    %29 = arith.index_cast %c1_i32 : i32 to index
    %c0_19 = arith.constant 0 : index
    %c0_20 = arith.constant 0 : index
    %30 = vector.load %arg6[%29, %c0_19, %c0_20] : memref<7x512x512xbf16, #tpu.memory_space<vmem>>, vector<1x512x512xbf16>
    %31 = vector.shape_cast %30 : vector<1x512x512xbf16> to vector<512x512xbf16>
    %cst_21 = arith.constant dense<0.000000e+00> : vector<16x512xf32>
    %32 = tpu.matmul %28, %31, %cst_21 {dimension_numbers = #tpu.dot_dimension_numbers<[1], [0], [0], [1], [0, 0, 1, 1], [], []>} : vector<16x512xbf16>, vector<512x512xbf16>, vector<16x512xf32> -> vector<16x512xf32>
    %33 = arith.index_cast %c1_i32 : i32 to index
    %c0_22 = arith.constant 0 : index
    %c0_23 = arith.constant 0 : index
    %34 = vector.load %arg7[%33, %c0_22, %c0_23] : memref<7x1x512xf32, #tpu.memory_space<vmem>>, vector<1x1x512xf32>
    %35 = vector.shape_cast %34 : vector<1x1x512xf32> to vector<1x512xf32>
    %36 = vector.broadcast %35 : vector<1x512xf32> to vector<16x512xf32>
    %37 = arith.addf %32, %36 : vector<16x512xf32>
    %cst_24 = arith.constant 0.000000e+00 : f32
    %38 = vector.broadcast %cst_24 : f32 to vector<16x512xf32>
    %39 = arith.maximumf %37, %38 : vector<16x512xf32>
    %40 = arith.truncf %39 : vector<16x512xf32> to vector<16x512xbf16>
    %c2_i32 = arith.constant 2 : i32
    %41 = arith.index_cast %c2_i32 : i32 to index
    %c0_25 = arith.constant 0 : index
    %c0_26 = arith.constant 0 : index
    %42 = vector.load %arg6[%41, %c0_25, %c0_26] : memref<7x512x512xbf16, #tpu.memory_space<vmem>>, vector<1x512x512xbf16>
    %43 = vector.shape_cast %42 : vector<1x512x512xbf16> to vector<512x512xbf16>
    %cst_27 = arith.constant dense<0.000000e+00> : vector<16x512xf32>
    %44 = tpu.matmul %40, %43, %cst_27 {dimension_numbers = #tpu.dot_dimension_numbers<[1], [0], [0], [1], [0, 0, 1, 1], [], []>} : vector<16x512xbf16>, vector<512x512xbf16>, vector<16x512xf32> -> vector<16x512xf32>
    %45 = arith.index_cast %c2_i32 : i32 to index
    %c0_28 = arith.constant 0 : index
    %c0_29 = arith.constant 0 : index
    %46 = vector.load %arg7[%45, %c0_28, %c0_29] : memref<7x1x512xf32, #tpu.memory_space<vmem>>, vector<1x1x512xf32>
    %47 = vector.shape_cast %46 : vector<1x1x512xf32> to vector<1x512xf32>
    %48 = vector.broadcast %47 : vector<1x512xf32> to vector<16x512xf32>
    %49 = arith.addf %44, %48 : vector<16x512xf32>
    %cst_30 = arith.constant 0.000000e+00 : f32
    %50 = vector.broadcast %cst_30 : f32 to vector<16x512xf32>
    %51 = arith.maximumf %49, %50 : vector<16x512xf32>
    %52 = arith.truncf %51 : vector<16x512xf32> to vector<16x512xbf16>
    %c3_i32 = arith.constant 3 : i32
    %53 = arith.index_cast %c3_i32 : i32 to index
    %c0_31 = arith.constant 0 : index
    %c0_32 = arith.constant 0 : index
    %54 = vector.load %arg6[%53, %c0_31, %c0_32] : memref<7x512x512xbf16, #tpu.memory_space<vmem>>, vector<1x512x512xbf16>
    %55 = vector.shape_cast %54 : vector<1x512x512xbf16> to vector<512x512xbf16>
    %cst_33 = arith.constant dense<0.000000e+00> : vector<16x512xf32>
    %56 = tpu.matmul %52, %55, %cst_33 {dimension_numbers = #tpu.dot_dimension_numbers<[1], [0], [0], [1], [0, 0, 1, 1], [], []>} : vector<16x512xbf16>, vector<512x512xbf16>, vector<16x512xf32> -> vector<16x512xf32>
    %57 = arith.index_cast %c3_i32 : i32 to index
    %c0_34 = arith.constant 0 : index
    %c0_35 = arith.constant 0 : index
    %58 = vector.load %arg7[%57, %c0_34, %c0_35] : memref<7x1x512xf32, #tpu.memory_space<vmem>>, vector<1x1x512xf32>
    %59 = vector.shape_cast %58 : vector<1x1x512xf32> to vector<1x512xf32>
    %60 = vector.broadcast %59 : vector<1x512xf32> to vector<16x512xf32>
    %61 = arith.addf %56, %60 : vector<16x512xf32>
    %cst_36 = arith.constant 0.000000e+00 : f32
    %62 = vector.broadcast %cst_36 : f32 to vector<16x512xf32>
    %63 = arith.maximumf %61, %62 : vector<16x512xf32>
    %64 = arith.truncf %63 : vector<16x512xf32> to vector<16x512xbf16>
    %c4_i32 = arith.constant 4 : i32
    %65 = arith.index_cast %c4_i32 : i32 to index
    %c0_37 = arith.constant 0 : index
    %c0_38 = arith.constant 0 : index
    %66 = vector.load %arg6[%65, %c0_37, %c0_38] : memref<7x512x512xbf16, #tpu.memory_space<vmem>>, vector<1x512x512xbf16>
    %67 = vector.shape_cast %66 : vector<1x512x512xbf16> to vector<512x512xbf16>
    %cst_39 = arith.constant dense<0.000000e+00> : vector<16x512xf32>
    %68 = tpu.matmul %64, %67, %cst_39 {dimension_numbers = #tpu.dot_dimension_numbers<[1], [0], [0], [1], [0, 0, 1, 1], [], []>} : vector<16x512xbf16>, vector<512x512xbf16>, vector<16x512xf32> -> vector<16x512xf32>
    %69 = arith.index_cast %c4_i32 : i32 to index
    %c0_40 = arith.constant 0 : index
    %c0_41 = arith.constant 0 : index
    %70 = vector.load %arg7[%69, %c0_40, %c0_41] : memref<7x1x512xf32, #tpu.memory_space<vmem>>, vector<1x1x512xf32>
    %71 = vector.shape_cast %70 : vector<1x1x512xf32> to vector<1x512xf32>
    %72 = vector.broadcast %71 : vector<1x512xf32> to vector<16x512xf32>
    %73 = arith.addf %68, %72 : vector<16x512xf32>
    %cst_42 = arith.constant 0.000000e+00 : f32
    %74 = vector.broadcast %cst_42 : f32 to vector<16x512xf32>
    %75 = arith.maximumf %73, %74 : vector<16x512xf32>
    %76 = arith.truncf %75 : vector<16x512xf32> to vector<16x512xbf16>
    %c5_i32 = arith.constant 5 : i32
    %77 = arith.index_cast %c5_i32 : i32 to index
    %c0_43 = arith.constant 0 : index
    %c0_44 = arith.constant 0 : index
    %78 = vector.load %arg6[%77, %c0_43, %c0_44] : memref<7x512x512xbf16, #tpu.memory_space<vmem>>, vector<1x512x512xbf16>
    %79 = vector.shape_cast %78 : vector<1x512x512xbf16> to vector<512x512xbf16>
    %cst_45 = arith.constant dense<0.000000e+00> : vector<16x512xf32>
    %80 = tpu.matmul %76, %79, %cst_45 {dimension_numbers = #tpu.dot_dimension_numbers<[1], [0], [0], [1], [0, 0, 1, 1], [], []>} : vector<16x512xbf16>, vector<512x512xbf16>, vector<16x512xf32> -> vector<16x512xf32>
    %81 = arith.index_cast %c5_i32 : i32 to index
    %c0_46 = arith.constant 0 : index
    %c0_47 = arith.constant 0 : index
    %82 = vector.load %arg7[%81, %c0_46, %c0_47] : memref<7x1x512xf32, #tpu.memory_space<vmem>>, vector<1x1x512xf32>
    %83 = vector.shape_cast %82 : vector<1x1x512xf32> to vector<1x512xf32>
    %84 = vector.broadcast %83 : vector<1x512xf32> to vector<16x512xf32>
    %85 = arith.addf %80, %84 : vector<16x512xf32>
    %cst_48 = arith.constant 0.000000e+00 : f32
    %86 = vector.broadcast %cst_48 : f32 to vector<16x512xf32>
    %87 = arith.maximumf %85, %86 : vector<16x512xf32>
    %88 = arith.truncf %87 : vector<16x512xf32> to vector<16x512xbf16>
    %c6_i32 = arith.constant 6 : i32
    %89 = arith.index_cast %c6_i32 : i32 to index
    %c0_49 = arith.constant 0 : index
    %c0_50 = arith.constant 0 : index
    %90 = vector.load %arg6[%89, %c0_49, %c0_50] : memref<7x512x512xbf16, #tpu.memory_space<vmem>>, vector<1x512x512xbf16>
    %91 = vector.shape_cast %90 : vector<1x512x512xbf16> to vector<512x512xbf16>
    %cst_51 = arith.constant dense<0.000000e+00> : vector<16x512xf32>
    %92 = tpu.matmul %88, %91, %cst_51 {dimension_numbers = #tpu.dot_dimension_numbers<[1], [0], [0], [1], [0, 0, 1, 1], [], []>} : vector<16x512xbf16>, vector<512x512xbf16>, vector<16x512xf32> -> vector<16x512xf32>
    %93 = arith.index_cast %c6_i32 : i32 to index
    %c0_52 = arith.constant 0 : index
    %c0_53 = arith.constant 0 : index
    %94 = vector.load %arg7[%93, %c0_52, %c0_53] : memref<7x1x512xf32, #tpu.memory_space<vmem>>, vector<1x1x512xf32>
    %95 = vector.shape_cast %94 : vector<1x1x512xf32> to vector<1x512xf32>
    %96 = vector.broadcast %95 : vector<1x512xf32> to vector<16x512xf32>
    %97 = arith.addf %92, %96 : vector<16x512xf32>
    %cst_54 = arith.constant 0.000000e+00 : f32
    %98 = vector.broadcast %cst_54 : f32 to vector<16x512xf32>
    %99 = arith.maximumf %97, %98 : vector<16x512xf32>
    %100 = arith.truncf %99 : vector<16x512xf32> to vector<16x512xbf16>
    %c7_i32 = arith.constant 7 : i32
    %c0_55 = arith.constant 0 : index
    %c0_56 = arith.constant 0 : index
    %101 = vector.load %arg8[%c0_55, %c0_56] : memref<512x128xbf16, #tpu.memory_space<vmem>>, vector<512x128xbf16>
    %cst_57 = arith.constant dense<0.000000e+00> : vector<16x128xf32>
    %102 = tpu.matmul %100, %101, %cst_57 {dimension_numbers = #tpu.dot_dimension_numbers<[1], [0], [0], [1], [0, 0, 1, 1], [], []>} : vector<16x512xbf16>, vector<512x128xbf16>, vector<16x128xf32> -> vector<16x128xf32>
    %c0_58 = arith.constant 0 : index
    %c0_59 = arith.constant 0 : index
    %103 = vector.load %arg9[%c0_58, %c0_59] : memref<1x128xf32, #tpu.memory_space<vmem>>, vector<1x128xf32>
    %104 = vector.broadcast %103 : vector<1x128xf32> to vector<16x128xf32>
    %105 = arith.addf %102, %104 : vector<16x128xf32>
    %cst_60 = arith.constant 0.000000e+00 : f32
    %106 = vector.broadcast %cst_60 : f32 to vector<16x128xf32>
    %107 = arith.maximumf %105, %106 : vector<16x128xf32>
    %108 = arith.truncf %107 : vector<16x128xf32> to vector<16x128xbf16>
    %c0_61 = arith.constant 0 : index
    %c0_62 = arith.constant 0 : index
    %109 = vector.load %arg10[%c0_61, %c0_62] : memref<128x2xbf16, #tpu.memory_space<vmem>>, vector<128x2xbf16>
    %cst_63 = arith.constant dense<0.000000e+00> : vector<16x2xf32>
    %110 = tpu.matmul %108, %109, %cst_63 {dimension_numbers = #tpu.dot_dimension_numbers<[1], [0], [0], [1], [0, 0, 1, 1], [], []>} : vector<16x128xbf16>, vector<128x2xbf16>, vector<16x2xf32> -> vector<16x2xf32>
    %c0_64 = arith.constant 0 : index
    %c0_65 = arith.constant 0 : index
    %111 = vector.load %arg11[%c0_64, %c0_65] : memref<1x2xf32, #tpu.memory_space<vmem>>, vector<1x2xf32>
    %112 = vector.broadcast %111 : vector<1x2xf32> to vector<16x2xf32>
    %113 = arith.addf %110, %112 : vector<16x2xf32>
    %c0_66 = arith.constant 0 : index
    %c0_67 = arith.constant 0 : index
    %114 = vector.load %arg13[%c0_66, %c0_67] : memref<16x2xf32, #tpu.memory_space<vmem>>, vector<16x2xf32>
    tpu.vector_store %arg13[%c0_66, %c0_67], %113 {strides = array<i32>} : memref<16x2xf32, #tpu.memory_space<vmem>>, vector<16x2xf32>,
    return
  }
  func.func @transform_0(%arg0: i32) -> (i32, i32) {
    %c0_i32 = arith.constant 0 : i32
    %c0_i32_0 = arith.constant 0 : i32
    %c0_i32_1 = arith.constant 0 : i32
    return %c0_i32, %c0_i32_0 : i32, i32
  }
  func.func @transform_1(%arg0: i32) -> (i32, i32) {
    %c0_i32 = arith.constant 0 : i32
    %c0_i32_0 = arith.constant 0 : i32
    %c0_i32_1 = arith.constant 0 : i32
    return %c0_i32, %c0_i32_0 : i32, i32
  }
  func.func @transform_2(%arg0: i32) -> (i32, i32) {
    %c0_i32 = arith.constant 0 : i32
    %c0_i32_0 = arith.constant 0 : i32
    %c0_i32_1 = arith.constant 0 : i32
    return %c0_i32, %c0_i32_0 : i32, i32
  }
  func.func @transform_3(%arg0: i32) -> (i32, i32) {
    %c0_i32 = arith.constant 0 : i32
    %c0_i32_0 = arith.constant 0 : i32
    %c0_i32_1 = arith.constant 0 : i32
    return %c0_i32, %c0_i32_0 : i32, i32
  }
  func.func @transform_4(%arg0: i32) -> (i32, i32) {
    %c0_i32 = arith.constant 0 : i32
    %c0_i32_0 = arith.constant 0 : i32
    %c0_i32_1 = arith.constant 0 : i32
    return %c0_i32, %c0_i32_0 : i32, i32
  }
  func.func @transform_5(%arg0: i32) -> (i32, i32, i32) {
    %c0_i32 = arith.constant 0 : i32
    %c0_i32_0 = arith.constant 0 : i32
    %c0_i32_1 = arith.constant 0 : i32
    %c0_i32_2 = arith.constant 0 : i32
    return %c0_i32, %c0_i32_0, %c0_i32_1 : i32, i32, i32
  }
  func.func @transform_6(%arg0: i32) -> (i32, i32, i32) {
    %c0_i32 = arith.constant 0 : i32
    %c0_i32_0 = arith.constant 0 : i32
    %c0_i32_1 = arith.constant 0 : i32
    %c0_i32_2 = arith.constant 0 : i32
    return %c0_i32, %c0_i32_0, %c0_i32_1 : i32, i32, i32
  }
  func.func @transform_7(%arg0: i32) -> (i32, i32) {
    %c0_i32 = arith.constant 0 : i32
    %c0_i32_0 = arith.constant 0 : i32
    %c0_i32_1 = arith.constant 0 : i32
    return %c0_i32, %c0_i32_0 : i32, i32
  }
  func.func @transform_8(%arg0: i32) -> (i32, i32) {
    %c0_i32 = arith.constant 0 : i32
    %c0_i32_0 = arith.constant 0 : i32
    %c0_i32_1 = arith.constant 0 : i32
    return %c0_i32, %c0_i32_0 : i32, i32
  }
  func.func @transform_9(%arg0: i32) -> (i32, i32) {
    %c0_i32 = arith.constant 0 : i32
    %c0_i32_0 = arith.constant 0 : i32
    %c0_i32_1 = arith.constant 0 : i32
    return %c0_i32, %c0_i32_0 : i32, i32
  }
  func.func @transform_10(%arg0: i32) -> (i32, i32) {
    %c0_i32 = arith.constant 0 : i32
    %c0_i32_0 = arith.constant 0 : i32
    %c0_i32_1 = arith.constant 0 : i32
    return %c0_i32, %c0_i32_0 : i32, i32
  }
  func.func @transform_11(%arg0: i32) -> (i32, i32) {
    %c0_i32 = arith.constant 0 : i32
    %c0_i32_0 = arith.constant 0 : i32
    %c0_i32_1 = arith.constant 0 : i32
    return %c0_i32, %c0_i32_0 : i32, i32
  }
  func.func @transform_12(%arg0: i32) -> (i32, i32) {
    %c0_i32 = arith.constant 0 : i32
    %c0_i32_0 = arith.constant 0 : i32
    %c0_i32_1 = arith.constant 0 : i32
    return %c0_i32, %c0_i32_0 : i32, i32
  }
}

</mosaic_0001>

<bundles_post_ra>
// kernel: projection_net_forward.1
= control target key start
LH: loop header
LB: loop body
LE: loop exit
PB: predicated region body
PF: predicated region fallthrough
CT: control target
= control target key end

     0   :  { %18 = vsyncpa [#allocation3], 0  ;;  %s11833_s0 = inlined_call_operand.vmem [shape: f32[16,1024], index: 0, kind: input, shape index: {}]   ;;  %s11834_s1 = inlined_call_operand.vmem [shape: bf16[1024,32], index: 1, kind: input, shape index: {}]   ;;  %s11835_s2 = inlined_call_operand.hbm [shape: f32[1,32], index: 2, kind: input, shape index: {}]   ;;  %s11836_s3 = inlined_call_operand.hbm [shape: bf16[32,512], index: 3, kind: input, shape index: {}]   ;;  %s11837_s4 = inlined_call_operand.hbm [shape: f32[1,512], index: 4, kind: input, shape index: {}]   ;;  %s11838_s5 = inlined_call_operand.hbm [shape: bf16[7,512,512], index: 5, kind: input, shape index: {}]   ;;  %s11839_s6 = inlined_call_operand.hbm [shape: f32[7,1,512], index: 6, kind: input, shape index: {}]   ;;  %s11840_s7 = inlined_call_operand.hbm [shape: bf16[512,128], index: 7, kind: input, shape index: {}]   ;;  %s11841_s8 = inlined_call_operand.hbm [shape: f32[1,128], index: 8, kind: input, shape index: {}]   ;;  %s11842_s9 = inlined_call_operand.vmem [shape: bf16[128,2], index: 9, kind: input, shape index: {}]   ;;  %s11843_s10 = inlined_call_operand.hbm [shape: f32[1,2], index: 10, kind: input, shape index: {}]   ;;  %s11844_s11 = inlined_call_operand.vmem [shape: f32[16,32], index: 11, kind: output, shape index: {0}]   ;;  %s11845_s12 = inlined_call_operand.vmem [shape: f32[16,2], index: 12, kind: output, shape index: {1}]  }
   0x1   :  { %19 = vsyncpa [#allocation5], 0 }
   0x2   :  { %20 = vsyncpa [#allocation8], 0 }
   0x3   :  { %21 = vsyncpa [#allocation11], 0 }
   0x4   :  { %22 = vsyncpa [#allocation14], 0  ;;  %s11277_s21 = smov [#allocation4]   ;;  %s11091_s25 = scalar_lea.hbm %s11836_s3, 1024 }
   0x5   :  { %s42_s22 = sshll.u32 %s11277_s21, 4  ;;  %p11092_p0 = scmp.ne.s32.totalorder %s11836_s3, %s11091_s25  ;;  %s43_s22 = int_to_ptr.vmem [resolvable:$true] %s42_s22 }
   0x6   :  { %p11095_p1 = scmp.lt.u32.totalorder %s11091_s25, %s11836_s3 }
   0x8   :  { %p11097_p2 = pnand %p11095_p1, %p11092_p0 }
   0xa   :  { %11100 = shalt.err (!%p11097_p2)
}
   0xb   :  { %s11101_s30 = scalar_lea.vmem %s43_s22, 1024  ;;  %p11106_p4 = scmp.lt.s32.totalorder %s43_s22, %s43_s22 }
   0xc   :  { %p11102_p3 = scmp.ne.s32.totalorder %s43_s22, %s11101_s30  ;;  %p11107_p5 = scmp.lt.s32.totalorder %s11101_s30, %s11101_s30 }
   0xe   :  { %p11108_p6 = por %p11107_p5, %p11106_p4 }
  0x10   :  { %p11109_p7 = pnand %p11108_p6, %p11102_p3 }
  0x12   :  { %11112 = shalt.err (!%p11109_p7)
}
  0x13   :  { %s11278_s13 = smov 256   ;;  %s11279_s14 = smov 16  }
  0x14   :  { %48 = dma.hbm_to_vmem [thread:$0]  %s11836_s3, 1024, %s43_s22, [#allocation5], %s11278_s13, %s11278_s13, %s11279_s14  }
  0x15   :  { %s11280_s17 = smov [#allocation7]   ;;  %s11113_s21 = scalar_lea.hbm %s11838_s5, 114688 }
  0x16   :  { %s64_s18 = sshll.u32 %s11280_s17, 4  ;;  %p11114_p8 = scmp.ne.s32.totalorder %s11838_s5, %s11113_s21  ;;  %s65_s18 = int_to_ptr.vmem [resolvable:$true] %s64_s18 }
  0x17   :  { %p11117_p9 = scmp.lt.u32.totalorder %s11113_s21, %s11838_s5 }
  0x19   :  { %p11119_p10 = pnand %p11117_p9, %p11114_p8 }
  0x1b   :  { %11122 = shalt.err (!%p11119_p10)
}
  0x1c   :  { %s11123_s27 = scalar_lea.vmem %s65_s18, 114688  ;;  %p11128_p12 = scmp.lt.s32.totalorder %s65_s18, %s65_s18 }
  0x1d   :  { %p11124_p11 = scmp.ne.s32.totalorder %s65_s18, %s11123_s27  ;;  %p11129_p13 = scmp.lt.s32.totalorder %s11123_s27, %s11123_s27 }
  0x1f   :  { %p11130_p0 = por %p11129_p13, %p11128_p12 }
  0x21   :  { %p11131_p1 = pnand %p11130_p0, %p11124_p11 }
  0x23   :  { %11134 = shalt.err (!%p11131_p1)
}
  0x24   :  { %70 = dma.hbm_to_vmem [thread:$0]  %s11838_s5, 114688, %s65_s18, [#allocation8], %s11278_s13, %s11278_s13, %s11279_s14  }
  0x25   :  { %s11281_s28 = smov [#allocation10]   ;;  %s11282_s30 = smov [#allocation2]  }
  0x26   :  { %s88_s29 = sshll.u32 %s11281_s28, 4  ;;  %s33_s15 = sshll.u32 %s11282_s30, 4  ;;  %s89_s29 = int_to_ptr.vmem [resolvable:$true] %s88_s29  ;;  %s11381_s15 = int_to_ptr.vmem [resolvable:$true] %s33_s15 }
  0x27   :  { %s11135_s19 = scalar_lea.hbm %s11840_s7, 4096 }
  0x28   :  { %p11136_p2 = scmp.ne.s32.totalorder %s11840_s7, %s11135_s19  ;;  %p11139_p3 = scmp.lt.u32.totalorder %s11135_s19, %s11840_s7 }
  0x2a   :  { %p11141_p4 = pnand %p11139_p3, %p11136_p2 }
  0x2c   :  { %11144 = shalt.err (!%p11141_p4)
}
  0x2d   :  { %s11145_s5 = scalar_lea.vmem %s89_s29, 4096  ;;  %p11150_p6 = scmp.lt.s32.totalorder %s89_s29, %s89_s29 }
  0x2e   :  { %p11146_p5 = scmp.ne.s32.totalorder %s89_s29, %s11145_s5  ;;  %p11151_p7 = scmp.lt.s32.totalorder %s11145_s5, %s11145_s5 }
  0x30   :  { %p11152_p8 = por %p11151_p7, %p11150_p6 }
  0x32   :  { %p11153_p9 = pnand %p11152_p8, %p11146_p5 }
  0x34   :  { %11156 = shalt.err (!%p11153_p9)
}
  0x35   :  { %s11283_s13 = smov 64   ;;  %s11284_s14 = smov 4  }
  0x36   :  { %94 = dma.hbm_to_vmem [thread:$0]  %s11840_s7, 4096, %s89_s29, [#allocation11], %s11283_s13, %s11283_s13, %s11284_s14  }
  0x37   :  { %s11157_s3 = scalar_lea.hbm %s11835_s2, 16 }
  0x38   :  { %p11158_p10 = scmp.ne.s32.totalorder %s11835_s2, %s11157_s3  ;;  %p11161_p11 = scmp.lt.u32.totalorder %s11157_s3, %s11835_s2 }
  0x3a   :  { %p11163_p12 = pnand %p11161_p11, %p11158_p10 }
  0x3c   :  { %11166 = shalt.err (!%p11163_p12)
}
  0x3d   :  { %s11167_s17 = scalar_lea.vmem %s11381_s15, 16  ;;  %s11171_s7 = scalar_lea.vmem %s11381_s15, 32 }
  0x3e   :  { %p11168_p13 = scmp.ne.s32.totalorder %s11381_s15, %s11167_s17  ;;  %p11172_p0 = scmp.lt.s32.totalorder %s11381_s15, %s11381_s15 }
  0x3f   :  { %p11173_p1 = scmp.lt.s32.totalorder %s11171_s7, %s11167_s17 }
  0x41   :  { %p11174_p2 = por %p11173_p1, %p11172_p0 }
  0x43   :  { %p11175_p3 = pnand %p11174_p2, %p11168_p13 }
  0x45   :  { %11178 = shalt.err (!%p11175_p3)
}
  0x46   :  { %36 = dma.hbm_to_vmem [thread:$0]  %s11835_s2, 16, %s11381_s15, [#allocation3]  }
  0x47   :  { %s11285_s20 = smov [#allocation6]   ;;  %s11286_s23 = smov [#allocation9]  }
  0x48   :  { %s55_s21 = sshll.u32 %s11285_s20, 4  ;;  %s76_s24 = sshll.u32 %s11286_s23, 4  ;;  %s56_s21 = int_to_ptr.vmem [resolvable:$true] %s55_s21  ;;  %s11416_s24 = int_to_ptr.vmem [resolvable:$true] %s76_s24 }
  0x49   :  { %s11179_s25 = scalar_lea.hbm %s11837_s4, 64 }
  0x4a   :  { %p11180_p4 = scmp.ne.s32.totalorder %s11837_s4, %s11179_s25  ;;  %p11183_p5 = scmp.lt.u32.totalorder %s11179_s25, %s11837_s4 }
  0x4c   :  { %p11185_p6 = pnand %p11183_p5, %p11180_p4 }
  0x4e   :  { %11188 = shalt.err (!%p11185_p6)
}
  0x4f   :  { %s11189_s2 = scalar_lea.vmem %s56_s21, 64  ;;  %p11194_p8 = scmp.lt.s32.totalorder %s56_s21, %s56_s21 }
  0x50   :  { %p11190_p7 = scmp.ne.s32.totalorder %s56_s21, %s11189_s2  ;;  %p11195_p9 = scmp.lt.s32.totalorder %s11189_s2, %s11189_s2 }
  0x52   :  { %p11196_p10 = por %p11195_p9, %p11194_p8 }
  0x54   :  { %p11197_p11 = pnand %p11196_p10, %p11190_p7 }
  0x56   :  { %11200 = shalt.err (!%p11197_p11)
}
  0x57   :  { %58 = dma.hbm_to_vmem [thread:$0]  %s11837_s4, 64, %s56_s21, [#allocation5]  }
  0x58   :  { %s11201_s17 = scalar_lea.hbm %s11839_s6, 448 }
  0x59   :  { %p11202_p12 = scmp.ne.s32.totalorder %s11839_s6, %s11201_s17  ;;  %p11205_p13 = scmp.lt.u32.totalorder %s11201_s17, %s11839_s6 }
  0x5b   :  { %p11207_p0 = pnand %p11205_p13, %p11202_p12 }
  0x5d   :  { %11210 = shalt.err (!%p11207_p0)
}
  0x5e   :  { %s11211_s23 = scalar_lea.vmem %s11416_s24, 448  ;;  %p11216_p2 = scmp.lt.s32.totalorder %s11416_s24, %s11416_s24 }
  0x5f   :  { %p11212_p1 = scmp.ne.s32.totalorder %s11416_s24, %s11211_s23  ;;  %p11217_p3 = scmp.lt.s32.totalorder %s11211_s23, %s11211_s23 }
  0x61   :  { %p11218_p4 = por %p11217_p3, %p11216_p2 }
  0x63   :  { %p11219_p5 = pnand %p11218_p4, %p11212_p1 }
  0x65   :  { %11222 = shalt.err (!%p11219_p5)
}
  0x66   :  { %82 = dma.hbm_to_vmem [thread:$0]  %s11839_s6, 448, %s11416_s24, [#allocation8], %s11283_s13, %s11283_s13, %s11284_s14  }
  0x67   :  { %s11287_s5 = smov [#allocation12]   ;;  %s11288_s25 = smov [#allocation13]  }
  0x68   :  { %s101_s18 = sshll.u32 %s11287_s5, 4  ;;  %s113_s26 = sshll.u32 %s11288_s25, 4  ;;  %s102_s18 = int_to_ptr.vmem [resolvable:$true] %s101_s18  ;;  %s114_s26 = int_to_ptr.vmem [resolvable:$true] %s113_s26 }
  0x69   :  { %s11223_s22 = scalar_lea.hbm %s11841_s8, 16 }
  0x6a   :  { %p11224_p6 = scmp.ne.s32.totalorder %s11841_s8, %s11223_s22  ;;  %p11227_p7 = scmp.lt.u32.totalorder %s11223_s22, %s11841_s8 }
  0x6c   :  { %p11229_p8 = pnand %p11227_p7, %p11224_p6 }
  0x6e   :  { %11232 = shalt.err (!%p11229_p8)
}
  0x6f   :  { %s11233_s6 = scalar_lea.vmem %s102_s18, 16  ;;  %s11237_s13 = scalar_lea.vmem %s102_s18, 32 }
  0x70   :  { %p11234_p9 = scmp.ne.s32.totalorder %s102_s18, %s11233_s6  ;;  %p11238_p10 = scmp.lt.s32.totalorder %s102_s18, %s102_s18 }
  0x71   :  { %p11239_p11 = scmp.lt.s32.totalorder %s11237_s13, %s11233_s6 }
  0x73   :  { %p11240_p12 = por %p11239_p11, %p11238_p10 }
  0x75   :  { %p11241_p13 = pnand %p11240_p12, %p11234_p9 }
  0x77   :  { %11244 = shalt.err (!%p11241_p13)
}
  0x78   :  { %104 = dma.hbm_to_vmem [thread:$0]  %s11841_s8, 16, %s102_s18, [#allocation11]  }
  0x79   :  { %s11245_s7 = scalar_lea.hbm %s11843_s10, 16 }
  0x7a   :  { %p11246_p0 = scmp.ne.s32.totalorder %s11843_s10, %s11245_s7  ;;  %p11249_p1 = scmp.lt.u32.totalorder %s11245_s7, %s11843_s10 }
  0x7c   :  { %p11251_p2 = pnand %p11249_p1, %p11246_p0 }
  0x7e   :  { %11254 = shalt.err (!%p11251_p2)
}
  0x7f   :  { %s11255_s4 = scalar_lea.vmem %s114_s26, 16  ;;  %s11259_s21 = scalar_lea.vmem %s114_s26, 32 }
  0x80   :  { %p11256_p3 = scmp.ne.s32.totalorder %s114_s26, %s11255_s4  ;;  %p11260_p4 = scmp.lt.s32.totalorder %s114_s26, %s114_s26 }
  0x81   :  { %p11261_p5 = scmp.lt.s32.totalorder %s11259_s21, %s11255_s4 }
  0x83   :  { %p11262_p6 = por %p11261_p5, %p11260_p4 }
  0x85   :  { %p11263_p7 = pnand %p11262_p6, %p11256_p3 }
  0x87   :  { %11266 = shalt.err (!%p11263_p7)
}
  0x88   :  { %116 = dma.hbm_to_vmem [thread:$0]  %s11843_s10, 16, %s114_s26, [#allocation14]  }
  0x89   :  { %11267 = dma.done.wait [#allocation3], 16  }
  0x8a   :  { %11268 = vsyncadd [#allocation3], 4294967280 }
  0x8b   :  { %11269 = dma.done.wait [#allocation5], 1088  }
  0x8c   :  { %11270 = vsyncadd [#allocation5], 4294966208 }
  0x8d   :  { %11271 = dma.done.wait [#allocation8], 115136  }
  0x8e   :  { %11272 = vsyncadd [#allocation8], 4294852160 }
  0x8f   :  { %11273 = dma.done.wait [#allocation11], 4112  }
  0x90   :  { %11274 = vsyncadd [#allocation11], 4294963184 }
  0x91   :  { %11275 = dma.done.wait [#allocation14], 16  }
  0x92   :  { %11276 = vsyncadd [#allocation14], 4294967280  ;;  %v9631_v0 = vld [vmem:[%s11834_s1 + $0x40] sm:$0xff]   ;;  %v9635_v4 = vld [vmem:[%s11834_s1 + $0x48] sm:$0xff]   ;;  %vm849_vm0 = vcmask 261120   ;;  %vm11291_vm1 = vmmov 0  }
  0x93   :  { %v9632_v1 = vld [vmem:[%s11834_s1 + $0xc0] sm:$0xff]   ;;  %9343 = vmatprep.subr.bf16.mxu0 %v9631_v0  ;;  %v9636_v5 = vld [vmem:[%s11834_s1 + $0xc8] sm:$0xff]   ;;  %v9639_v8 = vld [vmem:[%s11834_s1 + $0x50] sm:$0xff]   ;;  %vm8314_vm2 = vcmask 15360  }
  0x94   :  { %v9633_v2 = vld [vmem:[%s11834_s1] sm:$0xff]   ;;  %9365 = vmatprep.subr.bf16.mxu1 %v9632_v1  ;;  %v9637_v6 = vld [vmem:[%s11834_s1 + $0x8] sm:$0xff]   ;;  %v9640_v9 = vld [vmem:[%s11834_s1 + $0xd0] sm:$0xff]  }
  0x95   :  { %v9634_v3 = vld [vmem:[%s11834_s1 + $0x80] sm:$0xff]   ;;  %9344 = vmatpush3.bf16.msra.mxu0 %v9633_v2  ;;  %v9638_v7 = vld [vmem:[%s11834_s1 + $0x88] sm:$0xff]   ;;  %v9641_v10 = vld [vmem:[%s11834_s1 + $0x10] sm:$0xff]  }
  0x96   :  { %9366 = vmatpush3.bf16.msra.mxu1 %v9634_v3  ;;  %9345 = vmatprep.subr.bf16.mxu0 %v9635_v4  ;;  %v9642_v11 = vld [vmem:[%s11834_s1 + $0x90] sm:$0xff]   ;;  %v9643_v12 = vld [vmem:[%s11834_s1 + $0x58] sm:$0xff]   ;;  %v9647_v16 = vld [vmem:[%s11834_s1 + $0x60] sm:$0xff]  }
  0x97   :  { %9367 = vmatprep.subr.bf16.mxu1 %v9636_v5  ;;  %v9644_v13 = vld [vmem:[%s11834_s1 + $0xd8] sm:$0xff]   ;;  %v9648_v17 = vld [vmem:[%s11834_s1 + $0xe0] sm:$0xff]   ;;  %v9651_v20 = vld [vmem:[%s11834_s1 + $0x68] sm:$0xff]  }
  0x98   :  { %v9645_v14 = vld [vmem:[%s11834_s1 + $0x18] sm:$0xff]   ;;  %v9649_v18 = vld [vmem:[%s11834_s1 + $0x20] sm:$0xff]   ;;  %v9652_v21 = vld [vmem:[%s11834_s1 + $0xe8] sm:$0xff]  }
  0x99   :  { %9346 = vmatpush3.bf16.msra.mxu0 %v9637_v6  ;;  %v9646_v15 = vld [vmem:[%s11834_s1 + $0x98] sm:$0xff]   ;;  %v9650_v19 = vld [vmem:[%s11834_s1 + $0xa0] sm:$0xff]   ;;  %v9653_v22 = vld [vmem:[%s11834_s1 + $0x28] sm:$0xff]  }
  0x9a   :  { %9368 = vmatpush3.bf16.msra.mxu1 %v9638_v7  ;;  %9347 = vmatprep.subr.bf16.mxu0 %v9639_v8  ;;  %v9654_v23 = vld [vmem:[%s11834_s1 + $0xa8] sm:$0xff]   ;;  %v9655_v24 = vld [vmem:[%s11834_s1 + $0x70] sm:$0xff]   ;;  %v9659_v28 = vld [vmem:[%s11834_s1 + $0x78] sm:$0xff]  }
  0x9b   :  { %9369 = vmatprep.subr.bf16.mxu1 %v9640_v9  ;;  %v9656_v25 = vld [vmem:[%s11834_s1 + $0xf0] sm:$0xff]   ;;  %v9660_v29 = vld [vmem:[%s11834_s1 + $0xf8] sm:$0xff]   ;;  %v143_v32 = vld [vmem:[%s11833_s0 + $0x8] sm:$0xff] }
  0x9c   :  { %v9657_v26 = vld [vmem:[%s11834_s1 + $0x30] sm:$0xff]   ;;  %v9661_v30 = vld [vmem:[%s11834_s1 + $0x38] sm:$0xff]   ;;  %v151_v33 = vld [vmem:[%s11833_s0 + $0x48] sm:$0xff] }
  0x9d   :  { %9348 = vmatpush3.bf16.msra.mxu0 %v9641_v10  ;;  %v9658_v27 = vld [vmem:[%s11834_s1 + $0xb0] sm:$0xff]   ;;  %v9662_v31 = vld [vmem:[%s11834_s1 + $0xb8] sm:$0xff]   ;;  %v159_v35 = vpack.c.bf16 %v151_v33, %v143_v32  ;;  %v142_v37 = vld [vmem:[%s11833_s0] sm:$0xff] }
  0x9e   :  { %9370 = vmatpush3.bf16.msra.mxu1 %v9642_v11  ;;  %9349 = vmatprep.subr.bf16.mxu0 %v9643_v12  ;;  %v145_v34 = vld [vmem:[%s11833_s0 + $0x18] sm:$0xff]  ;;  %v150_v38 = vld [vmem:[%s11833_s0 + $0x40] sm:$0xff]  ;;  %v144_v41 = vld [vmem:[%s11833_s0 + $0x10] sm:$0xff] }
  0x9f   :  { %9371 = vmatprep.subr.bf16.mxu1 %v9644_v13  ;;  %v153_v36 = vld [vmem:[%s11833_s0 + $0x58] sm:$0xff]  ;;  %v158_v40 = vpack.c.bf16 %v150_v38, %v142_v37  ;;  %v152_v42 = vld [vmem:[%s11833_s0 + $0x50] sm:$0xff]  ;;  %717 = vmatprep.mubr.bf16.mxu0 %v159_v35  ;;  %v9663_v44 = vld [vmem:[%s11834_s1 + $0x140] sm:$0xff]  }
  0xa0   :  { %v161_v39 = vpack.c.bf16 %v153_v36, %v145_v34  ;;  %v160_v43 = vpack.c.bf16 %v152_v42, %v144_v41  ;;  %v9664_v45 = vld [vmem:[%s11834_s1 + $0x1c0] sm:$0xff]   ;;  %v9667_v48 = vld [vmem:[%s11834_s1 + $0x148] sm:$0xff]   ;;  %v9671_v52 = vld [vmem:[%s11834_s1 + $0x150] sm:$0xff]  }
  0xa1   :  { %9350 = vmatpush3.bf16.msra.mxu0 %v9645_v14  ;;  %v9665_v46 = vld [vmem:[%s11834_s1 + $0x100] sm:$0xff]   ;;  %v9668_v49 = vld [vmem:[%s11834_s1 + $0x1c8] sm:$0xff]   ;;  %v9672_v53 = vld [vmem:[%s11834_s1 + $0x1d0] sm:$0xff]  }
  0xa2   :  { %9372 = vmatpush3.bf16.msra.mxu1 %v9646_v15  ;;  %9351 = vmatprep.subr.bf16.mxu0 %v9647_v16  ;;  %v9666_v47 = vld [vmem:[%s11834_s1 + $0x180] sm:$0xff]   ;;  %v9669_v50 = vld [vmem:[%s11834_s1 + $0x108] sm:$0xff]   ;;  %v9673_v54 = vld [vmem:[%s11834_s1 + $0x110] sm:$0xff]  }
  0xa3   :  { %9373 = vmatprep.subr.bf16.mxu1 %v9648_v17  ;;  %758 = vmatprep.mubr.bf16.mxu1 %v161_v39  ;;  %v9670_v51 = vld [vmem:[%s11834_s1 + $0x188] sm:$0xff]   ;;  %v9674_v55 = vld [vmem:[%s11834_s1 + $0x190] sm:$0xff]   ;;  %v9675_v56 = vld [vmem:[%s11834_s1 + $0x158] sm:$0xff]  }
  0xa4   :  { %v9676_v57 = vld [vmem:[%s11834_s1 + $0x1d8] sm:$0xff]   ;;  %v9679_v60 = vld [vmem:[%s11834_s1 + $0x160] sm:$0xff]   ;;  %v9683_v0 = vld [vmem:[%s11834_s1 + $0x168] sm:$0xff]  }
  0xa5   :  { %9352 = vmatpush3.bf16.msra.mxu0 %v9649_v18  ;;  %v9677_v58 = vld [vmem:[%s11834_s1 + $0x118] sm:$0xff]   ;;  %v9680_v61 = vld [vmem:[%s11834_s1 + $0x1e0] sm:$0xff]   ;;  %v9684_v1 = vld [vmem:[%s11834_s1 + $0x1e8] sm:$0xff]  }
  0xa6   :  { %9374 = vmatpush3.bf16.msra.mxu1 %v9650_v19  ;;  %9353 = vmatprep.subr.bf16.mxu0 %v9651_v20  ;;  %v9678_v59 = vld [vmem:[%s11834_s1 + $0x198] sm:$0xff]   ;;  %v9681_v62 = vld [vmem:[%s11834_s1 + $0x120] sm:$0xff]   ;;  %v9685_v2 = vld [vmem:[%s11834_s1 + $0x128] sm:$0xff]  }
  0xa7   :  { %9375 = vmatprep.subr.bf16.mxu1 %v9652_v21  ;;  %v9682_v63 = vld [vmem:[%s11834_s1 + $0x1a0] sm:$0xff]   ;;  %v9686_v3 = vld [vmem:[%s11834_s1 + $0x1a8] sm:$0xff]   ;;  %v9687_v4 = vld [vmem:[%s11834_s1 + $0x170] sm:$0xff]  }
  0xa8   :  { %v9688_v5 = vld [vmem:[%s11834_s1 + $0x1f0] sm:$0xff]   ;;  %v9691_v8 = vld [vmem:[%s11834_s1 + $0x178] sm:$0xff]   ;;  %v147_v12 = vld [vmem:[%s11833_s0 + $0x28] sm:$0xff] }
  0xa9   :  { %9354 = vmatpush3.bf16.msra.mxu0 %v9653_v22  ;;  %v9689_v6 = vld [vmem:[%s11834_s1 + $0x130] sm:$0xff]   ;;  %v9692_v9 = vld [vmem:[%s11834_s1 + $0x1f8] sm:$0xff]   ;;  %v155_v13 = vld [vmem:[%s11833_s0 + $0x68] sm:$0xff] }
  0xaa   :  { %9376 = vmatpush3.bf16.msra.mxu1 %v9654_v23  ;;  %9355 = vmatprep.subr.bf16.mxu0 %v9655_v24  ;;  %v9690_v7 = vld [vmem:[%s11834_s1 + $0x1b0] sm:$0xff]   ;;  %v9693_v10 = vld [vmem:[%s11834_s1 + $0x138] sm:$0xff]   ;;  %v163_v16 = vpack.c.bf16 %v155_v13, %v147_v12  ;;  %v146_v18 = vld [vmem:[%s11833_s0 + $0x20] sm:$0xff] }
  0xab   :  { %9377 = vmatprep.subr.bf16.mxu1 %v9656_v25  ;;  %v9694_v11 = vld [vmem:[%s11834_s1 + $0x1b8] sm:$0xff]   ;;  %v154_v19 = vld [vmem:[%s11833_s0 + $0x60] sm:$0xff]  ;;  %v148_v20 = vld [vmem:[%s11833_s0 + $0x30] sm:$0xff] }
  0xac   :  { %v149_v14 = vld [vmem:[%s11833_s0 + $0x38] sm:$0xff]  ;;  %v162_v21 = vpack.c.bf16 %v154_v19, %v146_v18  ;;  %v156_v22 = vld [vmem:[%s11833_s0 + $0x70] sm:$0xff] }
  0xad   :  { %9356 = vmatpush3.bf16.msra.mxu0 %v9657_v26  ;;  %v157_v15 = vld [vmem:[%s11833_s0 + $0x78] sm:$0xff]  ;;  %v164_v23 = vpack.c.bf16 %v156_v22, %v148_v20  ;;  %v9695_v25 = vld [vmem:[#allocation4] ss:$16 sps:$4 sm:$0xff]  }
  0xae   :  { %9378 = vmatpush3.bf16.msra.mxu1 %v9658_v27  ;;  %9357 = vmatprep.subr.bf16.mxu0 %v9659_v28  ;;  %v165_v17 = vpack.c.bf16 %v157_v15, %v149_v14  ;;  %v9697_v24 = vld [vmem:[#allocation4 + $0x4] ss:$16 sps:$4 sm:$0xff]   ;;  %v9698_v27 = vld [vmem:[#allocation4 + $0x20] ss:$16 sps:$4 sm:$0xff]   ;;  %v11289_v28 = vmov 0  }
  0xaf   :  { %9379 = vmatprep.subr.bf16.mxu1 %v9660_v29  ;;  %v9700_v26 = vld [vmem:[#allocation4 + $0x24] ss:$16 sps:$4 sm:$0xff]   ;;  %v9703_v29 = vld [vmem:[#allocation4 + $0xc] ss:$16 sps:$4 sm:$0xff]   ;;  %v9715_v32 = vld [vmem:[#allocation7 + $0x24] ss:$16 sps:$4 sm:$0xff]  }
  0xb0   :  { %v9713_v33 = vld [vmem:[#allocation7 + $0x20] ss:$16 sps:$4 sm:$0xff]   ;;  %v9721_v34 = vld [vmem:[#allocation7 + $0x44] ss:$16 sps:$4 sm:$0xff]  }
  0xb1   :  { %9358 = vmatpush3.bf16.msra.mxu0 %v9661_v30  ;;  %v9707_v30 = vld [vmem:[#allocation7] ss:$16 sps:$4 sm:$0xff]   ;;  %v9727_v36 = vld [vmem:[#allocation7 + $0x64] ss:$16 sps:$4 sm:$0xff]  }
  0xb2   :  { %9380 = vmatpush3.bf16.msra.mxu1 %v9662_v31  ;;  %9387 = vmatprep.subr.bf16.mxu0 %v9663_v44  ;;  %v9709_v31 = vld [vmem:[#allocation7 + $0x4] ss:$16 sps:$4 sm:$0xff]   ;;  %v9719_v35 = vld [vmem:[#allocation7 + $0x40] ss:$16 sps:$4 sm:$0xff]  }
  0xb3   :  { %9409 = vmatprep.subr.bf16.mxu1 %v9664_v45  ;;  %v9725_v37 = vld [vmem:[#allocation7 + $0x60] ss:$16 sps:$4 sm:$0xff]   ;;  %v9733_v38 = vld [vmem:[#allocation7 + $0x84] ss:$16 sps:$4 sm:$0xff]  }
  0xb4   :  { %718 = vmatmul.mubr.bf16.vlgmr.msra.gmra.mrb[0].mxu0 %v158_v40  ;;  %v9731_v39 = vld [vmem:[#allocation7 + $0x80] ss:$16 sps:$4 sm:$0xff]   ;;  %v9739_v40 = vld [vmem:[#allocation7 + $0xa4] ss:$16 sps:$4 sm:$0xff]  }
  0xb5   :  { %759 = vmatmul.mubr.bf16.vlgmr.msra.gmra.mrb[0].mxu1 %v160_v43  ;;  %9388 = vmatpush3.bf16.msra.mxu0 %v9665_v46  ;;  %v9737_v41 = vld [vmem:[#allocation7 + $0xa0] ss:$16 sps:$4 sm:$0xff]   ;;  %v9745_v42 = vld [vmem:[#allocation7 + $0xc4] ss:$16 sps:$4 sm:$0xff]  }
  0xb6   :  { %9410 = vmatpush3.bf16.msra.mxu1 %v9666_v47  ;;  %9389 = vmatprep.subr.bf16.mxu0 %v9667_v48  ;;  %v9743_v43 = vld [vmem:[#allocation7 + $0xc0] ss:$16 sps:$4 sm:$0xff]   ;;  %v9751_v44 = vld [vmem:[#allocation7 + $0xe4] ss:$16 sps:$4 sm:$0xff]  }
  0xb7   :  { %9411 = vmatprep.subr.bf16.mxu1 %v9668_v49  ;;  %799 = vmatprep.mubr.bf16.mxu0 %v163_v16  ;;  %v9749_v45 = vld [vmem:[#allocation7 + $0xe0] ss:$16 sps:$4 sm:$0xff]   ;;  %v9757_v46 = vld [vmem:[#allocation7 + $0x104] ss:$16 sps:$4 sm:$0xff]  }
  0xb8   :  { %840 = vmatprep.mubr.bf16.mxu1 %v165_v17  ;;  %v9755_v47 = vld [vmem:[#allocation7 + $0x100] ss:$16 sps:$4 sm:$0xff]   ;;  %v9763_v48 = vld [vmem:[#allocation7 + $0x124] ss:$16 sps:$4 sm:$0xff]  }
  0xb9   :  { %9390 = vmatpush3.bf16.msra.mxu0 %v9669_v50  ;;  %v9761_v49 = vld [vmem:[#allocation7 + $0x120] ss:$16 sps:$4 sm:$0xff]   ;;  %v9769_v50 = vld [vmem:[#allocation7 + $0x144] ss:$16 sps:$4 sm:$0xff]  }
  0xba   :  { %9412 = vmatpush3.bf16.msra.mxu1 %v9670_v51  ;;  %9391 = vmatprep.subr.bf16.mxu0 %v9671_v52  ;;  %v9767_v51 = vld [vmem:[#allocation7 + $0x140] ss:$16 sps:$4 sm:$0xff]   ;;  %v9775_v52 = vld [vmem:[#allocation7 + $0x164] ss:$16 sps:$4 sm:$0xff]  }
  0xbb   :  { %9413 = vmatprep.subr.bf16.mxu1 %v9672_v53  ;;  %v9773_v53 = vld [vmem:[#allocation7 + $0x160] ss:$16 sps:$4 sm:$0xff]  }
  0xbd   :  { %9392 = vmatpush3.bf16.msra.mxu0 %v9673_v54  ;;  %v9781_v54 = vld [vmem:[#allocation7 + $0x184] ss:$16 sps:$4 sm:$0xff]  }
  0xbe   :  { %9414 = vmatpush3.bf16.msra.mxu1 %v9674_v55  ;;  %9393 = vmatprep.subr.bf16.mxu0 %v9675_v56  ;;  %v9779_v55 = vld [vmem:[#allocation7 + $0x180] ss:$16 sps:$4 sm:$0xff]   ;;  %v9787_v56 = vld [vmem:[#allocation7 + $0x1a4] ss:$16 sps:$4 sm:$0xff]  }
  0xbf   :  { %9415 = vmatprep.subr.bf16.mxu1 %v9676_v57  ;;  %v9785_v57 = vld [vmem:[#allocation7 + $0x1a0] ss:$16 sps:$4 sm:$0xff]  }
  0xc1   :  { %9394 = vmatpush3.bf16.msra.mxu0 %v9677_v58  ;;  %v8330_v58 = vld [vmem:[#allocation2] ss:$0 sm:$0xff] }
  0xc2   :  { %9416 = vmatpush3.bf16.msra.mxu1 %v9678_v59  ;;  %9395 = vmatprep.subr.bf16.mxu0 %v9679_v60 }
  0xc3   :  { %9417 = vmatprep.subr.bf16.mxu1 %v9680_v61 }
  0xc5   :  { %9396 = vmatpush3.bf16.msra.mxu0 %v9681_v62 }
  0xc6   :  { %9418 = vmatpush3.bf16.msra.mxu1 %v9682_v63  ;;  %9397 = vmatprep.subr.bf16.mxu0 %v9683_v0 }
  0xc7   :  { %9419 = vmatprep.subr.bf16.mxu1 %v9684_v1 }
  0xc9   :  { %9398 = vmatpush3.bf16.msra.mxu0 %v9685_v2 }
  0xca   :  { %9420 = vmatpush3.bf16.msra.mxu1 %v9686_v3  ;;  %9399 = vmatprep.subr.bf16.mxu0 %v9687_v4 }
  0xcb   :  { %9421 = vmatprep.subr.bf16.mxu1 %v9688_v5 }
  0xcd   :  { %9400 = vmatpush3.bf16.msra.mxu0 %v9689_v6 }
  0xce   :  { %9422 = vmatpush3.bf16.msra.mxu1 %v9690_v7  ;;  %9401 = vmatprep.subr.bf16.mxu0 %v9691_v8 }
  0xcf   :  { %9423 = vmatprep.subr.bf16.mxu1 %v9692_v9 }
  0xd1   :  { %9402 = vmatpush3.bf16.msra.mxu0 %v9693_v10 }
  0xd2   :  { %9424 = vmatpush3.bf16.msra.mxu1 %v9694_v11  ;;  %1814 = vmatprep.subr.bf16.mxu0 %v9709_v31  ;;  %v9704_v31 = vld [vmem:[#allocation4 + $0x28] ss:$16 sps:$4 sm:$0xff]  }
  0xd3   :  { %926 = vmatprep.subr.bf16.mxu1 %v9697_v24 }
  0xd4   :  { %800 = vmatmul.mubr.bf16.vlgmr.msra.gmra.mrb[4].mxu0 %v162_v21 }
  0xd5   :  { %841 = vmatmul.mubr.bf16.vlgmr.msra.gmra.mrb[4].mxu1 %v164_v23  ;;  %1815 = vmatpush1.bf16.msra.mxu0 %v9707_v30 }
  0xd6   :  { %927 = vmatpush1.bf16.msra.mxu1 %v9695_v25  ;;  %958 = vmatprep.mubr.bf16.mxu1 %v11289_v28 }
  0xd7   :  { %928 = vmatprep.subr.bf16.mxu1 %v9700_v26  ;;  %1816 = vmatprep.subr.bf16.mxu0 %v9715_v32  ;;  %v9701_v26 = vld [vmem:[#allocation4 + $0x8] ss:$16 sps:$4 sm:$0xff]   ;;  %v9712_v32 = vld [vmem:[#allocation7 + $0xc] ss:$16 sps:$4 sm:$0xff]  }
  0xd9   :  { %1817 = vmatpush1.bf16.msra.mxu0 %v9713_v33  ;;  %v9710_v33 = vld [vmem:[#allocation7 + $0x8] ss:$16 sps:$4 sm:$0xff]  }
  0xda   :  { %929 = vmatpush1.bf16.msra.mxu1 %v9698_v27  ;;  %1818 = vmatprep.subr.bf16.mxu0 %v9721_v34  ;;  %v9718_v34 = vld [vmem:[#allocation7 + $0x2c] ss:$16 sps:$4 sm:$0xff]  }
  0xdb   :  { %969 = vmatprep.subr.bf16.mxu1 %v9703_v29  ;;  %v9706_v29 = vld [vmem:[#allocation4 + $0x2c] ss:$16 sps:$4 sm:$0xff]  }
  0xdd   :  { %1819 = vmatpush1.bf16.msra.mxu0 %v9719_v35  ;;  %v9716_v35 = vld [vmem:[#allocation7 + $0x28] ss:$16 sps:$4 sm:$0xff]  }
  0xde   :  { %1820 = vmatprep.subr.bf16.mxu0 %v9727_v36  ;;  %v9724_v36 = vld [vmem:[#allocation7 + $0x4c] ss:$16 sps:$4 sm:$0xff]  }
  0xe1   :  { %1821 = vmatpush1.bf16.msra.mxu0 %v9725_v37  ;;  %v9722_v37 = vld [vmem:[#allocation7 + $0x48] ss:$16 sps:$4 sm:$0xff]  }
  0xe2   :  { %1822 = vmatprep.subr.bf16.mxu0 %v9733_v38  ;;  %v9730_v38 = vld [vmem:[#allocation7 + $0x6c] ss:$16 sps:$4 sm:$0xff]  }
  0xe5   :  { %1823 = vmatpush1.bf16.msra.mxu0 %v9731_v39  ;;  %v9728_v39 = vld [vmem:[#allocation7 + $0x68] ss:$16 sps:$4 sm:$0xff]  }
  0xe6   :  { %1824 = vmatprep.subr.bf16.mxu0 %v9739_v40  ;;  %v9736_v40 = vld [vmem:[#allocation7 + $0x8c] ss:$16 sps:$4 sm:$0xff]  }
  0xe9   :  { %1825 = vmatpush1.bf16.msra.mxu0 %v9737_v41  ;;  %v9742_v41 = vld [vmem:[#allocation7 + $0xac] ss:$16 sps:$4 sm:$0xff]  }
  0xea   :  { %1826 = vmatprep.subr.bf16.mxu0 %v9745_v42  ;;  %v9740_v42 = vld [vmem:[#allocation7 + $0xa8] ss:$16 sps:$4 sm:$0xff]  }
  0xed   :  { %1827 = vmatpush1.bf16.msra.mxu0 %v9743_v43  ;;  %v9748_v43 = vld [vmem:[#allocation7 + $0xcc] ss:$16 sps:$4 sm:$0xff]  }
  0xee   :  { %1828 = vmatprep.subr.bf16.mxu0 %v9751_v44  ;;  %v9746_v44 = vld [vmem:[#allocation7 + $0xc8] ss:$16 sps:$4 sm:$0xff]  }
  0xf1   :  { %1829 = vmatpush1.bf16.msra.mxu0 %v9749_v45  ;;  %v9754_v45 = vld [vmem:[#allocation7 + $0xec] ss:$16 sps:$4 sm:$0xff]  }
  0xf2   :  { %1830 = vmatprep.subr.bf16.mxu0 %v9757_v46  ;;  %v9752_v46 = vld [vmem:[#allocation7 + $0xe8] ss:$16 sps:$4 sm:$0xff]  }
  0xf5   :  { %1831 = vmatpush1.bf16.msra.mxu0 %v9755_v47  ;;  %v9760_v47 = vld [vmem:[#allocation7 + $0x10c] ss:$16 sps:$4 sm:$0xff]  }
  0xf6   :  { %1832 = vmatprep.subr.bf16.mxu0 %v9763_v48  ;;  %v9758_v48 = vld [vmem:[#allocation7 + $0x108] ss:$16 sps:$4 sm:$0xff]  }
  0xf9   :  { %1833 = vmatpush1.bf16.msra.mxu0 %v9761_v49  ;;  %v9766_v49 = vld [vmem:[#allocation7 + $0x12c] ss:$16 sps:$4 sm:$0xff]  }
  0xfa   :  { %1834 = vmatprep.subr.bf16.mxu0 %v9769_v50  ;;  %v9764_v50 = vld [vmem:[#allocation7 + $0x128] ss:$16 sps:$4 sm:$0xff]  }
  0xfd   :  { %1835 = vmatpush1.bf16.msra.mxu0 %v9767_v51  ;;  %v9772_v51 = vld [vmem:[#allocation7 + $0x14c] ss:$16 sps:$4 sm:$0xff]  }
  0xfe   :  { %1836 = vmatprep.subr.bf16.mxu0 %v9775_v52  ;;  %v9770_v52 = vld [vmem:[#allocation7 + $0x148] ss:$16 sps:$4 sm:$0xff]  }
 0x101   :  { %1837 = vmatpush1.bf16.msra.mxu0 %v9773_v53  ;;  %v9778_v53 = vld [vmem:[#allocation7 + $0x16c] ss:$16 sps:$4 sm:$0xff]  }
 0x102   :  { %1838 = vmatprep.subr.bf16.mxu0 %v9781_v54  ;;  %v9776_v54 = vld [vmem:[#allocation7 + $0x168] ss:$16 sps:$4 sm:$0xff]  }
 0x105   :  { %1839 = vmatpush1.bf16.msra.mxu0 %v9779_v55  ;;  %v9784_v55 = vld [vmem:[#allocation7 + $0x18c] ss:$16 sps:$4 sm:$0xff]  }
 0x106   :  { %1840 = vmatprep.subr.bf16.mxu0 %v9787_v56  ;;  %v9782_v56 = vld [vmem:[#allocation7 + $0x188] ss:$16 sps:$4 sm:$0xff]  }
 0x109   :  { %1841 = vmatpush1.bf16.msra.mxu0 %v9785_v57  ;;  %v9790_v57 = vld [vmem:[#allocation7 + $0x1ac] ss:$16 sps:$4 sm:$0xff]  }
 0x187   :  { %v9359_v59 = vpop.f32.mrb[0].mxu0 }
 0x188   :  { %v9381_v60 = vpop.f32.mrb[0].mxu1  ;;  %v9360_v61 = vpop.f32.mrb[1].mxu0 }
 0x189   :  { %v9361_v62 = vadd.f32 %v9360_v61, %v9359_v59  ;;  %v9382_v63 = vpop.f32.mrb[1].mxu1  ;;  %v9362_v0 = vpop.f32.mrb[2].mxu0  ;;  %v9793_v59 = vld [vmem:[#allocation7 + $0x1c4] ss:$16 sps:$4 sm:$0xff]   ;;  %v9791_v61 = vld [vmem:[#allocation7 + $0x1c0] ss:$16 sps:$4 sm:$0xff]  }
 0x18a   :  { %v9383_v1 = vadd.f32 %v9382_v63, %v9381_v60  ;;  %v9384_v2 = vpop.f32.mrb[2].mxu1  ;;  %v9363_v3 = vpop.f32.mrb[3].mxu0  ;;  %v9796_v60 = vld [vmem:[#allocation7 + $0x1cc] ss:$16 sps:$4 sm:$0xff]   ;;  %1842 = vmatprep.subr.bf16.mxu0 %v9793_v59  ;;  %v9799_v63 = vld [vmem:[#allocation7 + $0x1e4] ss:$16 sps:$4 sm:$0xff]  }
 0x18b   :  { %v720_v4 = vadd.f32 %v9361_v62, %v8330_v58  ;;  %v9364_v5 = vadd.f32 %v9363_v3, %v9362_v0  ;;  %v9385_v6 = vpop.f32.mrb[3].mxu1  ;;  %v9794_v62 = vld [vmem:[#allocation7 + $0x1c8] ss:$16 sps:$4 sm:$0xff]   ;;  %1843 = vmatpush1.bf16.msra.mxu0 %v9791_v61  ;;  %v9802_v0 = vld [vmem:[#allocation7 + $0x1ec] ss:$16 sps:$4 sm:$0xff]  }
 0x18c   :  { %v9386_v7 = vadd.f32 %v9385_v6, %v9384_v2  ;;  %v9800_v2 = vld [vmem:[#allocation7 + $0x1e8] ss:$16 sps:$4 sm:$0xff]   ;;  %1844 = vmatprep.subr.bf16.mxu0 %v9799_v63  ;;  %v9805_v3 = vld [vmem:[#allocation7 + $0x204] ss:$16 sps:$4 sm:$0xff]   ;;  %v9832_v59 = vld [vmem:[#allocation7 + $0x28c] ss:$16 sps:$4 sm:$0xff]  }
 0x18d   :  { %v761_v8 = vadd.f32 %v9383_v1, %v720_v4  ;;  %v723_v9 = vadd.f32 %v9364_v5, %v8330_v58  ;;  %v9788_v58 = vld [vmem:[#allocation7 + $0x1a8] ss:$16 sps:$4 sm:$0xff]   ;;  %v9797_v1 = vld [vmem:[#allocation7 + $0x1e0] ss:$16 sps:$4 sm:$0xff]   ;;  %v9808_v4 = vld [vmem:[#allocation7 + $0x20c] ss:$16 sps:$4 sm:$0xff]   ;;  %v863_v5 = vlaneseq }
 0x18e   :  { %v9830_v61 = vld [vmem:[#allocation7 + $0x288] ss:$16 sps:$4 sm:$0xff]   ;;  %v9838_v63 = vld [vmem:[#allocation7 + $0x2ac] ss:$16 sps:$4 sm:$0xff]  }
 0x18f   :  { %v764_v10 = vadd.f32 %v9386_v7, %v723_v9  ;;  %1845 = vmatpush1.bf16.msra.mxu0 %v9797_v1  ;;  %v864_v6 = vshrl.u32 %v863_v5, 7  ;;  %v9836_v1 = vld [vmem:[#allocation7 + $0x2a8] ss:$16 sps:$4 sm:$0xff]  }
 0x190   :  { %1857 = vmatprep.subr.bf16.mxu0 %v9805_v3  ;;  %v9844_v3 = vld [vmem:[#allocation7 + $0x2cc] ss:$16 sps:$4 sm:$0xff]   ;;  %v9842_v5 = vld [vmem:[#allocation7 + $0x2c8] ss:$16 sps:$4 sm:$0xff]  }
 0x191   :  { %v11726_v7 = vsub.s32 0, %v864_v6  ;;  %v11728_v9 = vsub.s32 1, %v864_v6 }
 0x1a7   :  { %v9403_v11 = vpop.f32.mrb[4].mxu0 }
 0x1a8   :  { %v9425_v12 = vpop.f32.mrb[4].mxu1  ;;  %v9404_v13 = vpop.f32.mrb[5].mxu0 }
 0x1a9   :  { %v9405_v14 = vadd.f32 %v9404_v13, %v9403_v11  ;;  %v9426_v15 = vpop.f32.mrb[5].mxu1  ;;  %v9406_v16 = vpop.f32.mrb[6].mxu0 }
 0x1aa   :  { %v9427_v17 = vadd.f32 %v9426_v15, %v9425_v12  ;;  %v9428_v18 = vpop.f32.mrb[6].mxu1  ;;  %v9407_v19 = vpop.f32.mrb[7].mxu0  ;;  %v11732_v15 = vsub.s32 2, %v864_v6 }
 0x1ab   :  { %v802_v20 = vadd.f32 %v9405_v14, %v761_v8  ;;  %v9408_v21 = vadd.f32 %v9407_v19, %v9406_v16  ;;  %v9429_v22 = vpop.f32.mrb[7].mxu1  ;;  %v861_v8 = vld [vmem:[#allocation6] sm:$0xf] }
 0x1ac   :  { %v9430_v23 = vadd.f32 %v9429_v22, %v9428_v18  ;;  %v870_v11 = vrot.slane %v861_v8, %v11728_v9  ;;  %v11734_v18 = vsub.s32 3, %v864_v6  ;;  %v9847_v6 = vld [vmem:[#allocation7 + $0x2e4] ss:$16 sps:$4 sm:$0xff]  }
 0x1ad   :  { %v843_v24 = vadd.f32 %v9427_v17, %v802_v20  ;;  %v805_v25 = vadd.f32 %v9408_v21, %v764_v10  ;;  %v866_v10 = vrot.slane %v861_v8, %v11726_v7 }
 0x1af   :  { %v846_v27 = vadd.f32 %v9430_v23, %v805_v25  ;;  %850 = vst.msk [vmem:[%s11844_s11] sm:$0xff] %vm849_vm0, %v843_v24 }
 0x1b1   :  { %v852_v30 = vpack.c.bf16 %v846_v27, %v843_v24  ;;  %851 = vst.msk [vmem:[%s11844_s11 + $0x8] sm:$0xff] %vm849_vm0, %v846_v27  ;;  %v874_v24 = vrot.slane %v861_v8, %v11732_v15  ;;  %v878_v27 = vrot.slane %v861_v8, %v11734_v18  ;;  %v9850_v8 = vld [vmem:[#allocation7 + $0x2ec] ss:$16 sps:$4 sm:$0xff]  }
 0x1b3   :  { %8403 = vmatmul.mubr.msk.bf16.vlgmr.msra.gmra.mrb[8].mxu1 %vm849_vm0, %v852_v30 }
 0x1b4   :  { %970 = vmatpush1.bf16.msra.mxu1 %v9701_v26  ;;  %1001 = vmatprep.mubr.bf16.mxu1 %v11289_v28  ;;  %v9734_v28 = vld [vmem:[#allocation7 + $0x88] ss:$16 sps:$4 sm:$0xff]  }
 0x1b5   :  { %971 = vmatprep.subr.bf16.mxu1 %v9706_v29 }
 0x1b8   :  { %972 = vmatpush1.bf16.msra.mxu1 %v9704_v31 }
 0x1b9   :  { %1900 = vmatprep.subr.bf16.mxu1 %v9712_v32  ;;  %v9803_v32 = vld [vmem:[#allocation7 + $0x200] ss:$16 sps:$4 sm:$0xff]  }
 0x1bb   :  { %8404 = vmatmul.mubr.msk.bf16.vlgmr.msra.gmra.mrb[12].mxu1 %vm849_vm0, %v852_v30 }
 0x1bc   :  { %1901 = vmatpush1.bf16.msra.mxu1 %v9710_v33  ;;  %v9806_v33 = vld [vmem:[#allocation7 + $0x208] ss:$16 sps:$4 sm:$0xff]  }
 0x1bd   :  { %1902 = vmatprep.subr.bf16.mxu1 %v9718_v34 }
 0x1c0   :  { %1903 = vmatpush1.bf16.msra.mxu1 %v9716_v35 }
 0x1c1   :  { %1904 = vmatprep.subr.bf16.mxu1 %v9724_v36  ;;  %v9811_v36 = vld [vmem:[#allocation7 + $0x224] ss:$16 sps:$4 sm:$0xff]  }
 0x1c4   :  { %1905 = vmatpush1.bf16.msra.mxu1 %v9722_v37  ;;  %v9814_v37 = vld [vmem:[#allocation7 + $0x22c] ss:$16 sps:$4 sm:$0xff]  }
 0x1c5   :  { %1906 = vmatprep.subr.bf16.mxu1 %v9730_v38 }
 0x1c8   :  { %1907 = vmatpush1.bf16.msra.mxu1 %v9728_v39 }
 0x1c9   :  { %1908 = vmatprep.subr.bf16.mxu1 %v9736_v40 }
 0x1cc   :  { %1909 = vmatpush1.bf16.msra.mxu1 %v9734_v28 }
 0x1cd   :  { %1910 = vmatprep.subr.bf16.mxu1 %v9742_v41 }
 0x1d0   :  { %1911 = vmatpush1.bf16.msra.mxu1 %v9740_v42  ;;  %v9809_v42 = vld [vmem:[#allocation7 + $0x220] ss:$16 sps:$4 sm:$0xff]  }
 0x1d1   :  { %1912 = vmatprep.subr.bf16.mxu1 %v9748_v43  ;;  %v9812_v43 = vld [vmem:[#allocation7 + $0x228] ss:$16 sps:$4 sm:$0xff]  }
 0x1d4   :  { %1913 = vmatpush1.bf16.msra.mxu1 %v9746_v44 }
 0x1d5   :  { %1914 = vmatprep.subr.bf16.mxu1 %v9754_v45 }
 0x1d8   :  { %1915 = vmatpush1.bf16.msra.mxu1 %v9752_v46  ;;  %v9817_v46 = vld [vmem:[#allocation7 + $0x244] ss:$16 sps:$4 sm:$0xff]  }
 0x1d9   :  { %1916 = vmatprep.subr.bf16.mxu1 %v9760_v47  ;;  %v9820_v47 = vld [vmem:[#allocation7 + $0x24c] ss:$16 sps:$4 sm:$0xff]  }
 0x1dc   :  { %1917 = vmatpush1.bf16.msra.mxu1 %v9758_v48 }
 0x1dd   :  { %1918 = vmatprep.subr.bf16.mxu1 %v9766_v49 }
 0x1e0   :  { %1919 = vmatpush1.bf16.msra.mxu1 %v9764_v50 }
 0x1e1   :  { %1920 = vmatprep.subr.bf16.mxu1 %v9772_v51 }
 0x1e4   :  { %1921 = vmatpush1.bf16.msra.mxu1 %v9770_v52  ;;  %v9815_v52 = vld [vmem:[#allocation7 + $0x240] ss:$16 sps:$4 sm:$0xff]  }
 0x1e5   :  { %1922 = vmatprep.subr.bf16.mxu1 %v9778_v53  ;;  %v9818_v53 = vld [vmem:[#allocation7 + $0x248] ss:$16 sps:$4 sm:$0xff]  }
 0x1e8   :  { %1923 = vmatpush1.bf16.msra.mxu1 %v9776_v54  ;;  %v9823_v54 = vld [vmem:[#allocation7 + $0x264] ss:$16 sps:$4 sm:$0xff]  }
 0x1e9   :  { %1924 = vmatprep.subr.bf16.mxu1 %v9784_v55  ;;  %v9826_v55 = vld [vmem:[#allocation7 + $0x26c] ss:$16 sps:$4 sm:$0xff]  }
 0x1ec   :  { %1925 = vmatpush1.bf16.msra.mxu1 %v9782_v56  ;;  %v9821_v56 = vld [vmem:[#allocation7 + $0x260] ss:$16 sps:$4 sm:$0xff]  }
 0x1ed   :  { %1926 = vmatprep.subr.bf16.mxu1 %v9790_v57  ;;  %v9824_v57 = vld [vmem:[#allocation7 + $0x268] ss:$16 sps:$4 sm:$0xff]  }
 0x1f0   :  { %1927 = vmatpush1.bf16.msra.mxu1 %v9788_v58  ;;  %v9829_v58 = vld [vmem:[#allocation7 + $0x284] ss:$16 sps:$4 sm:$0xff]  }
 0x1f1   :  { %1928 = vmatprep.subr.bf16.mxu1 %v9796_v60  ;;  %v9827_v60 = vld [vmem:[#allocation7 + $0x280] ss:$16 sps:$4 sm:$0xff]  }
 0x1f4   :  { %1929 = vmatpush1.bf16.msra.mxu1 %v9794_v62  ;;  %v9835_v62 = vld [vmem:[#allocation7 + $0x2a4] ss:$16 sps:$4 sm:$0xff]  }
 0x1f5   :  { %1930 = vmatprep.subr.bf16.mxu1 %v9802_v0  ;;  %v9833_v0 = vld [vmem:[#allocation7 + $0x2a0] ss:$16 sps:$4 sm:$0xff]  }
 0x1f8   :  { %1931 = vmatpush1.bf16.msra.mxu1 %v9800_v2  ;;  %v9841_v2 = vld [vmem:[#allocation7 + $0x2c4] ss:$16 sps:$4 sm:$0xff]  }
 0x1f9   :  { %1943 = vmatprep.subr.bf16.mxu1 %v9808_v4  ;;  %v9839_v4 = vld [vmem:[#allocation7 + $0x2c0] ss:$16 sps:$4 sm:$0xff]  }
 0x286   :  { %v960_v12 = vpop.f32.mrb[8].mxu1 }
 0x287   :  { %v961_v13 = vadd.f32 %v960_v12, %v866_v10  ;;  %v962_v14 = vpop.f32.mrb[9].mxu1  ;;  %v9853_v12 = vld [vmem:[#allocation7 + $0x304] ss:$16 sps:$4 sm:$0xff]  }
 0x288   :  { %v963_v16 = vadd.f32 %v962_v14, %v870_v11  ;;  %v964_v17 = vpop.f32.mrb[10].mxu1  ;;  %v9851_v14 = vld [vmem:[#allocation7 + $0x300] ss:$16 sps:$4 sm:$0xff]  }
 0x289   :  { %v965_v19 = vadd.f32 %v964_v17, %v866_v10  ;;  %v966_v20 = vpop.f32.mrb[11].mxu1  ;;  %v1012_v22 = vmax.f32 %v961_v13, 0.0  ;;  %v9845_v10 = vld [vmem:[#allocation7 + $0x2e0] ss:$16 sps:$4 sm:$0xff]   ;;  %v9856_v13 = vld [vmem:[#allocation7 + $0x30c] ss:$16 sps:$4 sm:$0xff]  }
 0x28a   :  { %v967_v21 = vadd.f32 %v966_v20, %v870_v11  ;;  %v1013_v25 = vmax.f32 %v963_v16, 0.0  ;;  %v9848_v11 = vld [vmem:[#allocation7 + $0x2e8] ss:$16 sps:$4 sm:$0xff]   ;;  %v9859_v17 = vld [vmem:[#allocation7 + $0x324] ss:$16 sps:$4 sm:$0xff]  }
 0x28b   :  { %v1016_v23 = vmax.f32 %v965_v19, 0.0  ;;  %v9854_v16 = vld [vmem:[#allocation7 + $0x308] ss:$16 sps:$4 sm:$0xff]   ;;  %v9862_v19 = vld [vmem:[#allocation7 + $0x32c] ss:$16 sps:$4 sm:$0xff]  }
 0x28c   :  { %v1017_v26 = vmax.f32 %v967_v21, 0.0  ;;  %v9857_v20 = vld [vmem:[#allocation7 + $0x320] ss:$16 sps:$4 sm:$0xff]   ;;  %v9860_v21 = vld [vmem:[#allocation7 + $0x328] ss:$16 sps:$4 sm:$0xff]  }
 0x28d   :  { %v1020_v29 = vpack.c.bf16 %v1016_v23, %v1012_v22  ;;  %v9865_v22 = vld [vmem:[#allocation7 + $0x344] ss:$16 sps:$4 sm:$0xff]   ;;  %v9868_v23 = vld [vmem:[#allocation7 + $0x34c] ss:$16 sps:$4 sm:$0xff]  }
 0x28e   :  { %v1021_v30 = vpack.c.bf16 %v1017_v26, %v1013_v25  ;;  %v1003_v31 = vpop.f32.mrb[12].mxu1  ;;  %v9866_v25 = vld [vmem:[#allocation7 + $0x348] ss:$16 sps:$4 sm:$0xff]   ;;  %v9871_v26 = vld [vmem:[#allocation7 + $0x364] ss:$16 sps:$4 sm:$0xff]  }
 0x28f   :  { %v1004_v34 = vadd.f32 %v1003_v31, %v874_v24  ;;  %v1005_v35 = vpop.f32.mrb[13].mxu1  ;;  %v9877_v31 = vld [vmem:[#allocation7 + $0x384] ss:$16 sps:$4 sm:$0xff]  }
 0x290   :  { %v1006_v38 = vadd.f32 %v1005_v35, %v878_v27  ;;  %v1007_v39 = vpop.f32.mrb[14].mxu1  ;;  %1846 = vmatprep.mubr.bf16.mxu0 %v1021_v30  ;;  %1932 = vmatprep.mubr.bf16.mxu1 %v1021_v30  ;;  %v9872_v30 = vld [vmem:[#allocation7 + $0x368] ss:$16 sps:$4 sm:$0xff]   ;;  %v9883_v35 = vld [vmem:[#allocation7 + $0x3a4] ss:$16 sps:$4 sm:$0xff]  }
 0x291   :  { %v1008_v40 = vadd.f32 %v1007_v39, %v874_v24  ;;  %v1009_v28 = vpop.f32.mrb[15].mxu1  ;;  %1847 = vmatmul.mubr.bf16.vlgmr.msra.gmra.mrb[8].mxu0 %v1020_v29  ;;  %1933 = vmatmul.mubr.bf16.vlgmr.msra.gmra.mrb[16].mxu1 %v1020_v29  ;;  %v1014_v44 = vmax.f32 %v1004_v34, 0.0  ;;  %v9863_v24 = vld [vmem:[#allocation7 + $0x340] ss:$16 sps:$4 sm:$0xff]   ;;  %v9878_v34 = vld [vmem:[#allocation7 + $0x388] ss:$16 sps:$4 sm:$0xff]  }
 0x292   :  { %v1010_v41 = vadd.f32 %v1009_v28, %v878_v27  ;;  %1858 = vmatpush1.bf16.msra.mxu0 %v9803_v32  ;;  %1944 = vmatpush1.bf16.msra.mxu1 %v9806_v33  ;;  %v1015_v48 = vmax.f32 %v1006_v38, 0.0  ;;  %v9874_v27 = vld [vmem:[#allocation7 + $0x36c] ss:$16 sps:$4 sm:$0xff]   ;;  %v9869_v29 = vld [vmem:[#allocation7 + $0x360] ss:$16 sps:$4 sm:$0xff]  }
 0x293   :  { %v1018_v45 = vmax.f32 %v1008_v40, 0.0  ;;  %1859 = vmatprep.subr.bf16.mxu0 %v9811_v36  ;;  %1945 = vmatprep.subr.bf16.mxu1 %v9814_v37  ;;  %v9880_v32 = vld [vmem:[#allocation7 + $0x38c] ss:$16 sps:$4 sm:$0xff]   ;;  %v9875_v33 = vld [vmem:[#allocation7 + $0x380] ss:$16 sps:$4 sm:$0xff]  }
 0x294   :  { %v1019_v49 = vmax.f32 %v1010_v41, 0.0  ;;  %v9886_v36 = vld [vmem:[#allocation7 + $0x3ac] ss:$16 sps:$4 sm:$0xff]   ;;  %v9881_v37 = vld [vmem:[#allocation7 + $0x3a0] ss:$16 sps:$4 sm:$0xff]  }
 0x295   :  { %v11738_v50 = vpack.c.bf16 %v1018_v45, %v1014_v44  ;;  %v9884_v38 = vld [vmem:[#allocation7 + $0x3a8] ss:$16 sps:$4 sm:$0xff]   ;;  %v9889_v39 = vld [vmem:[#allocation7 + $0x3c4] ss:$16 sps:$4 sm:$0xff]   ;;  %v9892_v40 = vld [vmem:[#allocation7 + $0x3cc] ss:$16 sps:$4 sm:$0xff]  }
 0x296   :  { %v1023_v51 = vpack.c.bf16 %v1019_v49, %v1015_v48  ;;  %1860 = vmatpush1.bf16.msra.mxu0 %v9809_v42  ;;  %1946 = vmatpush1.bf16.msra.mxu1 %v9812_v43  ;;  %v9887_v28 = vld [vmem:[#allocation7 + $0x3c0] ss:$16 sps:$4 sm:$0xff]   ;;  %v9890_v41 = vld [vmem:[#allocation7 + $0x3c8] ss:$16 sps:$4 sm:$0xff]   ;;  %v9895_v42 = vld [vmem:[#allocation7 + $0x3e4] ss:$16 sps:$4 sm:$0xff]  }
 0x297   :  { %1861 = vmatprep.subr.bf16.mxu0 %v9817_v46  ;;  %1947 = vmatprep.subr.bf16.mxu1 %v9820_v47  ;;  %v9898_v43 = vld [vmem:[#allocation7 + $0x3ec] ss:$16 sps:$4 sm:$0xff]   ;;  %v9893_v44 = vld [vmem:[#allocation7 + $0x3e0] ss:$16 sps:$4 sm:$0xff]   ;;  %v9896_v45 = vld [vmem:[#allocation7 + $0x3e8] ss:$16 sps:$4 sm:$0xff]  }
 0x298   :  { %1889 = vmatprep.mubr.bf16.mxu0 %v1023_v51  ;;  %1975 = vmatprep.mubr.bf16.mxu1 %v1023_v51  ;;  %v9901_v46 = vld [vmem:[#allocation7 + $0x404] ss:$16 sps:$4 sm:$0xff]   ;;  %v9904_v47 = vld [vmem:[#allocation7 + $0x40c] ss:$16 sps:$4 sm:$0xff]   ;;  %v9899_v48 = vld [vmem:[#allocation7 + $0x400] ss:$16 sps:$4 sm:$0xff]  }
 0x299   :  { %v9902_v49 = vld [vmem:[#allocation7 + $0x408] ss:$16 sps:$4 sm:$0xff]   ;;  %v9907_v51 = vld [vmem:[#allocation7 + $0x424] ss:$16 sps:$4 sm:$0xff]  }
 0x29a   :  { %1862 = vmatpush1.bf16.msra.mxu0 %v9815_v52  ;;  %1948 = vmatpush1.bf16.msra.mxu1 %v9818_v53  ;;  %v9910_v52 = vld [vmem:[#allocation7 + $0x42c] ss:$16 sps:$4 sm:$0xff]   ;;  %v9905_v53 = vld [vmem:[#allocation7 + $0x420] ss:$16 sps:$4 sm:$0xff]  }
 0x29b   :  { %1863 = vmatprep.subr.bf16.mxu0 %v9823_v54  ;;  %1949 = vmatprep.subr.bf16.mxu1 %v9826_v55  ;;  %v9908_v54 = vld [vmem:[#allocation7 + $0x428] ss:$16 sps:$4 sm:$0xff]   ;;  %v9913_v55 = vld [vmem:[#allocation7 + $0x444] ss:$16 sps:$4 sm:$0xff]  }
 0x29e   :  { %1864 = vmatpush1.bf16.msra.mxu0 %v9821_v56  ;;  %1950 = vmatpush1.bf16.msra.mxu1 %v9824_v57  ;;  %v9916_v56 = vld [vmem:[#allocation7 + $0x44c] ss:$16 sps:$4 sm:$0xff]   ;;  %v9911_v57 = vld [vmem:[#allocation7 + $0x440] ss:$16 sps:$4 sm:$0xff]  }
 0x29f   :  { %1865 = vmatprep.subr.bf16.mxu0 %v9829_v58  ;;  %1951 = vmatprep.subr.bf16.mxu1 %v9832_v59  ;;  %v9914_v58 = vld [vmem:[#allocation7 + $0x448] ss:$16 sps:$4 sm:$0xff]   ;;  %v9919_v59 = vld [vmem:[#allocation7 + $0x464] ss:$16 sps:$4 sm:$0xff]  }
 0x2a2   :  { %1866 = vmatpush1.bf16.msra.mxu0 %v9827_v60  ;;  %1952 = vmatpush1.bf16.msra.mxu1 %v9830_v61  ;;  %v9922_v60 = vld [vmem:[#allocation7 + $0x46c] ss:$16 sps:$4 sm:$0xff]   ;;  %v9917_v61 = vld [vmem:[#allocation7 + $0x460] ss:$16 sps:$4 sm:$0xff]  }
 0x2a3   :  { %1867 = vmatprep.subr.bf16.mxu0 %v9835_v62  ;;  %1953 = vmatprep.subr.bf16.mxu1 %v9838_v63  ;;  %v9925_v62 = vld [vmem:[#allocation7 + $0x484] ss:$16 sps:$4 sm:$0xff]   ;;  %v9928_v63 = vld [vmem:[#allocation7 + $0x48c] ss:$16 sps:$4 sm:$0xff]  }
 0x2a6   :  { %1868 = vmatpush1.bf16.msra.mxu0 %v9833_v0  ;;  %1954 = vmatpush1.bf16.msra.mxu1 %v9836_v1  ;;  %v9923_v0 = vld [vmem:[#allocation7 + $0x480] ss:$16 sps:$4 sm:$0xff]   ;;  %v9926_v1 = vld [vmem:[#allocation7 + $0x488] ss:$16 sps:$4 sm:$0xff]  }
 0x2a7   :  { %1869 = vmatprep.subr.bf16.mxu0 %v9841_v2  ;;  %1955 = vmatprep.subr.bf16.mxu1 %v9844_v3  ;;  %v9931_v2 = vld [vmem:[#allocation7 + $0x4a4] ss:$16 sps:$4 sm:$0xff]   ;;  %v9934_v3 = vld [vmem:[#allocation7 + $0x4ac] ss:$16 sps:$4 sm:$0xff]  }
 0x2aa   :  { %1870 = vmatpush1.bf16.msra.mxu0 %v9839_v4  ;;  %1956 = vmatpush1.bf16.msra.mxu1 %v9842_v5  ;;  %v9929_v4 = vld [vmem:[#allocation7 + $0x4a0] ss:$16 sps:$4 sm:$0xff]   ;;  %v9932_v5 = vld [vmem:[#allocation7 + $0x4a8] ss:$16 sps:$4 sm:$0xff]  }
 0x2ab   :  { %1871 = vmatprep.subr.bf16.mxu0 %v9847_v6  ;;  %1957 = vmatprep.subr.bf16.mxu1 %v9850_v8  ;;  %v9937_v6 = vld [vmem:[#allocation7 + $0x4c4] ss:$16 sps:$4 sm:$0xff]   ;;  %v9940_v8 = vld [vmem:[#allocation7 + $0x4cc] ss:$16 sps:$4 sm:$0xff]  }
 0x2ae   :  { %1872 = vmatpush1.bf16.msra.mxu0 %v9845_v10  ;;  %1958 = vmatpush1.bf16.msra.mxu1 %v9848_v11  ;;  %v9935_v10 = vld [vmem:[#allocation7 + $0x4c0] ss:$16 sps:$4 sm:$0xff]   ;;  %v9938_v11 = vld [vmem:[#allocation7 + $0x4c8] ss:$16 sps:$4 sm:$0xff]  }
 0x2af   :  { %1873 = vmatprep.subr.bf16.mxu0 %v9853_v12  ;;  %1959 = vmatprep.subr.bf16.mxu1 %v9856_v13  ;;  %v9943_v12 = vld [vmem:[#allocation7 + $0x4e4] ss:$16 sps:$4 sm:$0xff]   ;;  %v9946_v13 = vld [vmem:[#allocation7 + $0x4ec] ss:$16 sps:$4 sm:$0xff]  }
 0x2b2   :  { %1874 = vmatpush1.bf16.msra.mxu0 %v9851_v14  ;;  %1960 = vmatpush1.bf16.msra.mxu1 %v9854_v16  ;;  %v9941_v14 = vld [vmem:[#allocation7 + $0x4e0] ss:$16 sps:$4 sm:$0xff]   ;;  %v9944_v16 = vld [vmem:[#allocation7 + $0x4e8] ss:$16 sps:$4 sm:$0xff]  }
 0x2b3   :  { %1875 = vmatprep.subr.bf16.mxu0 %v9859_v17  ;;  %1961 = vmatprep.subr.bf16.mxu1 %v9862_v19  ;;  %v9949_v17 = vld [vmem:[#allocation7 + $0x504] ss:$16 sps:$4 sm:$0xff]   ;;  %v9952_v19 = vld [vmem:[#allocation7 + $0x50c] ss:$16 sps:$4 sm:$0xff]  }
 0x2b6   :  { %1876 = vmatpush1.bf16.msra.mxu0 %v9857_v20  ;;  %1962 = vmatpush1.bf16.msra.mxu1 %v9860_v21  ;;  %v9947_v20 = vld [vmem:[#allocation7 + $0x500] ss:$16 sps:$4 sm:$0xff]   ;;  %v9950_v21 = vld [vmem:[#allocation7 + $0x508] ss:$16 sps:$4 sm:$0xff]  }
 0x2b7   :  { %1877 = vmatprep.subr.bf16.mxu0 %v9865_v22  ;;  %1963 = vmatprep.subr.bf16.mxu1 %v9868_v23  ;;  %v9955_v22 = vld [vmem:[#allocation7 + $0x524] ss:$16 sps:$4 sm:$0xff]   ;;  %v9958_v23 = vld [vmem:[#allocation7 + $0x52c] ss:$16 sps:$4 sm:$0xff]  }
 0x2ba   :  { %1878 = vmatpush1.bf16.msra.mxu0 %v9863_v24  ;;  %1964 = vmatpush1.bf16.msra.mxu1 %v9866_v25  ;;  %v9953_v24 = vld [vmem:[#allocation7 + $0x520] ss:$16 sps:$4 sm:$0xff]   ;;  %v9956_v25 = vld [vmem:[#allocation7 + $0x528] ss:$16 sps:$4 sm:$0xff]  }
 0x2bb   :  { %1879 = vmatprep.subr.bf16.mxu0 %v9871_v26  ;;  %1965 = vmatprep.subr.bf16.mxu1 %v9874_v27  ;;  %v9961_v26 = vld [vmem:[#allocation7 + $0x544] ss:$16 sps:$4 sm:$0xff]   ;;  %v9964_v27 = vld [vmem:[#allocation7 + $0x54c] ss:$16 sps:$4 sm:$0xff]  }
 0x2be   :  { %1880 = vmatpush1.bf16.msra.mxu0 %v9869_v29  ;;  %1966 = vmatpush1.bf16.msra.mxu1 %v9872_v30  ;;  %v9959_v29 = vld [vmem:[#allocation7 + $0x540] ss:$16 sps:$4 sm:$0xff]   ;;  %v9962_v30 = vld [vmem:[#allocation7 + $0x548] ss:$16 sps:$4 sm:$0xff]  }
 0x2bf   :  { %1881 = vmatprep.subr.bf16.mxu0 %v9877_v31  ;;  %1967 = vmatprep.subr.bf16.mxu1 %v9880_v32  ;;  %v9967_v31 = vld [vmem:[#allocation7 + $0x564] ss:$16 sps:$4 sm:$0xff]   ;;  %v9970_v32 = vld [vmem:[#allocation7 + $0x56c] ss:$16 sps:$4 sm:$0xff]  }
 0x2c2   :  { %1882 = vmatpush1.bf16.msra.mxu0 %v9875_v33  ;;  %1968 = vmatpush1.bf16.msra.mxu1 %v9878_v34  ;;  %v9965_v33 = vld [vmem:[#allocation7 + $0x560] ss:$16 sps:$4 sm:$0xff]   ;;  %v9968_v34 = vld [vmem:[#allocation7 + $0x568] ss:$16 sps:$4 sm:$0xff]  }
 0x2c3   :  { %1883 = vmatprep.subr.bf16.mxu0 %v9883_v35  ;;  %1969 = vmatprep.subr.bf16.mxu1 %v9886_v36  ;;  %v9973_v35 = vld [vmem:[#allocation7 + $0x584] ss:$16 sps:$4 sm:$0xff]   ;;  %v9976_v36 = vld [vmem:[#allocation7 + $0x58c] ss:$16 sps:$4 sm:$0xff]  }
 0x2c6   :  { %1884 = vmatpush1.bf16.msra.mxu0 %v9881_v37  ;;  %1970 = vmatpush1.bf16.msra.mxu1 %v9884_v38  ;;  %v9971_v37 = vld [vmem:[#allocation7 + $0x580] ss:$16 sps:$4 sm:$0xff]   ;;  %v9974_v38 = vld [vmem:[#allocation7 + $0x588] ss:$16 sps:$4 sm:$0xff]  }
 0x2c7   :  { %1885 = vmatprep.subr.bf16.mxu0 %v9889_v39  ;;  %1971 = vmatprep.subr.bf16.mxu1 %v9892_v40  ;;  %v9979_v39 = vld [vmem:[#allocation7 + $0x5a4] ss:$16 sps:$4 sm:$0xff]   ;;  %v9982_v40 = vld [vmem:[#allocation7 + $0x5ac] ss:$16 sps:$4 sm:$0xff]  }
 0x2ca   :  { %1886 = vmatpush1.bf16.msra.mxu0 %v9887_v28  ;;  %1972 = vmatpush1.bf16.msra.mxu1 %v9890_v41  ;;  %v9977_v28 = vld [vmem:[#allocation7 + $0x5a0] ss:$16 sps:$4 sm:$0xff]   ;;  %v9980_v41 = vld [vmem:[#allocation7 + $0x5a8] ss:$16 sps:$4 sm:$0xff]  }
 0x2cb   :  { %1887 = vmatprep.subr.bf16.mxu0 %v9895_v42  ;;  %1973 = vmatprep.subr.bf16.mxu1 %v9898_v43  ;;  %v9985_v42 = vld [vmem:[#allocation7 + $0x5c4] ss:$16 sps:$4 sm:$0xff]   ;;  %v9988_v43 = vld [vmem:[#allocation7 + $0x5cc] ss:$16 sps:$4 sm:$0xff]  }
 0x2ce   :  { %1888 = vmatpush1.bf16.msra.mxu0 %v9893_v44  ;;  %1974 = vmatpush1.bf16.msra.mxu1 %v9896_v45  ;;  %v9983_v44 = vld [vmem:[#allocation7 + $0x5c0] ss:$16 sps:$4 sm:$0xff]   ;;  %v9986_v45 = vld [vmem:[#allocation7 + $0x5c8] ss:$16 sps:$4 sm:$0xff]  }
 0x2cf   :  { %2790 = vmatprep.subr.bf16.mxu0 %v9901_v46  ;;  %2876 = vmatprep.subr.bf16.mxu1 %v9904_v47  ;;  %v9991_v46 = vld [vmem:[#allocation7 + $0x5e4] ss:$16 sps:$4 sm:$0xff]   ;;  %v9994_v47 = vld [vmem:[#allocation7 + $0x5ec] ss:$16 sps:$4 sm:$0xff]  }
 0x2d1   :  { %1890 = vmatmul.mubr.bf16.vlgmr.msra.gmra.mrb[8].mxu0 %v11738_v50  ;;  %1976 = vmatmul.mubr.bf16.vlgmr.msra.gmra.mrb[16].mxu1 %v11738_v50  ;;  %v9920_v50 = vld [vmem:[#allocation7 + $0x468] ss:$16 sps:$4 sm:$0xff]  }
 0x2d2   :  { %2791 = vmatpush1.bf16.msra.mxu0 %v9899_v48  ;;  %2877 = vmatpush1.bf16.msra.mxu1 %v9902_v49  ;;  %v9989_v48 = vld [vmem:[#allocation7 + $0x5e0] ss:$16 sps:$4 sm:$0xff]   ;;  %v9992_v49 = vld [vmem:[#allocation7 + $0x5e8] ss:$16 sps:$4 sm:$0xff]  }
 0x2d3   :  { %2792 = vmatprep.subr.bf16.mxu0 %v9907_v51  ;;  %2878 = vmatprep.subr.bf16.mxu1 %v9910_v52  ;;  %v9997_v51 = vld [vmem:[#allocation7 + $0x604] ss:$16 sps:$4 sm:$0xff]   ;;  %v10000_v52 = vld [vmem:[#allocation7 + $0x60c] ss:$16 sps:$4 sm:$0xff]  }
 0x2d6   :  { %2793 = vmatpush1.bf16.msra.mxu0 %v9905_v53  ;;  %2879 = vmatpush1.bf16.msra.mxu1 %v9908_v54  ;;  %v1152_v53 = vld [vmem:[#allocation9] sm:$0xf] }
 0x2d7   :  { %2794 = vmatprep.subr.bf16.mxu0 %v9913_v55  ;;  %2880 = vmatprep.subr.bf16.mxu1 %v9916_v56  ;;  %v1157_v54 = vrot.slane %v1152_v53, %v11726_v7  ;;  %v1165_v55 = vrot.slane %v1152_v53, %v11732_v15  ;;  %v1161_v56 = vrot.slane %v1152_v53, %v11728_v9 }
 0x2da   :  { %2795 = vmatpush1.bf16.msra.mxu0 %v9911_v57  ;;  %2881 = vmatpush1.bf16.msra.mxu1 %v9914_v58  ;;  %v1169_v57 = vrot.slane %v1152_v53, %v11734_v18  ;;  %v10042_v53 = vld [vmem:[#allocation7 + $0x6ec] ss:$16 sps:$4 sm:$0xff]  }
 0x2db   :  { %2796 = vmatprep.subr.bf16.mxu0 %v9919_v59  ;;  %2882 = vmatprep.subr.bf16.mxu1 %v9922_v60 }
 0x2de   :  { %2797 = vmatpush1.bf16.msra.mxu0 %v9917_v61  ;;  %2883 = vmatpush1.bf16.msra.mxu1 %v9920_v50 }
 0x2df   :  { %2798 = vmatprep.subr.bf16.mxu0 %v9925_v62  ;;  %2884 = vmatprep.subr.bf16.mxu1 %v9928_v63 }
 0x2e2   :  { %2799 = vmatpush1.bf16.msra.mxu0 %v9923_v0  ;;  %2885 = vmatpush1.bf16.msra.mxu1 %v9926_v1 }
 0x2e3   :  { %2800 = vmatprep.subr.bf16.mxu0 %v9931_v2  ;;  %2886 = vmatprep.subr.bf16.mxu1 %v9934_v3 }
 0x2e6   :  { %2801 = vmatpush1.bf16.msra.mxu0 %v9929_v4  ;;  %2887 = vmatpush1.bf16.msra.mxu1 %v9932_v5 }
 0x2e7   :  { %2802 = vmatprep.subr.bf16.mxu0 %v9937_v6  ;;  %2888 = vmatprep.subr.bf16.mxu1 %v9940_v8 }
 0x2ea   :  { %2803 = vmatpush1.bf16.msra.mxu0 %v9935_v10  ;;  %2889 = vmatpush1.bf16.msra.mxu1 %v9938_v11 }
 0x2eb   :  { %2804 = vmatprep.subr.bf16.mxu0 %v9943_v12  ;;  %2890 = vmatprep.subr.bf16.mxu1 %v9946_v13 }
 0x2ee   :  { %2805 = vmatpush1.bf16.msra.mxu0 %v9941_v14  ;;  %2891 = vmatpush1.bf16.msra.mxu1 %v9944_v16 }
 0x2ef   :  { %2806 = vmatprep.subr.bf16.mxu0 %v9949_v17  ;;  %2892 = vmatprep.subr.bf16.mxu1 %v9952_v19 }
 0x2f2   :  { %2807 = vmatpush1.bf16.msra.mxu0 %v9947_v20  ;;  %2893 = vmatpush1.bf16.msra.mxu1 %v9950_v21 }
 0x2f3   :  { %2808 = vmatprep.subr.bf16.mxu0 %v9955_v22  ;;  %2894 = vmatprep.subr.bf16.mxu1 %v9958_v23 }
 0x2f6   :  { %2809 = vmatpush1.bf16.msra.mxu0 %v9953_v24  ;;  %2895 = vmatpush1.bf16.msra.mxu1 %v9956_v25  ;;  %v9995_v25 = vld [vmem:[#allocation7 + $0x600] ss:$16 sps:$4 sm:$0xff]  }
 0x2f7   :  { %2810 = vmatprep.subr.bf16.mxu0 %v9961_v26  ;;  %2896 = vmatprep.subr.bf16.mxu1 %v9964_v27  ;;  %v9998_v26 = vld [vmem:[#allocation7 + $0x608] ss:$16 sps:$4 sm:$0xff]   ;;  %v10003_v27 = vld [vmem:[#allocation7 + $0x624] ss:$16 sps:$4 sm:$0xff]  }
 0x2fa   :  { %2811 = vmatpush1.bf16.msra.mxu0 %v9959_v29  ;;  %2897 = vmatpush1.bf16.msra.mxu1 %v9962_v30  ;;  %v10006_v29 = vld [vmem:[#allocation7 + $0x62c] ss:$16 sps:$4 sm:$0xff]   ;;  %v10001_v30 = vld [vmem:[#allocation7 + $0x620] ss:$16 sps:$4 sm:$0xff]  }
 0x2fb   :  { %2812 = vmatprep.subr.bf16.mxu0 %v9967_v31  ;;  %2898 = vmatprep.subr.bf16.mxu1 %v9970_v32  ;;  %v10004_v31 = vld [vmem:[#allocation7 + $0x628] ss:$16 sps:$4 sm:$0xff]   ;;  %v10009_v32 = vld [vmem:[#allocation7 + $0x644] ss:$16 sps:$4 sm:$0xff]  }
 0x2fe   :  { %2813 = vmatpush1.bf16.msra.mxu0 %v9965_v33  ;;  %2899 = vmatpush1.bf16.msra.mxu1 %v9968_v34  ;;  %v10012_v33 = vld [vmem:[#allocation7 + $0x64c] ss:$16 sps:$4 sm:$0xff]   ;;  %v10007_v34 = vld [vmem:[#allocation7 + $0x640] ss:$16 sps:$4 sm:$0xff]  }
 0x2ff   :  { %2814 = vmatprep.subr.bf16.mxu0 %v9973_v35  ;;  %2900 = vmatprep.subr.bf16.mxu1 %v9976_v36  ;;  %v10010_v35 = vld [vmem:[#allocation7 + $0x648] ss:$16 sps:$4 sm:$0xff]   ;;  %v10015_v36 = vld [vmem:[#allocation7 + $0x664] ss:$16 sps:$4 sm:$0xff]  }
 0x302   :  { %2815 = vmatpush1.bf16.msra.mxu0 %v9971_v37  ;;  %2901 = vmatpush1.bf16.msra.mxu1 %v9974_v38  ;;  %v10018_v37 = vld [vmem:[#allocation7 + $0x66c] ss:$16 sps:$4 sm:$0xff]   ;;  %v10013_v38 = vld [vmem:[#allocation7 + $0x660] ss:$16 sps:$4 sm:$0xff]  }
 0x303   :  { %2816 = vmatprep.subr.bf16.mxu0 %v9979_v39  ;;  %2902 = vmatprep.subr.bf16.mxu1 %v9982_v40  ;;  %v10016_v39 = vld [vmem:[#allocation7 + $0x668] ss:$16 sps:$4 sm:$0xff]   ;;  %v10021_v40 = vld [vmem:[#allocation7 + $0x684] ss:$16 sps:$4 sm:$0xff]  }
 0x306   :  { %2817 = vmatpush1.bf16.msra.mxu0 %v9977_v28  ;;  %2903 = vmatpush1.bf16.msra.mxu1 %v9980_v41  ;;  %v10024_v28 = vld [vmem:[#allocation7 + $0x68c] ss:$16 sps:$4 sm:$0xff]   ;;  %v10019_v41 = vld [vmem:[#allocation7 + $0x680] ss:$16 sps:$4 sm:$0xff]  }
 0x307   :  { %2818 = vmatprep.subr.bf16.mxu0 %v9985_v42  ;;  %2904 = vmatprep.subr.bf16.mxu1 %v9988_v43  ;;  %v10022_v42 = vld [vmem:[#allocation7 + $0x688] ss:$16 sps:$4 sm:$0xff]   ;;  %v10027_v43 = vld [vmem:[#allocation7 + $0x6a4] ss:$16 sps:$4 sm:$0xff]  }
 0x30a   :  { %2819 = vmatpush1.bf16.msra.mxu0 %v9983_v44  ;;  %2905 = vmatpush1.bf16.msra.mxu1 %v9986_v45  ;;  %v10030_v44 = vld [vmem:[#allocation7 + $0x6ac] ss:$16 sps:$4 sm:$0xff]   ;;  %v10025_v45 = vld [vmem:[#allocation7 + $0x6a0] ss:$16 sps:$4 sm:$0xff]  }
 0x30b   :  { %2820 = vmatprep.subr.bf16.mxu0 %v9991_v46  ;;  %2906 = vmatprep.subr.bf16.mxu1 %v9994_v47  ;;  %v10028_v46 = vld [vmem:[#allocation7 + $0x6a8] ss:$16 sps:$4 sm:$0xff]   ;;  %v10033_v47 = vld [vmem:[#allocation7 + $0x6c4] ss:$16 sps:$4 sm:$0xff]  }
 0x30e   :  { %2821 = vmatpush1.bf16.msra.mxu0 %v9989_v48  ;;  %2907 = vmatpush1.bf16.msra.mxu1 %v9992_v49  ;;  %v10036_v48 = vld [vmem:[#allocation7 + $0x6cc] ss:$16 sps:$4 sm:$0xff]   ;;  %v10031_v49 = vld [vmem:[#allocation7 + $0x6c0] ss:$16 sps:$4 sm:$0xff]  }
 0x30f   :  { %2833 = vmatprep.subr.bf16.mxu0 %v9997_v51  ;;  %2919 = vmatprep.subr.bf16.mxu1 %v10000_v52  ;;  %v10034_v51 = vld [vmem:[#allocation7 + $0x6c8] ss:$16 sps:$4 sm:$0xff]   ;;  %v10039_v52 = vld [vmem:[#allocation7 + $0x6e4] ss:$16 sps:$4 sm:$0xff]  }
 0x3a4   :  { %v1891_v58 = vpop.f32.mrb[8].mxu0  ;;  %v1977_v59 = vpop.f32.mrb[16].mxu1 }
 0x3a5   :  { %v9504_v60 = vadd.f32 %v1891_v58, %v1157_v54  ;;  %v9508_v61 = vadd.f32 %v1977_v59, %v1165_v55  ;;  %v1893_v50 = vpop.f32.mrb[9].mxu0  ;;  %v1979_v62 = vpop.f32.mrb[17].mxu1  ;;  %v10043_v58 = vld [vmem:[#allocation7 + $0x700] ss:$16 sps:$4 sm:$0xff]   ;;  %v10046_v59 = vld [vmem:[#allocation7 + $0x708] ss:$16 sps:$4 sm:$0xff]  }
 0x3a6   :  { %v9505_v63 = vadd.f32 %v1893_v50, %v1161_v56  ;;  %v9509_v0 = vadd.f32 %v1979_v62, %v1169_v57  ;;  %v1895_v1 = vpop.f32.mrb[10].mxu0  ;;  %v1981_v2 = vpop.f32.mrb[18].mxu1  ;;  %v10049_v50 = vld [vmem:[#allocation7 + $0x720] ss:$16 sps:$4 sm:$0xff]   ;;  %v10052_v62 = vld [vmem:[#allocation7 + $0x728] ss:$16 sps:$4 sm:$0xff]  }
 0x3a7   :  { %v9506_v3 = vadd.f32 %v1895_v1, %v1157_v54  ;;  %v9510_v4 = vadd.f32 %v1981_v2, %v1165_v55  ;;  %v1897_v5 = vpop.f32.mrb[11].mxu0  ;;  %v1983_v6 = vpop.f32.mrb[19].mxu1  ;;  %v1986_v11 = vmax.f32 %v9504_v60, 0.0  ;;  %v1988_v12 = vmax.f32 %v9508_v61, 0.0  ;;  %v10037_v54 = vld [vmem:[#allocation7 + $0x6e0] ss:$16 sps:$4 sm:$0xff]  }
 0x3a8   :  { %v9507_v8 = vadd.f32 %v1897_v5, %v1161_v56  ;;  %v9511_v10 = vadd.f32 %v1983_v6, %v1169_v57  ;;  %v1987_v16 = vmax.f32 %v9505_v63, 0.0  ;;  %v1989_v17 = vmax.f32 %v9509_v0, 0.0  ;;  %v10040_v55 = vld [vmem:[#allocation7 + $0x6e8] ss:$16 sps:$4 sm:$0xff]   ;;  %v10045_v56 = vld [vmem:[#allocation7 + $0x704] ss:$16 sps:$4 sm:$0xff]  }
 0x3a9   :  { %v1990_v13 = vmax.f32 %v9506_v3, 0.0  ;;  %v1992_v14 = vmax.f32 %v9510_v4, 0.0  ;;  %v10048_v57 = vld [vmem:[#allocation7 + $0x70c] ss:$16 sps:$4 sm:$0xff]   ;;  %v10051_v60 = vld [vmem:[#allocation7 + $0x724] ss:$16 sps:$4 sm:$0xff]  }
 0x3aa   :  { %v1991_v19 = vmax.f32 %v9507_v8, 0.0  ;;  %v1993_v20 = vmax.f32 %v9511_v10, 0.0  ;;  %v10054_v61 = vld [vmem:[#allocation7 + $0x72c] ss:$16 sps:$4 sm:$0xff]   ;;  %v10057_v63 = vld [vmem:[#allocation7 + $0x744] ss:$16 sps:$4 sm:$0xff]  }
 0x3ab   :  { %v1994_v21 = vpack.c.bf16 %v1990_v13, %v1986_v11  ;;  %v11746_v22 = vpack.c.bf16 %v1992_v14, %v1988_v12  ;;  %v10060_v0 = vld [vmem:[#allocation7 + $0x74c] ss:$16 sps:$4 sm:$0xff]   ;;  %v10055_v1 = vld [vmem:[#allocation7 + $0x740] ss:$16 sps:$4 sm:$0xff]   ;;  %v10058_v2 = vld [vmem:[#allocation7 + $0x748] ss:$16 sps:$4 sm:$0xff]  }
 0x3ac   :  { %v1995_v23 = vpack.c.bf16 %v1991_v19, %v1987_v16  ;;  %v1997_v24 = vpack.c.bf16 %v1993_v20, %v1989_v17  ;;  %v10063_v3 = vld [vmem:[#allocation7 + $0x764] ss:$16 sps:$4 sm:$0xff]   ;;  %v10066_v4 = vld [vmem:[#allocation7 + $0x76c] ss:$16 sps:$4 sm:$0xff]   ;;  %v10061_v5 = vld [vmem:[#allocation7 + $0x760] ss:$16 sps:$4 sm:$0xff]  }
 0x3ad   :  { %v10064_v6 = vld [vmem:[#allocation7 + $0x768] ss:$16 sps:$4 sm:$0xff]   ;;  %v10069_v8 = vld [vmem:[#allocation7 + $0x784] ss:$16 sps:$4 sm:$0xff]   ;;  %v10072_v10 = vld [vmem:[#allocation7 + $0x78c] ss:$16 sps:$4 sm:$0xff]  }
 0x3ae   :  { %2822 = vmatprep.mubr.bf16.mxu0 %v1995_v23  ;;  %2908 = vmatprep.mubr.bf16.mxu1 %v1995_v23  ;;  %v10067_v11 = vld [vmem:[#allocation7 + $0x780] ss:$16 sps:$4 sm:$0xff]   ;;  %v10070_v12 = vld [vmem:[#allocation7 + $0x788] ss:$16 sps:$4 sm:$0xff]   ;;  %v10075_v13 = vld [vmem:[#allocation7 + $0x7a4] ss:$16 sps:$4 sm:$0xff]  }
 0x3af   :  { %2823 = vmatmul.mubr.bf16.vlgmr.msra.gmra.mrb[12].mxu0 %v1994_v21  ;;  %2909 = vmatmul.mubr.bf16.vlgmr.msra.gmra.mrb[20].mxu1 %v1994_v21  ;;  %v10078_v14 = vld [vmem:[#allocation7 + $0x7ac] ss:$16 sps:$4 sm:$0xff]   ;;  %v10073_v16 = vld [vmem:[#allocation7 + $0x7a0] ss:$16 sps:$4 sm:$0xff]   ;;  %v10076_v17 = vld [vmem:[#allocation7 + $0x7a8] ss:$16 sps:$4 sm:$0xff]  }
 0x3b0   :  { %2834 = vmatpush1.bf16.msra.mxu0 %v9995_v25  ;;  %2920 = vmatpush1.bf16.msra.mxu1 %v9998_v26  ;;  %v10081_v19 = vld [vmem:[#allocation7 + $0x7c4] ss:$16 sps:$4 sm:$0xff]   ;;  %v10084_v20 = vld [vmem:[#allocation7 + $0x7cc] ss:$16 sps:$4 sm:$0xff]   ;;  %v10079_v21 = vld [vmem:[#allocation7 + $0x7c0] ss:$16 sps:$4 sm:$0xff]  }
 0x3b1   :  { %2865 = vmatprep.mubr.bf16.mxu0 %v1997_v24  ;;  %2951 = vmatprep.mubr.bf16.mxu1 %v1997_v24  ;;  %v10082_v23 = vld [vmem:[#allocation7 + $0x7c8] ss:$16 sps:$4 sm:$0xff]   ;;  %v10087_v24 = vld [vmem:[#allocation7 + $0x7e4] ss:$16 sps:$4 sm:$0xff]   ;;  %v10090_v25 = vld [vmem:[#allocation7 + $0x7ec] ss:$16 sps:$4 sm:$0xff]  }
 0x3b2   :  { %2835 = vmatprep.subr.bf16.mxu0 %v10003_v27  ;;  %2921 = vmatprep.subr.bf16.mxu1 %v10006_v29  ;;  %v10085_v26 = vld [vmem:[#allocation7 + $0x7e0] ss:$16 sps:$4 sm:$0xff]   ;;  %v10088_v27 = vld [vmem:[#allocation7 + $0x7e8] ss:$16 sps:$4 sm:$0xff]   ;;  %v10093_v29 = vld [vmem:[#allocation7 + $0x804] ss:$16 sps:$4 sm:$0xff]  }
 0x3b4   :  { %2836 = vmatpush1.bf16.msra.mxu0 %v10001_v30  ;;  %2922 = vmatpush1.bf16.msra.mxu1 %v10004_v31  ;;  %v10096_v30 = vld [vmem:[#allocation7 + $0x80c] ss:$16 sps:$4 sm:$0xff]   ;;  %v10091_v31 = vld [vmem:[#allocation7 + $0x800] ss:$16 sps:$4 sm:$0xff]  }
 0x3b5   :  { %2837 = vmatprep.subr.bf16.mxu0 %v10009_v32  ;;  %2923 = vmatprep.subr.bf16.mxu1 %v10012_v33  ;;  %v10094_v32 = vld [vmem:[#allocation7 + $0x808] ss:$16 sps:$4 sm:$0xff]   ;;  %v10099_v33 = vld [vmem:[#allocation7 + $0x824] ss:$16 sps:$4 sm:$0xff]  }
 0x3b8   :  { %2838 = vmatpush1.bf16.msra.mxu0 %v10007_v34  ;;  %2924 = vmatpush1.bf16.msra.mxu1 %v10010_v35  ;;  %v10102_v34 = vld [vmem:[#allocation7 + $0x82c] ss:$16 sps:$4 sm:$0xff]   ;;  %v10097_v35 = vld [vmem:[#allocation7 + $0x820] ss:$16 sps:$4 sm:$0xff]  }
 0x3b9   :  { %2839 = vmatprep.subr.bf16.mxu0 %v10015_v36  ;;  %2925 = vmatprep.subr.bf16.mxu1 %v10018_v37  ;;  %v10100_v36 = vld [vmem:[#allocation7 + $0x828] ss:$16 sps:$4 sm:$0xff]   ;;  %v10105_v37 = vld [vmem:[#allocation7 + $0x844] ss:$16 sps:$4 sm:$0xff]  }
 0x3bc   :  { %2840 = vmatpush1.bf16.msra.mxu0 %v10013_v38  ;;  %2926 = vmatpush1.bf16.msra.mxu1 %v10016_v39  ;;  %v10108_v38 = vld [vmem:[#allocation7 + $0x84c] ss:$16 sps:$4 sm:$0xff]   ;;  %v10103_v39 = vld [vmem:[#allocation7 + $0x840] ss:$16 sps:$4 sm:$0xff]  }
 0x3bd   :  { %2841 = vmatprep.subr.bf16.mxu0 %v10021_v40  ;;  %2927 = vmatprep.subr.bf16.mxu1 %v10024_v28  ;;  %v10106_v40 = vld [vmem:[#allocation7 + $0x848] ss:$16 sps:$4 sm:$0xff]   ;;  %v10111_v28 = vld [vmem:[#allocation7 + $0x864] ss:$16 sps:$4 sm:$0xff]  }
 0x3c0   :  { %2842 = vmatpush1.bf16.msra.mxu0 %v10019_v41  ;;  %2928 = vmatpush1.bf16.msra.mxu1 %v10022_v42  ;;  %v10114_v41 = vld [vmem:[#allocation7 + $0x86c] ss:$16 sps:$4 sm:$0xff]   ;;  %v10109_v42 = vld [vmem:[#allocation7 + $0x860] ss:$16 sps:$4 sm:$0xff]  }
 0x3c1   :  { %2843 = vmatprep.subr.bf16.mxu0 %v10027_v43  ;;  %2929 = vmatprep.subr.bf16.mxu1 %v10030_v44  ;;  %v10117_v43 = vld [vmem:[#allocation7 + $0x884] ss:$16 sps:$4 sm:$0xff]   ;;  %v10120_v44 = vld [vmem:[#allocation7 + $0x88c] ss:$16 sps:$4 sm:$0xff]  }
 0x3c4   :  { %2844 = vmatpush1.bf16.msra.mxu0 %v10025_v45  ;;  %2930 = vmatpush1.bf16.msra.mxu1 %v10028_v46  ;;  %v10115_v45 = vld [vmem:[#allocation7 + $0x880] ss:$16 sps:$4 sm:$0xff]   ;;  %v10118_v46 = vld [vmem:[#allocation7 + $0x888] ss:$16 sps:$4 sm:$0xff]  }
 0x3c5   :  { %2845 = vmatprep.subr.bf16.mxu0 %v10033_v47  ;;  %2931 = vmatprep.subr.bf16.mxu1 %v10036_v48  ;;  %v10123_v47 = vld [vmem:[#allocation7 + $0x8a4] ss:$16 sps:$4 sm:$0xff]   ;;  %v10126_v48 = vld [vmem:[#allocation7 + $0x8ac] ss:$16 sps:$4 sm:$0xff]  }
 0x3c8   :  { %2846 = vmatpush1.bf16.msra.mxu0 %v10031_v49  ;;  %2932 = vmatpush1.bf16.msra.mxu1 %v10034_v51  ;;  %v10121_v49 = vld [vmem:[#allocation7 + $0x8a0] ss:$16 sps:$4 sm:$0xff]   ;;  %v10124_v51 = vld [vmem:[#allocation7 + $0x8a8] ss:$16 sps:$4 sm:$0xff]  }
 0x3c9   :  { %2847 = vmatprep.subr.bf16.mxu0 %v10039_v52  ;;  %2933 = vmatprep.subr.bf16.mxu1 %v10042_v53  ;;  %v10129_v52 = vld [vmem:[#allocation7 + $0x8c4] ss:$16 sps:$4 sm:$0xff]   ;;  %v10132_v53 = vld [vmem:[#allocation7 + $0x8cc] ss:$16 sps:$4 sm:$0xff]  }
 0x3cc   :  { %2848 = vmatpush1.bf16.msra.mxu0 %v10037_v54  ;;  %2934 = vmatpush1.bf16.msra.mxu1 %v10040_v55  ;;  %v10127_v54 = vld [vmem:[#allocation7 + $0x8c0] ss:$16 sps:$4 sm:$0xff]   ;;  %v10130_v55 = vld [vmem:[#allocation7 + $0x8c8] ss:$16 sps:$4 sm:$0xff]  }
 0x3cd   :  { %2849 = vmatprep.subr.bf16.mxu0 %v10045_v56  ;;  %2935 = vmatprep.subr.bf16.mxu1 %v10048_v57  ;;  %v10135_v56 = vld [vmem:[#allocation7 + $0x8e4] ss:$16 sps:$4 sm:$0xff]   ;;  %v10138_v57 = vld [vmem:[#allocation7 + $0x8ec] ss:$16 sps:$4 sm:$0xff]  }
 0x3d0   :  { %2850 = vmatpush1.bf16.msra.mxu0 %v10043_v58  ;;  %2936 = vmatpush1.bf16.msra.mxu1 %v10046_v59  ;;  %v10133_v58 = vld [vmem:[#allocation7 + $0x8e0] ss:$16 sps:$4 sm:$0xff]   ;;  %v10136_v59 = vld [vmem:[#allocation7 + $0x8e8] ss:$16 sps:$4 sm:$0xff]  }
 0x3d1   :  { %2851 = vmatprep.subr.bf16.mxu0 %v10051_v60  ;;  %2937 = vmatprep.subr.bf16.mxu1 %v10054_v61  ;;  %v10141_v60 = vld [vmem:[#allocation7 + $0x904] ss:$16 sps:$4 sm:$0xff]   ;;  %v10144_v61 = vld [vmem:[#allocation7 + $0x90c] ss:$16 sps:$4 sm:$0xff]  }
 0x3d4   :  { %2852 = vmatpush1.bf16.msra.mxu0 %v10049_v50  ;;  %2938 = vmatpush1.bf16.msra.mxu1 %v10052_v62  ;;  %v10139_v50 = vld [vmem:[#allocation7 + $0x900] ss:$16 sps:$4 sm:$0xff]   ;;  %v10142_v62 = vld [vmem:[#allocation7 + $0x908] ss:$16 sps:$4 sm:$0xff]  }
 0x3d5   :  { %2853 = vmatprep.subr.bf16.mxu0 %v10057_v63  ;;  %2939 = vmatprep.subr.bf16.mxu1 %v10060_v0  ;;  %v10147_v63 = vld [vmem:[#allocation7 + $0x924] ss:$16 sps:$4 sm:$0xff]   ;;  %v10150_v0 = vld [vmem:[#allocation7 + $0x92c] ss:$16 sps:$4 sm:$0xff]  }
 0x3d8   :  { %2854 = vmatpush1.bf16.msra.mxu0 %v10055_v1  ;;  %2940 = vmatpush1.bf16.msra.mxu1 %v10058_v2  ;;  %v10145_v1 = vld [vmem:[#allocation7 + $0x920] ss:$16 sps:$4 sm:$0xff]   ;;  %v10148_v2 = vld [vmem:[#allocation7 + $0x928] ss:$16 sps:$4 sm:$0xff]  }
 0x3d9   :  { %2855 = vmatprep.subr.bf16.mxu0 %v10063_v3  ;;  %2941 = vmatprep.subr.bf16.mxu1 %v10066_v4  ;;  %v10153_v3 = vld [vmem:[#allocation7 + $0x944] ss:$16 sps:$4 sm:$0xff]   ;;  %v10156_v4 = vld [vmem:[#allocation7 + $0x94c] ss:$16 sps:$4 sm:$0xff]  }
 0x3dc   :  { %2856 = vmatpush1.bf16.msra.mxu0 %v10061_v5  ;;  %2942 = vmatpush1.bf16.msra.mxu1 %v10064_v6  ;;  %v10151_v5 = vld [vmem:[#allocation7 + $0x940] ss:$16 sps:$4 sm:$0xff]   ;;  %v10154_v6 = vld [vmem:[#allocation7 + $0x948] ss:$16 sps:$4 sm:$0xff]  }
 0x3dd   :  { %2857 = vmatprep.subr.bf16.mxu0 %v10069_v8  ;;  %2943 = vmatprep.subr.bf16.mxu1 %v10072_v10  ;;  %v10159_v8 = vld [vmem:[#allocation7 + $0x964] ss:$16 sps:$4 sm:$0xff]   ;;  %v10162_v10 = vld [vmem:[#allocation7 + $0x96c] ss:$16 sps:$4 sm:$0xff]  }
 0x3e0   :  { %2858 = vmatpush1.bf16.msra.mxu0 %v10067_v11  ;;  %2944 = vmatpush1.bf16.msra.mxu1 %v10070_v12  ;;  %v10157_v11 = vld [vmem:[#allocation7 + $0x960] ss:$16 sps:$4 sm:$0xff]   ;;  %v10160_v12 = vld [vmem:[#allocation7 + $0x968] ss:$16 sps:$4 sm:$0xff]  }
 0x3e1   :  { %2859 = vmatprep.subr.bf16.mxu0 %v10075_v13  ;;  %2945 = vmatprep.subr.bf16.mxu1 %v10078_v14  ;;  %v10165_v13 = vld [vmem:[#allocation7 + $0x984] ss:$16 sps:$4 sm:$0xff]   ;;  %v10168_v14 = vld [vmem:[#allocation7 + $0x98c] ss:$16 sps:$4 sm:$0xff]  }
 0x3e4   :  { %2860 = vmatpush1.bf16.msra.mxu0 %v10073_v16  ;;  %2946 = vmatpush1.bf16.msra.mxu1 %v10076_v17  ;;  %v10163_v16 = vld [vmem:[#allocation7 + $0x980] ss:$16 sps:$4 sm:$0xff]   ;;  %v10166_v17 = vld [vmem:[#allocation7 + $0x988] ss:$16 sps:$4 sm:$0xff]  }
 0x3e5   :  { %2861 = vmatprep.subr.bf16.mxu0 %v10081_v19  ;;  %2947 = vmatprep.subr.bf16.mxu1 %v10084_v20  ;;  %v10171_v19 = vld [vmem:[#allocation7 + $0x9a4] ss:$16 sps:$4 sm:$0xff]   ;;  %v10174_v20 = vld [vmem:[#allocation7 + $0x9ac] ss:$16 sps:$4 sm:$0xff]  }
 0x3e8   :  { %2862 = vmatpush1.bf16.msra.mxu0 %v10079_v21  ;;  %2948 = vmatpush1.bf16.msra.mxu1 %v10082_v23  ;;  %v10169_v21 = vld [vmem:[#allocation7 + $0x9a0] ss:$16 sps:$4 sm:$0xff]   ;;  %v10172_v23 = vld [vmem:[#allocation7 + $0x9a8] ss:$16 sps:$4 sm:$0xff]  }
 0x3e9   :  { %2863 = vmatprep.subr.bf16.mxu0 %v10087_v24  ;;  %2949 = vmatprep.subr.bf16.mxu1 %v10090_v25  ;;  %v10177_v24 = vld [vmem:[#allocation7 + $0x9c4] ss:$16 sps:$4 sm:$0xff]   ;;  %v10180_v25 = vld [vmem:[#allocation7 + $0x9cc] ss:$16 sps:$4 sm:$0xff]  }
 0x3ec   :  { %2864 = vmatpush1.bf16.msra.mxu0 %v10085_v26  ;;  %2950 = vmatpush1.bf16.msra.mxu1 %v10088_v27  ;;  %v10175_v26 = vld [vmem:[#allocation7 + $0x9c0] ss:$16 sps:$4 sm:$0xff]   ;;  %v10178_v27 = vld [vmem:[#allocation7 + $0x9c8] ss:$16 sps:$4 sm:$0xff]  }
 0x3ed   :  { %3766 = vmatprep.subr.bf16.mxu0 %v10093_v29  ;;  %3852 = vmatprep.subr.bf16.mxu1 %v10096_v30  ;;  %v10183_v29 = vld [vmem:[#allocation7 + $0x9e4] ss:$16 sps:$4 sm:$0xff]   ;;  %v10186_v30 = vld [vmem:[#allocation7 + $0x9ec] ss:$16 sps:$4 sm:$0xff]  }
 0x3ef   :  { %2866 = vmatmul.mubr.bf16.vlgmr.msra.gmra.mrb[12].mxu0 %v11746_v22  ;;  %2952 = vmatmul.mubr.bf16.vlgmr.msra.gmra.mrb[20].mxu1 %v11746_v22  ;;  %v10112_v22 = vld [vmem:[#allocation7 + $0x868] ss:$16 sps:$4 sm:$0xff]  }
 0x3f0   :  { %3767 = vmatpush1.bf16.msra.mxu0 %v10091_v31  ;;  %3853 = vmatpush1.bf16.msra.mxu1 %v10094_v32  ;;  %v10181_v31 = vld [vmem:[#allocation7 + $0x9e0] ss:$16 sps:$4 sm:$0xff]   ;;  %v10184_v32 = vld [vmem:[#allocation7 + $0x9e8] ss:$16 sps:$4 sm:$0xff]  }
 0x3f1   :  { %3768 = vmatprep.subr.bf16.mxu0 %v10099_v33  ;;  %3854 = vmatprep.subr.bf16.mxu1 %v10102_v34  ;;  %v10189_v33 = vld [vmem:[#allocation7 + $0xa04] ss:$16 sps:$4 sm:$0xff]   ;;  %v10192_v34 = vld [vmem:[#allocation7 + $0xa0c] ss:$16 sps:$4 sm:$0xff]  }
 0x3f4   :  { %3769 = vmatpush1.bf16.msra.mxu0 %v10097_v35  ;;  %3855 = vmatpush1.bf16.msra.mxu1 %v10100_v36  ;;  %v2128_v35 = vld [vmem:[#allocation9 + $0x4] sm:$0xf] }
 0x3f5   :  { %3770 = vmatprep.subr.bf16.mxu0 %v10105_v37  ;;  %3856 = vmatprep.subr.bf16.mxu1 %v10108_v38  ;;  %v2133_v36 = vrot.slane %v2128_v35, %v11726_v7  ;;  %v2141_v37 = vrot.slane %v2128_v35, %v11732_v15  ;;  %v2137_v38 = vrot.slane %v2128_v35, %v11728_v9 }
 0x3f8   :  { %3771 = vmatpush1.bf16.msra.mxu0 %v10103_v39  ;;  %3857 = vmatpush1.bf16.msra.mxu1 %v10106_v40  ;;  %v2145_v39 = vrot.slane %v2128_v35, %v11734_v18  ;;  %v10234_v35 = vld [vmem:[#allocation7 + $0xaec] ss:$16 sps:$4 sm:$0xff]  }
 0x3f9   :  { %3772 = vmatprep.subr.bf16.mxu0 %v10111_v28  ;;  %3858 = vmatprep.subr.bf16.mxu1 %v10114_v41 }
 0x3fc   :  { %3773 = vmatpush1.bf16.msra.mxu0 %v10109_v42  ;;  %3859 = vmatpush1.bf16.msra.mxu1 %v10112_v22 }
 0x3fd   :  { %3774 = vmatprep.subr.bf16.mxu0 %v10117_v43  ;;  %3860 = vmatprep.subr.bf16.mxu1 %v10120_v44 }
 0x400   :  { %3775 = vmatpush1.bf16.msra.mxu0 %v10115_v45  ;;  %3861 = vmatpush1.bf16.msra.mxu1 %v10118_v46 }
 0x401   :  { %3776 = vmatprep.subr.bf16.mxu0 %v10123_v47  ;;  %3862 = vmatprep.subr.bf16.mxu1 %v10126_v48 }
 0x404   :  { %3777 = vmatpush1.bf16.msra.mxu0 %v10121_v49  ;;  %3863 = vmatpush1.bf16.msra.mxu1 %v10124_v51 }
 0x405   :  { %3778 = vmatprep.subr.bf16.mxu0 %v10129_v52  ;;  %3864 = vmatprep.subr.bf16.mxu1 %v10132_v53 }
 0x408   :  { %3779 = vmatpush1.bf16.msra.mxu0 %v10127_v54  ;;  %3865 = vmatpush1.bf16.msra.mxu1 %v10130_v55 }
 0x409   :  { %3780 = vmatprep.subr.bf16.mxu0 %v10135_v56  ;;  %3866 = vmatprep.subr.bf16.mxu1 %v10138_v57 }
 0x40c   :  { %3781 = vmatpush1.bf16.msra.mxu0 %v10133_v58  ;;  %3867 = vmatpush1.bf16.msra.mxu1 %v10136_v59 }
 0x40d   :  { %3782 = vmatprep.subr.bf16.mxu0 %v10141_v60  ;;  %3868 = vmatprep.subr.bf16.mxu1 %v10144_v61 }
 0x410   :  { %3783 = vmatpush1.bf16.msra.mxu0 %v10139_v50  ;;  %3869 = vmatpush1.bf16.msra.mxu1 %v10142_v62 }
 0x411   :  { %3784 = vmatprep.subr.bf16.mxu0 %v10147_v63  ;;  %3870 = vmatprep.subr.bf16.mxu1 %v10150_v0 }
 0x414   :  { %3785 = vmatpush1.bf16.msra.mxu0 %v10145_v1  ;;  %3871 = vmatpush1.bf16.msra.mxu1 %v10148_v2  ;;  %v10187_v2 = vld [vmem:[#allocation7 + $0xa00] ss:$16 sps:$4 sm:$0xff]  }
 0x415   :  { %3786 = vmatprep.subr.bf16.mxu0 %v10153_v3  ;;  %3872 = vmatprep.subr.bf16.mxu1 %v10156_v4  ;;  %v10190_v3 = vld [vmem:[#allocation7 + $0xa08] ss:$16 sps:$4 sm:$0xff]   ;;  %v10195_v4 = vld [vmem:[#allocation7 + $0xa24] ss:$16 sps:$4 sm:$0xff]  }
 0x418   :  { %3787 = vmatpush1.bf16.msra.mxu0 %v10151_v5  ;;  %3873 = vmatpush1.bf16.msra.mxu1 %v10154_v6  ;;  %v10198_v5 = vld [vmem:[#allocation7 + $0xa2c] ss:$16 sps:$4 sm:$0xff]   ;;  %v10193_v6 = vld [vmem:[#allocation7 + $0xa20] ss:$16 sps:$4 sm:$0xff]  }
 0x419   :  { %3788 = vmatprep.subr.bf16.mxu0 %v10159_v8  ;;  %3874 = vmatprep.subr.bf16.mxu1 %v10162_v10  ;;  %v10196_v8 = vld [vmem:[#allocation7 + $0xa28] ss:$16 sps:$4 sm:$0xff]   ;;  %v10201_v10 = vld [vmem:[#allocation7 + $0xa44] ss:$16 sps:$4 sm:$0xff]  }
 0x41c   :  { %3789 = vmatpush1.bf16.msra.mxu0 %v10157_v11  ;;  %3875 = vmatpush1.bf16.msra.mxu1 %v10160_v12  ;;  %v10204_v11 = vld [vmem:[#allocation7 + $0xa4c] ss:$16 sps:$4 sm:$0xff]   ;;  %v10199_v12 = vld [vmem:[#allocation7 + $0xa40] ss:$16 sps:$4 sm:$0xff]  }
 0x41d   :  { %3790 = vmatprep.subr.bf16.mxu0 %v10165_v13  ;;  %3876 = vmatprep.subr.bf16.mxu1 %v10168_v14  ;;  %v10202_v13 = vld [vmem:[#allocation7 + $0xa48] ss:$16 sps:$4 sm:$0xff]   ;;  %v10207_v14 = vld [vmem:[#allocation7 + $0xa64] ss:$16 sps:$4 sm:$0xff]  }
 0x420   :  { %3791 = vmatpush1.bf16.msra.mxu0 %v10163_v16  ;;  %3877 = vmatpush1.bf16.msra.mxu1 %v10166_v17  ;;  %v10210_v16 = vld [vmem:[#allocation7 + $0xa6c] ss:$16 sps:$4 sm:$0xff]   ;;  %v10205_v17 = vld [vmem:[#allocation7 + $0xa60] ss:$16 sps:$4 sm:$0xff]  }
 0x421   :  { %3792 = vmatprep.subr.bf16.mxu0 %v10171_v19  ;;  %3878 = vmatprep.subr.bf16.mxu1 %v10174_v20  ;;  %v10208_v19 = vld [vmem:[#allocation7 + $0xa68] ss:$16 sps:$4 sm:$0xff]   ;;  %v10213_v20 = vld [vmem:[#allocation7 + $0xa84] ss:$16 sps:$4 sm:$0xff]  }
 0x424   :  { %3793 = vmatpush1.bf16.msra.mxu0 %v10169_v21  ;;  %3879 = vmatpush1.bf16.msra.mxu1 %v10172_v23  ;;  %v10216_v21 = vld [vmem:[#allocation7 + $0xa8c] ss:$16 sps:$4 sm:$0xff]   ;;  %v10211_v23 = vld [vmem:[#allocation7 + $0xa80] ss:$16 sps:$4 sm:$0xff]  }
 0x425   :  { %3794 = vmatprep.subr.bf16.mxu0 %v10177_v24  ;;  %3880 = vmatprep.subr.bf16.mxu1 %v10180_v25  ;;  %v10214_v24 = vld [vmem:[#allocation7 + $0xa88] ss:$16 sps:$4 sm:$0xff]   ;;  %v10219_v25 = vld [vmem:[#allocation7 + $0xaa4] ss:$16 sps:$4 sm:$0xff]  }
 0x428   :  { %3795 = vmatpush1.bf16.msra.mxu0 %v10175_v26  ;;  %3881 = vmatpush1.bf16.msra.mxu1 %v10178_v27  ;;  %v10222_v26 = vld [vmem:[#allocation7 + $0xaac] ss:$16 sps:$4 sm:$0xff]   ;;  %v10217_v27 = vld [vmem:[#allocation7 + $0xaa0] ss:$16 sps:$4 sm:$0xff]  }
 0x429   :  { %3796 = vmatprep.subr.bf16.mxu0 %v10183_v29  ;;  %3882 = vmatprep.subr.bf16.mxu1 %v10186_v30  ;;  %v10220_v29 = vld [vmem:[#allocation7 + $0xaa8] ss:$16 sps:$4 sm:$0xff]   ;;  %v10225_v30 = vld [vmem:[#allocation7 + $0xac4] ss:$16 sps:$4 sm:$0xff]  }
 0x42c   :  { %3797 = vmatpush1.bf16.msra.mxu0 %v10181_v31  ;;  %3883 = vmatpush1.bf16.msra.mxu1 %v10184_v32  ;;  %v10228_v31 = vld [vmem:[#allocation7 + $0xacc] ss:$16 sps:$4 sm:$0xff]   ;;  %v10223_v32 = vld [vmem:[#allocation7 + $0xac0] ss:$16 sps:$4 sm:$0xff]  }
 0x42d   :  { %3809 = vmatprep.subr.bf16.mxu0 %v10189_v33  ;;  %3895 = vmatprep.subr.bf16.mxu1 %v10192_v34  ;;  %v10226_v33 = vld [vmem:[#allocation7 + $0xac8] ss:$16 sps:$4 sm:$0xff]   ;;  %v10231_v34 = vld [vmem:[#allocation7 + $0xae4] ss:$16 sps:$4 sm:$0xff]  }
 0x4c2   :  { %v2867_v40 = vpop.f32.mrb[12].mxu0  ;;  %v2953_v28 = vpop.f32.mrb[20].mxu1 }
 0x4c3   :  { %v9512_v41 = vadd.f32 %v2867_v40, %v2133_v36  ;;  %v9516_v42 = vadd.f32 %v2953_v28, %v2141_v37  ;;  %v2869_v22 = vpop.f32.mrb[13].mxu0  ;;  %v2955_v43 = vpop.f32.mrb[21].mxu1  ;;  %v10235_v40 = vld [vmem:[#allocation7 + $0xb00] ss:$16 sps:$4 sm:$0xff]   ;;  %v10238_v28 = vld [vmem:[#allocation7 + $0xb08] ss:$16 sps:$4 sm:$0xff]  }
 0x4c4   :  { %v9513_v44 = vadd.f32 %v2869_v22, %v2137_v38  ;;  %v9517_v45 = vadd.f32 %v2955_v43, %v2145_v39  ;;  %v2871_v46 = vpop.f32.mrb[14].mxu0  ;;  %v2957_v47 = vpop.f32.mrb[22].mxu1  ;;  %v10241_v22 = vld [vmem:[#allocation7 + $0xb20] ss:$16 sps:$4 sm:$0xff]   ;;  %v10244_v43 = vld [vmem:[#allocation7 + $0xb28] ss:$16 sps:$4 sm:$0xff]  }
 0x4c5   :  { %v9514_v48 = vadd.f32 %v2871_v46, %v2133_v36  ;;  %v9518_v49 = vadd.f32 %v2957_v47, %v2141_v37  ;;  %v2873_v51 = vpop.f32.mrb[15].mxu0  ;;  %v2959_v52 = vpop.f32.mrb[23].mxu1  ;;  %v2962_v55 = vmax.f32 %v9512_v41, 0.0  ;;  %v2964_v56 = vmax.f32 %v9516_v42, 0.0  ;;  %v10229_v36 = vld [vmem:[#allocation7 + $0xae0] ss:$16 sps:$4 sm:$0xff]  }
 0x4c6   :  { %v9515_v53 = vadd.f32 %v2873_v51, %v2137_v38  ;;  %v9519_v54 = vadd.f32 %v2959_v52, %v2145_v39  ;;  %v2963_v59 = vmax.f32 %v9513_v44, 0.0  ;;  %v2965_v60 = vmax.f32 %v9517_v45, 0.0  ;;  %v10232_v37 = vld [vmem:[#allocation7 + $0xae8] ss:$16 sps:$4 sm:$0xff]   ;;  %v10237_v38 = vld [vmem:[#allocation7 + $0xb04] ss:$16 sps:$4 sm:$0xff]  }
 0x4c7   :  { %v2966_v57 = vmax.f32 %v9514_v48, 0.0  ;;  %v2968_v58 = vmax.f32 %v9518_v49, 0.0  ;;  %v10240_v39 = vld [vmem:[#allocation7 + $0xb0c] ss:$16 sps:$4 sm:$0xff]   ;;  %v10243_v41 = vld [vmem:[#allocation7 + $0xb24] ss:$16 sps:$4 sm:$0xff]  }
 0x4c8   :  { %v2967_v61 = vmax.f32 %v9515_v53, 0.0  ;;  %v2969_v50 = vmax.f32 %v9519_v54, 0.0  ;;  %v10246_v42 = vld [vmem:[#allocation7 + $0xb2c] ss:$16 sps:$4 sm:$0xff]   ;;  %v10249_v44 = vld [vmem:[#allocation7 + $0xb44] ss:$16 sps:$4 sm:$0xff]  }
 0x4c9   :  { %v2970_v62 = vpack.c.bf16 %v2966_v57, %v2962_v55  ;;  %v11754_v63 = vpack.c.bf16 %v2968_v58, %v2964_v56  ;;  %v10252_v45 = vld [vmem:[#allocation7 + $0xb4c] ss:$16 sps:$4 sm:$0xff]   ;;  %v10247_v46 = vld [vmem:[#allocation7 + $0xb40] ss:$16 sps:$4 sm:$0xff]   ;;  %v10250_v47 = vld [vmem:[#allocation7 + $0xb48] ss:$16 sps:$4 sm:$0xff]  }
 0x4ca   :  { %v2971_v0 = vpack.c.bf16 %v2967_v61, %v2963_v59  ;;  %v2973_v1 = vpack.c.bf16 %v2969_v50, %v2965_v60  ;;  %v10255_v48 = vld [vmem:[#allocation7 + $0xb64] ss:$16 sps:$4 sm:$0xff]   ;;  %v10258_v49 = vld [vmem:[#allocation7 + $0xb6c] ss:$16 sps:$4 sm:$0xff]   ;;  %v10253_v51 = vld [vmem:[#allocation7 + $0xb60] ss:$16 sps:$4 sm:$0xff]  }
 0x4cb   :  { %v10256_v52 = vld [vmem:[#allocation7 + $0xb68] ss:$16 sps:$4 sm:$0xff]   ;;  %v10261_v53 = vld [vmem:[#allocation7 + $0xb84] ss:$16 sps:$4 sm:$0xff]   ;;  %v10264_v54 = vld [vmem:[#allocation7 + $0xb8c] ss:$16 sps:$4 sm:$0xff]  }
 0x4cc   :  { %3798 = vmatprep.mubr.bf16.mxu0 %v2971_v0  ;;  %3884 = vmatprep.mubr.bf16.mxu1 %v2971_v0  ;;  %v10259_v55 = vld [vmem:[#allocation7 + $0xb80] ss:$16 sps:$4 sm:$0xff]   ;;  %v10262_v56 = vld [vmem:[#allocation7 + $0xb88] ss:$16 sps:$4 sm:$0xff]   ;;  %v10267_v57 = vld [vmem:[#allocation7 + $0xba4] ss:$16 sps:$4 sm:$0xff]  }
 0x4cd   :  { %3799 = vmatmul.mubr.bf16.vlgmr.msra.gmra.mrb[16].mxu0 %v2970_v62  ;;  %3885 = vmatmul.mubr.bf16.vlgmr.msra.gmra.mrb[24].mxu1 %v2970_v62  ;;  %v10270_v58 = vld [vmem:[#allocation7 + $0xbac] ss:$16 sps:$4 sm:$0xff]   ;;  %v10265_v59 = vld [vmem:[#allocation7 + $0xba0] ss:$16 sps:$4 sm:$0xff]   ;;  %v10268_v60 = vld [vmem:[#allocation7 + $0xba8] ss:$16 sps:$4 sm:$0xff]  }
 0x4ce   :  { %3810 = vmatpush1.bf16.msra.mxu0 %v10187_v2  ;;  %3896 = vmatpush1.bf16.msra.mxu1 %v10190_v3  ;;  %v10273_v61 = vld [vmem:[#allocation7 + $0xbc4] ss:$16 sps:$4 sm:$0xff]   ;;  %v10276_v50 = vld [vmem:[#allocation7 + $0xbcc] ss:$16 sps:$4 sm:$0xff]   ;;  %v10271_v62 = vld [vmem:[#allocation7 + $0xbc0] ss:$16 sps:$4 sm:$0xff]  }
 0x4cf   :  { %3841 = vmatprep.mubr.bf16.mxu0 %v2973_v1  ;;  %3927 = vmatprep.mubr.bf16.mxu1 %v2973_v1  ;;  %v10274_v0 = vld [vmem:[#allocation7 + $0xbc8] ss:$16 sps:$4 sm:$0xff]   ;;  %v10279_v1 = vld [vmem:[#allocation7 + $0xbe4] ss:$16 sps:$4 sm:$0xff]   ;;  %v10282_v2 = vld [vmem:[#allocation7 + $0xbec] ss:$16 sps:$4 sm:$0xff]  }
 0x4d0   :  { %3811 = vmatprep.subr.bf16.mxu0 %v10195_v4  ;;  %3897 = vmatprep.subr.bf16.mxu1 %v10198_v5  ;;  %v10277_v3 = vld [vmem:[#allocation7 + $0xbe0] ss:$16 sps:$4 sm:$0xff]   ;;  %v10280_v4 = vld [vmem:[#allocation7 + $0xbe8] ss:$16 sps:$4 sm:$0xff]   ;;  %v10285_v5 = vld [vmem:[#allocation7 + $0xc04] ss:$16 sps:$4 sm:$0xff]  }
 0x4d2   :  { %3812 = vmatpush1.bf16.msra.mxu0 %v10193_v6  ;;  %3898 = vmatpush1.bf16.msra.mxu1 %v10196_v8  ;;  %v10288_v6 = vld [vmem:[#allocation7 + $0xc0c] ss:$16 sps:$4 sm:$0xff]   ;;  %v10283_v8 = vld [vmem:[#allocation7 + $0xc00] ss:$16 sps:$4 sm:$0xff]  }
 0x4d3   :  { %3813 = vmatprep.subr.bf16.mxu0 %v10201_v10  ;;  %3899 = vmatprep.subr.bf16.mxu1 %v10204_v11  ;;  %v10286_v10 = vld [vmem:[#allocation7 + $0xc08] ss:$16 sps:$4 sm:$0xff]   ;;  %v10291_v11 = vld [vmem:[#allocation7 + $0xc24] ss:$16 sps:$4 sm:$0xff]  }
 0x4d6   :  { %3814 = vmatpush1.bf16.msra.mxu0 %v10199_v12  ;;  %3900 = vmatpush1.bf16.msra.mxu1 %v10202_v13  ;;  %v10294_v12 = vld [vmem:[#allocation7 + $0xc2c] ss:$16 sps:$4 sm:$0xff]   ;;  %v10289_v13 = vld [vmem:[#allocation7 + $0xc20] ss:$16 sps:$4 sm:$0xff]  }
 0x4d7   :  { %3815 = vmatprep.subr.bf16.mxu0 %v10207_v14  ;;  %3901 = vmatprep.subr.bf16.mxu1 %v10210_v16  ;;  %v10292_v14 = vld [vmem:[#allocation7 + $0xc28] ss:$16 sps:$4 sm:$0xff]   ;;  %v10297_v16 = vld [vmem:[#allocation7 + $0xc44] ss:$16 sps:$4 sm:$0xff]  }
 0x4da   :  { %3816 = vmatpush1.bf16.msra.mxu0 %v10205_v17  ;;  %3902 = vmatpush1.bf16.msra.mxu1 %v10208_v19  ;;  %v10300_v17 = vld [vmem:[#allocation7 + $0xc4c] ss:$16 sps:$4 sm:$0xff]   ;;  %v10295_v19 = vld [vmem:[#allocation7 + $0xc40] ss:$16 sps:$4 sm:$0xff]  }
 0x4db   :  { %3817 = vmatprep.subr.bf16.mxu0 %v10213_v20  ;;  %3903 = vmatprep.subr.bf16.mxu1 %v10216_v21  ;;  %v10298_v20 = vld [vmem:[#allocation7 + $0xc48] ss:$16 sps:$4 sm:$0xff]   ;;  %v10303_v21 = vld [vmem:[#allocation7 + $0xc64] ss:$16 sps:$4 sm:$0xff]  }
 0x4de   :  { %3818 = vmatpush1.bf16.msra.mxu0 %v10211_v23  ;;  %3904 = vmatpush1.bf16.msra.mxu1 %v10214_v24  ;;  %v10306_v23 = vld [vmem:[#allocation7 + $0xc6c] ss:$16 sps:$4 sm:$0xff]   ;;  %v10301_v24 = vld [vmem:[#allocation7 + $0xc60] ss:$16 sps:$4 sm:$0xff]  }
 0x4df   :  { %3819 = vmatprep.subr.bf16.mxu0 %v10219_v25  ;;  %3905 = vmatprep.subr.bf16.mxu1 %v10222_v26  ;;  %v10309_v25 = vld [vmem:[#allocation7 + $0xc84] ss:$16 sps:$4 sm:$0xff]   ;;  %v10312_v26 = vld [vmem:[#allocation7 + $0xc8c] ss:$16 sps:$4 sm:$0xff]  }
 0x4e2   :  { %3820 = vmatpush1.bf16.msra.mxu0 %v10217_v27  ;;  %3906 = vmatpush1.bf16.msra.mxu1 %v10220_v29  ;;  %v10307_v27 = vld [vmem:[#allocation7 + $0xc80] ss:$16 sps:$4 sm:$0xff]   ;;  %v10310_v29 = vld [vmem:[#allocation7 + $0xc88] ss:$16 sps:$4 sm:$0xff]  }
 0x4e3   :  { %3821 = vmatprep.subr.bf16.mxu0 %v10225_v30  ;;  %3907 = vmatprep.subr.bf16.mxu1 %v10228_v31  ;;  %v10315_v30 = vld [vmem:[#allocation7 + $0xca4] ss:$16 sps:$4 sm:$0xff]   ;;  %v10318_v31 = vld [vmem:[#allocation7 + $0xcac] ss:$16 sps:$4 sm:$0xff]  }
 0x4e6   :  { %3822 = vmatpush1.bf16.msra.mxu0 %v10223_v32  ;;  %3908 = vmatpush1.bf16.msra.mxu1 %v10226_v33  ;;  %v10313_v32 = vld [vmem:[#allocation7 + $0xca0] ss:$16 sps:$4 sm:$0xff]   ;;  %v10316_v33 = vld [vmem:[#allocation7 + $0xca8] ss:$16 sps:$4 sm:$0xff]  }
 0x4e7   :  { %3823 = vmatprep.subr.bf16.mxu0 %v10231_v34  ;;  %3909 = vmatprep.subr.bf16.mxu1 %v10234_v35  ;;  %v10321_v34 = vld [vmem:[#allocation7 + $0xcc4] ss:$16 sps:$4 sm:$0xff]   ;;  %v10324_v35 = vld [vmem:[#allocation7 + $0xccc] ss:$16 sps:$4 sm:$0xff]  }
 0x4ea   :  { %3824 = vmatpush1.bf16.msra.mxu0 %v10229_v36  ;;  %3910 = vmatpush1.bf16.msra.mxu1 %v10232_v37  ;;  %v10319_v36 = vld [vmem:[#allocation7 + $0xcc0] ss:$16 sps:$4 sm:$0xff]   ;;  %v10322_v37 = vld [vmem:[#allocation7 + $0xcc8] ss:$16 sps:$4 sm:$0xff]  }
 0x4eb   :  { %3825 = vmatprep.subr.bf16.mxu0 %v10237_v38  ;;  %3911 = vmatprep.subr.bf16.mxu1 %v10240_v39  ;;  %v10327_v38 = vld [vmem:[#allocation7 + $0xce4] ss:$16 sps:$4 sm:$0xff]   ;;  %v10330_v39 = vld [vmem:[#allocation7 + $0xcec] ss:$16 sps:$4 sm:$0xff]  }
 0x4ee   :  { %3826 = vmatpush1.bf16.msra.mxu0 %v10235_v40  ;;  %3912 = vmatpush1.bf16.msra.mxu1 %v10238_v28  ;;  %v10325_v40 = vld [vmem:[#allocation7 + $0xce0] ss:$16 sps:$4 sm:$0xff]   ;;  %v10328_v28 = vld [vmem:[#allocation7 + $0xce8] ss:$16 sps:$4 sm:$0xff]  }
 0x4ef   :  { %3827 = vmatprep.subr.bf16.mxu0 %v10243_v41  ;;  %3913 = vmatprep.subr.bf16.mxu1 %v10246_v42  ;;  %v10333_v41 = vld [vmem:[#allocation7 + $0xd04] ss:$16 sps:$4 sm:$0xff]   ;;  %v10336_v42 = vld [vmem:[#allocation7 + $0xd0c] ss:$16 sps:$4 sm:$0xff]  }
 0x4f2   :  { %3828 = vmatpush1.bf16.msra.mxu0 %v10241_v22  ;;  %3914 = vmatpush1.bf16.msra.mxu1 %v10244_v43  ;;  %v10331_v22 = vld [vmem:[#allocation7 + $0xd00] ss:$16 sps:$4 sm:$0xff]   ;;  %v10334_v43 = vld [vmem:[#allocation7 + $0xd08] ss:$16 sps:$4 sm:$0xff]  }
 0x4f3   :  { %3829 = vmatprep.subr.bf16.mxu0 %v10249_v44  ;;  %3915 = vmatprep.subr.bf16.mxu1 %v10252_v45  ;;  %v10339_v44 = vld [vmem:[#allocation7 + $0xd24] ss:$16 sps:$4 sm:$0xff]   ;;  %v10342_v45 = vld [vmem:[#allocation7 + $0xd2c] ss:$16 sps:$4 sm:$0xff]  }
 0x4f6   :  { %3830 = vmatpush1.bf16.msra.mxu0 %v10247_v46  ;;  %3916 = vmatpush1.bf16.msra.mxu1 %v10250_v47  ;;  %v10337_v46 = vld [vmem:[#allocation7 + $0xd20] ss:$16 sps:$4 sm:$0xff]   ;;  %v10340_v47 = vld [vmem:[#allocation7 + $0xd28] ss:$16 sps:$4 sm:$0xff]  }
 0x4f7   :  { %3831 = vmatprep.subr.bf16.mxu0 %v10255_v48  ;;  %3917 = vmatprep.subr.bf16.mxu1 %v10258_v49  ;;  %v10345_v48 = vld [vmem:[#allocation7 + $0xd44] ss:$16 sps:$4 sm:$0xff]   ;;  %v10348_v49 = vld [vmem:[#allocation7 + $0xd4c] ss:$16 sps:$4 sm:$0xff]  }
 0x4fa   :  { %3832 = vmatpush1.bf16.msra.mxu0 %v10253_v51  ;;  %3918 = vmatpush1.bf16.msra.mxu1 %v10256_v52  ;;  %v10343_v51 = vld [vmem:[#allocation7 + $0xd40] ss:$16 sps:$4 sm:$0xff]   ;;  %v10346_v52 = vld [vmem:[#allocation7 + $0xd48] ss:$16 sps:$4 sm:$0xff]  }
 0x4fb   :  { %3833 = vmatprep.subr.bf16.mxu0 %v10261_v53  ;;  %3919 = vmatprep.subr.bf16.mxu1 %v10264_v54  ;;  %v10351_v53 = vld [vmem:[#allocation7 + $0xd64] ss:$16 sps:$4 sm:$0xff]   ;;  %v10354_v54 = vld [vmem:[#allocation7 + $0xd6c] ss:$16 sps:$4 sm:$0xff]  }
 0x4fe   :  { %3834 = vmatpush1.bf16.msra.mxu0 %v10259_v55  ;;  %3920 = vmatpush1.bf16.msra.mxu1 %v10262_v56  ;;  %v10349_v55 = vld [vmem:[#allocation7 + $0xd60] ss:$16 sps:$4 sm:$0xff]   ;;  %v10352_v56 = vld [vmem:[#allocation7 + $0xd68] ss:$16 sps:$4 sm:$0xff]  }
 0x4ff   :  { %3835 = vmatprep.subr.bf16.mxu0 %v10267_v57  ;;  %3921 = vmatprep.subr.bf16.mxu1 %v10270_v58  ;;  %v10357_v57 = vld [vmem:[#allocation7 + $0xd84] ss:$16 sps:$4 sm:$0xff]   ;;  %v10360_v58 = vld [vmem:[#allocation7 + $0xd8c] ss:$16 sps:$4 sm:$0xff]  }
 0x502   :  { %3836 = vmatpush1.bf16.msra.mxu0 %v10265_v59  ;;  %3922 = vmatpush1.bf16.msra.mxu1 %v10268_v60  ;;  %v10355_v59 = vld [vmem:[#allocation7 + $0xd80] ss:$16 sps:$4 sm:$0xff]   ;;  %v10358_v60 = vld [vmem:[#allocation7 + $0xd88] ss:$16 sps:$4 sm:$0xff]  }
 0x503   :  { %3837 = vmatprep.subr.bf16.mxu0 %v10273_v61  ;;  %3923 = vmatprep.subr.bf16.mxu1 %v10276_v50  ;;  %v10363_v61 = vld [vmem:[#allocation7 + $0xda4] ss:$16 sps:$4 sm:$0xff]   ;;  %v10366_v50 = vld [vmem:[#allocation7 + $0xdac] ss:$16 sps:$4 sm:$0xff]  }
 0x506   :  { %3838 = vmatpush1.bf16.msra.mxu0 %v10271_v62  ;;  %3924 = vmatpush1.bf16.msra.mxu1 %v10274_v0  ;;  %v10361_v62 = vld [vmem:[#allocation7 + $0xda0] ss:$16 sps:$4 sm:$0xff]   ;;  %v10364_v0 = vld [vmem:[#allocation7 + $0xda8] ss:$16 sps:$4 sm:$0xff]  }
 0x507   :  { %3839 = vmatprep.subr.bf16.mxu0 %v10279_v1  ;;  %3925 = vmatprep.subr.bf16.mxu1 %v10282_v2  ;;  %v10369_v1 = vld [vmem:[#allocation7 + $0xdc4] ss:$16 sps:$4 sm:$0xff]   ;;  %v10372_v2 = vld [vmem:[#allocation7 + $0xdcc] ss:$16 sps:$4 sm:$0xff]  }
 0x50a   :  { %3840 = vmatpush1.bf16.msra.mxu0 %v10277_v3  ;;  %3926 = vmatpush1.bf16.msra.mxu1 %v10280_v4  ;;  %v10367_v3 = vld [vmem:[#allocation7 + $0xdc0] ss:$16 sps:$4 sm:$0xff]   ;;  %v10370_v4 = vld [vmem:[#allocation7 + $0xdc8] ss:$16 sps:$4 sm:$0xff]  }
 0x50b   :  { %4742 = vmatprep.subr.bf16.mxu0 %v10285_v5  ;;  %4828 = vmatprep.subr.bf16.mxu1 %v10288_v6  ;;  %v10375_v5 = vld [vmem:[#allocation7 + $0xde4] ss:$16 sps:$4 sm:$0xff]   ;;  %v10378_v6 = vld [vmem:[#allocation7 + $0xdec] ss:$16 sps:$4 sm:$0xff]  }
 0x50d   :  { %3842 = vmatmul.mubr.bf16.vlgmr.msra.gmra.mrb[16].mxu0 %v11754_v63  ;;  %3928 = vmatmul.mubr.bf16.vlgmr.msra.gmra.mrb[24].mxu1 %v11754_v63  ;;  %v10304_v63 = vld [vmem:[#allocation7 + $0xc68] ss:$16 sps:$4 sm:$0xff]  }
 0x50e   :  { %4743 = vmatpush1.bf16.msra.mxu0 %v10283_v8  ;;  %4829 = vmatpush1.bf16.msra.mxu1 %v10286_v10  ;;  %v10373_v8 = vld [vmem:[#allocation7 + $0xde0] ss:$16 sps:$4 sm:$0xff]   ;;  %v10376_v10 = vld [vmem:[#allocation7 + $0xde8] ss:$16 sps:$4 sm:$0xff]  }
 0x50f   :  { %4744 = vmatprep.subr.bf16.mxu0 %v10291_v11  ;;  %4830 = vmatprep.subr.bf16.mxu1 %v10294_v12  ;;  %v10381_v11 = vld [vmem:[#allocation7 + $0xe04] ss:$16 sps:$4 sm:$0xff]   ;;  %v10384_v12 = vld [vmem:[#allocation7 + $0xe0c] ss:$16 sps:$4 sm:$0xff]  }
 0x512   :  { %4745 = vmatpush1.bf16.msra.mxu0 %v10289_v13  ;;  %4831 = vmatpush1.bf16.msra.mxu1 %v10292_v14  ;;  %v3104_v13 = vld [vmem:[#allocation9 + $0x8] sm:$0xf] }
 0x513   :  { %4746 = vmatprep.subr.bf16.mxu0 %v10297_v16  ;;  %4832 = vmatprep.subr.bf16.mxu1 %v10300_v17  ;;  %v3109_v14 = vrot.slane %v3104_v13, %v11726_v7  ;;  %v3117_v16 = vrot.slane %v3104_v13, %v11732_v15  ;;  %v3113_v17 = vrot.slane %v3104_v13, %v11728_v9 }
 0x516   :  { %4747 = vmatpush1.bf16.msra.mxu0 %v10295_v19  ;;  %4833 = vmatpush1.bf16.msra.mxu1 %v10298_v20  ;;  %v3121_v19 = vrot.slane %v3104_v13, %v11734_v18  ;;  %v10426_v13 = vld [vmem:[#allocation7 + $0xeec] ss:$16 sps:$4 sm:$0xff]  }
 0x517   :  { %4748 = vmatprep.subr.bf16.mxu0 %v10303_v21  ;;  %4834 = vmatprep.subr.bf16.mxu1 %v10306_v23 }
 0x51a   :  { %4749 = vmatpush1.bf16.msra.mxu0 %v10301_v24  ;;  %4835 = vmatpush1.bf16.msra.mxu1 %v10304_v63 }
 0x51b   :  { %4750 = vmatprep.subr.bf16.mxu0 %v10309_v25  ;;  %4836 = vmatprep.subr.bf16.mxu1 %v10312_v26 }
 0x51e   :  { %4751 = vmatpush1.bf16.msra.mxu0 %v10307_v27  ;;  %4837 = vmatpush1.bf16.msra.mxu1 %v10310_v29 }
 0x51f   :  { %4752 = vmatprep.subr.bf16.mxu0 %v10315_v30  ;;  %4838 = vmatprep.subr.bf16.mxu1 %v10318_v31 }
 0x522   :  { %4753 = vmatpush1.bf16.msra.mxu0 %v10313_v32  ;;  %4839 = vmatpush1.bf16.msra.mxu1 %v10316_v33 }
 0x523   :  { %4754 = vmatprep.subr.bf16.mxu0 %v10321_v34  ;;  %4840 = vmatprep.subr.bf16.mxu1 %v10324_v35 }
 0x526   :  { %4755 = vmatpush1.bf16.msra.mxu0 %v10319_v36  ;;  %4841 = vmatpush1.bf16.msra.mxu1 %v10322_v37 }
 0x527   :  { %4756 = vmatprep.subr.bf16.mxu0 %v10327_v38  ;;  %4842 = vmatprep.subr.bf16.mxu1 %v10330_v39 }
 0x52a   :  { %4757 = vmatpush1.bf16.msra.mxu0 %v10325_v40  ;;  %4843 = vmatpush1.bf16.msra.mxu1 %v10328_v28 }
 0x52b   :  { %4758 = vmatprep.subr.bf16.mxu0 %v10333_v41  ;;  %4844 = vmatprep.subr.bf16.mxu1 %v10336_v42 }
 0x52e   :  { %4759 = vmatpush1.bf16.msra.mxu0 %v10331_v22  ;;  %4845 = vmatpush1.bf16.msra.mxu1 %v10334_v43 }
 0x52f   :  { %4760 = vmatprep.subr.bf16.mxu0 %v10339_v44  ;;  %4846 = vmatprep.subr.bf16.mxu1 %v10342_v45 }
 0x532   :  { %4761 = vmatpush1.bf16.msra.mxu0 %v10337_v46  ;;  %4847 = vmatpush1.bf16.msra.mxu1 %v10340_v47  ;;  %v10379_v47 = vld [vmem:[#allocation7 + $0xe00] ss:$16 sps:$4 sm:$0xff]  }
 0x533   :  { %4762 = vmatprep.subr.bf16.mxu0 %v10345_v48  ;;  %4848 = vmatprep.subr.bf16.mxu1 %v10348_v49  ;;  %v10382_v48 = vld [vmem:[#allocation7 + $0xe08] ss:$16 sps:$4 sm:$0xff]   ;;  %v10387_v49 = vld [vmem:[#allocation7 + $0xe24] ss:$16 sps:$4 sm:$0xff]  }
 0x536   :  { %4763 = vmatpush1.bf16.msra.mxu0 %v10343_v51  ;;  %4849 = vmatpush1.bf16.msra.mxu1 %v10346_v52  ;;  %v10390_v51 = vld [vmem:[#allocation7 + $0xe2c] ss:$16 sps:$4 sm:$0xff]   ;;  %v10385_v52 = vld [vmem:[#allocation7 + $0xe20] ss:$16 sps:$4 sm:$0xff]  }
 0x537   :  { %4764 = vmatprep.subr.bf16.mxu0 %v10351_v53  ;;  %4850 = vmatprep.subr.bf16.mxu1 %v10354_v54  ;;  %v10388_v53 = vld [vmem:[#allocation7 + $0xe28] ss:$16 sps:$4 sm:$0xff]   ;;  %v10393_v54 = vld [vmem:[#allocation7 + $0xe44] ss:$16 sps:$4 sm:$0xff]  }
 0x53a   :  { %4765 = vmatpush1.bf16.msra.mxu0 %v10349_v55  ;;  %4851 = vmatpush1.bf16.msra.mxu1 %v10352_v56  ;;  %v10396_v55 = vld [vmem:[#allocation7 + $0xe4c] ss:$16 sps:$4 sm:$0xff]   ;;  %v10391_v56 = vld [vmem:[#allocation7 + $0xe40] ss:$16 sps:$4 sm:$0xff]  }
 0x53b   :  { %4766 = vmatprep.subr.bf16.mxu0 %v10357_v57  ;;  %4852 = vmatprep.subr.bf16.mxu1 %v10360_v58  ;;  %v10394_v57 = vld [vmem:[#allocation7 + $0xe48] ss:$16 sps:$4 sm:$0xff]   ;;  %v10399_v58 = vld [vmem:[#allocation7 + $0xe64] ss:$16 sps:$4 sm:$0xff]  }
 0x53e   :  { %4767 = vmatpush1.bf16.msra.mxu0 %v10355_v59  ;;  %4853 = vmatpush1.bf16.msra.mxu1 %v10358_v60  ;;  %v10402_v59 = vld [vmem:[#allocation7 + $0xe6c] ss:$16 sps:$4 sm:$0xff]   ;;  %v10397_v60 = vld [vmem:[#allocation7 + $0xe60] ss:$16 sps:$4 sm:$0xff]  }
 0x53f   :  { %4768 = vmatprep.subr.bf16.mxu0 %v10363_v61  ;;  %4854 = vmatprep.subr.bf16.mxu1 %v10366_v50  ;;  %v10400_v61 = vld [vmem:[#allocation7 + $0xe68] ss:$16 sps:$4 sm:$0xff]   ;;  %v10405_v50 = vld [vmem:[#allocation7 + $0xe84] ss:$16 sps:$4 sm:$0xff]  }
 0x542   :  { %4769 = vmatpush1.bf16.msra.mxu0 %v10361_v62  ;;  %4855 = vmatpush1.bf16.msra.mxu1 %v10364_v0  ;;  %v10408_v62 = vld [vmem:[#allocation7 + $0xe8c] ss:$16 sps:$4 sm:$0xff]   ;;  %v10403_v0 = vld [vmem:[#allocation7 + $0xe80] ss:$16 sps:$4 sm:$0xff]  }
 0x543   :  { %4770 = vmatprep.subr.bf16.mxu0 %v10369_v1  ;;  %4856 = vmatprep.subr.bf16.mxu1 %v10372_v2  ;;  %v10406_v1 = vld [vmem:[#allocation7 + $0xe88] ss:$16 sps:$4 sm:$0xff]   ;;  %v10411_v2 = vld [vmem:[#allocation7 + $0xea4] ss:$16 sps:$4 sm:$0xff]  }
 0x546   :  { %4771 = vmatpush1.bf16.msra.mxu0 %v10367_v3  ;;  %4857 = vmatpush1.bf16.msra.mxu1 %v10370_v4  ;;  %v10414_v3 = vld [vmem:[#allocation7 + $0xeac] ss:$16 sps:$4 sm:$0xff]   ;;  %v10409_v4 = vld [vmem:[#allocation7 + $0xea0] ss:$16 sps:$4 sm:$0xff]  }
 0x547   :  { %4772 = vmatprep.subr.bf16.mxu0 %v10375_v5  ;;  %4858 = vmatprep.subr.bf16.mxu1 %v10378_v6  ;;  %v10412_v5 = vld [vmem:[#allocation7 + $0xea8] ss:$16 sps:$4 sm:$0xff]   ;;  %v10417_v6 = vld [vmem:[#allocation7 + $0xec4] ss:$16 sps:$4 sm:$0xff]  }
 0x54a   :  { %4773 = vmatpush1.bf16.msra.mxu0 %v10373_v8  ;;  %4859 = vmatpush1.bf16.msra.mxu1 %v10376_v10  ;;  %v10420_v8 = vld [vmem:[#allocation7 + $0xecc] ss:$16 sps:$4 sm:$0xff]   ;;  %v10415_v10 = vld [vmem:[#allocation7 + $0xec0] ss:$16 sps:$4 sm:$0xff]  }
 0x54b   :  { %4785 = vmatprep.subr.bf16.mxu0 %v10381_v11  ;;  %4871 = vmatprep.subr.bf16.mxu1 %v10384_v12  ;;  %v10418_v11 = vld [vmem:[#allocation7 + $0xec8] ss:$16 sps:$4 sm:$0xff]   ;;  %v10423_v12 = vld [vmem:[#allocation7 + $0xee4] ss:$16 sps:$4 sm:$0xff]  }
 0x5e0   :  { %v3843_v20 = vpop.f32.mrb[16].mxu0  ;;  %v3929_v21 = vpop.f32.mrb[24].mxu1 }
 0x5e1   :  { %v9520_v23 = vadd.f32 %v3843_v20, %v3109_v14  ;;  %v9524_v24 = vadd.f32 %v3929_v21, %v3117_v16  ;;  %v3845_v63 = vpop.f32.mrb[17].mxu0  ;;  %v3931_v25 = vpop.f32.mrb[25].mxu1  ;;  %v10427_v20 = vld [vmem:[#allocation7 + $0xf00] ss:$16 sps:$4 sm:$0xff]   ;;  %v10430_v21 = vld [vmem:[#allocation7 + $0xf08] ss:$16 sps:$4 sm:$0xff]  }
 0x5e2   :  { %v9521_v26 = vadd.f32 %v3845_v63, %v3113_v17  ;;  %v9525_v27 = vadd.f32 %v3931_v25, %v3121_v19  ;;  %v3847_v29 = vpop.f32.mrb[18].mxu0  ;;  %v3933_v30 = vpop.f32.mrb[26].mxu1  ;;  %v10433_v63 = vld [vmem:[#allocation7 + $0xf20] ss:$16 sps:$4 sm:$0xff]   ;;  %v10436_v25 = vld [vmem:[#allocation7 + $0xf28] ss:$16 sps:$4 sm:$0xff]  }
 0x5e3   :  { %v9522_v31 = vadd.f32 %v3847_v29, %v3109_v14  ;;  %v9526_v32 = vadd.f32 %v3933_v30, %v3117_v16  ;;  %v3849_v33 = vpop.f32.mrb[19].mxu0  ;;  %v3935_v34 = vpop.f32.mrb[27].mxu1  ;;  %v3938_v37 = vmax.f32 %v9520_v23, 0.0  ;;  %v3940_v38 = vmax.f32 %v9524_v24, 0.0  ;;  %v10421_v14 = vld [vmem:[#allocation7 + $0xee0] ss:$16 sps:$4 sm:$0xff]  }
 0x5e4   :  { %v9523_v35 = vadd.f32 %v3849_v33, %v3113_v17  ;;  %v9527_v36 = vadd.f32 %v3935_v34, %v3121_v19  ;;  %v3939_v28 = vmax.f32 %v9521_v26, 0.0  ;;  %v3941_v41 = vmax.f32 %v9525_v27, 0.0  ;;  %v10424_v16 = vld [vmem:[#allocation7 + $0xee8] ss:$16 sps:$4 sm:$0xff]   ;;  %v10429_v17 = vld [vmem:[#allocation7 + $0xf04] ss:$16 sps:$4 sm:$0xff]  }
 0x5e5   :  { %v3942_v39 = vmax.f32 %v9522_v31, 0.0  ;;  %v3944_v40 = vmax.f32 %v9526_v32, 0.0  ;;  %v10432_v19 = vld [vmem:[#allocation7 + $0xf0c] ss:$16 sps:$4 sm:$0xff]   ;;  %v10435_v23 = vld [vmem:[#allocation7 + $0xf24] ss:$16 sps:$4 sm:$0xff]  }
 0x5e6   :  { %v3943_v42 = vmax.f32 %v9523_v35, 0.0  ;;  %v3945_v22 = vmax.f32 %v9527_v36, 0.0  ;;  %v10438_v24 = vld [vmem:[#allocation7 + $0xf2c] ss:$16 sps:$4 sm:$0xff]   ;;  %v10441_v26 = vld [vmem:[#allocation7 + $0xf44] ss:$16 sps:$4 sm:$0xff]  }
 0x5e7   :  { %v3946_v43 = vpack.c.bf16 %v3942_v39, %v3938_v37  ;;  %v11762_v44 = vpack.c.bf16 %v3944_v40, %v3940_v38  ;;  %v10444_v27 = vld [vmem:[#allocation7 + $0xf4c] ss:$16 sps:$4 sm:$0xff]   ;;  %v10439_v29 = vld [vmem:[#allocation7 + $0xf40] ss:$16 sps:$4 sm:$0xff]   ;;  %v10442_v30 = vld [vmem:[#allocation7 + $0xf48] ss:$16 sps:$4 sm:$0xff]  }
 0x5e8   :  { %v3947_v45 = vpack.c.bf16 %v3943_v42, %v3939_v28  ;;  %v3949_v46 = vpack.c.bf16 %v3945_v22, %v3941_v41  ;;  %v10447_v31 = vld [vmem:[#allocation7 + $0xf64] ss:$16 sps:$4 sm:$0xff]   ;;  %v10450_v32 = vld [vmem:[#allocation7 + $0xf6c] ss:$16 sps:$4 sm:$0xff]   ;;  %v10445_v33 = vld [vmem:[#allocation7 + $0xf60] ss:$16 sps:$4 sm:$0xff]  }
 0x5e9   :  { %v10448_v34 = vld [vmem:[#allocation7 + $0xf68] ss:$16 sps:$4 sm:$0xff]   ;;  %v10453_v35 = vld [vmem:[#allocation7 + $0xf84] ss:$16 sps:$4 sm:$0xff]   ;;  %v10456_v36 = vld [vmem:[#allocation7 + $0xf8c] ss:$16 sps:$4 sm:$0xff]  }
 0x5ea   :  { %4774 = vmatprep.mubr.bf16.mxu0 %v3947_v45  ;;  %4860 = vmatprep.mubr.bf16.mxu1 %v3947_v45  ;;  %v10451_v37 = vld [vmem:[#allocation7 + $0xf80] ss:$16 sps:$4 sm:$0xff]   ;;  %v10454_v38 = vld [vmem:[#allocation7 + $0xf88] ss:$16 sps:$4 sm:$0xff]   ;;  %v10459_v39 = vld [vmem:[#allocation7 + $0xfa4] ss:$16 sps:$4 sm:$0xff]  }
 0x5eb   :  { %4775 = vmatmul.mubr.bf16.vlgmr.msra.gmra.mrb[20].mxu0 %v3946_v43  ;;  %4861 = vmatmul.mubr.bf16.vlgmr.msra.gmra.mrb[28].mxu1 %v3946_v43  ;;  %v10462_v40 = vld [vmem:[#allocation7 + $0xfac] ss:$16 sps:$4 sm:$0xff]   ;;  %v10457_v28 = vld [vmem:[#allocation7 + $0xfa0] ss:$16 sps:$4 sm:$0xff]   ;;  %v10460_v41 = vld [vmem:[#allocation7 + $0xfa8] ss:$16 sps:$4 sm:$0xff]  }
 0x5ec   :  { %4786 = vmatpush1.bf16.msra.mxu0 %v10379_v47  ;;  %4872 = vmatpush1.bf16.msra.mxu1 %v10382_v48  ;;  %v10465_v42 = vld [vmem:[#allocation7 + $0xfc4] ss:$16 sps:$4 sm:$0xff]   ;;  %v10468_v22 = vld [vmem:[#allocation7 + $0xfcc] ss:$16 sps:$4 sm:$0xff]   ;;  %v10463_v43 = vld [vmem:[#allocation7 + $0xfc0] ss:$16 sps:$4 sm:$0xff]  }
 0x5ed   :  { %4817 = vmatprep.mubr.bf16.mxu0 %v3949_v46  ;;  %4903 = vmatprep.mubr.bf16.mxu1 %v3949_v46  ;;  %v10466_v45 = vld [vmem:[#allocation7 + $0xfc8] ss:$16 sps:$4 sm:$0xff]   ;;  %v10471_v46 = vld [vmem:[#allocation7 + $0xfe4] ss:$16 sps:$4 sm:$0xff]   ;;  %v10474_v47 = vld [vmem:[#allocation7 + $0xfec] ss:$16 sps:$4 sm:$0xff]  }
 0x5ee   :  { %4787 = vmatprep.subr.bf16.mxu0 %v10387_v49  ;;  %4873 = vmatprep.subr.bf16.mxu1 %v10390_v51  ;;  %v10469_v48 = vld [vmem:[#allocation7 + $0xfe0] ss:$16 sps:$4 sm:$0xff]   ;;  %v10472_v49 = vld [vmem:[#allocation7 + $0xfe8] ss:$16 sps:$4 sm:$0xff]   ;;  %v10477_v51 = vld [vmem:[#allocation7 + $0x1004] ss:$16 sps:$4 sm:$0xff]  }
 0x5f0   :  { %4788 = vmatpush1.bf16.msra.mxu0 %v10385_v52  ;;  %4874 = vmatpush1.bf16.msra.mxu1 %v10388_v53  ;;  %v10480_v52 = vld [vmem:[#allocation7 + $0x100c] ss:$16 sps:$4 sm:$0xff]   ;;  %v10475_v53 = vld [vmem:[#allocation7 + $0x1000] ss:$16 sps:$4 sm:$0xff]  }
 0x5f1   :  { %4789 = vmatprep.subr.bf16.mxu0 %v10393_v54  ;;  %4875 = vmatprep.subr.bf16.mxu1 %v10396_v55  ;;  %v10478_v54 = vld [vmem:[#allocation7 + $0x1008] ss:$16 sps:$4 sm:$0xff]   ;;  %v10483_v55 = vld [vmem:[#allocation7 + $0x1024] ss:$16 sps:$4 sm:$0xff]  }
 0x5f4   :  { %4790 = vmatpush1.bf16.msra.mxu0 %v10391_v56  ;;  %4876 = vmatpush1.bf16.msra.mxu1 %v10394_v57  ;;  %v10486_v56 = vld [vmem:[#allocation7 + $0x102c] ss:$16 sps:$4 sm:$0xff]   ;;  %v10481_v57 = vld [vmem:[#allocation7 + $0x1020] ss:$16 sps:$4 sm:$0xff]  }
 0x5f5   :  { %4791 = vmatprep.subr.bf16.mxu0 %v10399_v58  ;;  %4877 = vmatprep.subr.bf16.mxu1 %v10402_v59  ;;  %v10484_v58 = vld [vmem:[#allocation7 + $0x1028] ss:$16 sps:$4 sm:$0xff]   ;;  %v10489_v59 = vld [vmem:[#allocation7 + $0x1044] ss:$16 sps:$4 sm:$0xff]  }
 0x5f8   :  { %4792 = vmatpush1.bf16.msra.mxu0 %v10397_v60  ;;  %4878 = vmatpush1.bf16.msra.mxu1 %v10400_v61  ;;  %v10492_v60 = vld [vmem:[#allocation7 + $0x104c] ss:$16 sps:$4 sm:$0xff]   ;;  %v10487_v61 = vld [vmem:[#allocation7 + $0x1040] ss:$16 sps:$4 sm:$0xff]  }
 0x5f9   :  { %4793 = vmatprep.subr.bf16.mxu0 %v10405_v50  ;;  %4879 = vmatprep.subr.bf16.mxu1 %v10408_v62  ;;  %v10490_v50 = vld [vmem:[#allocation7 + $0x1048] ss:$16 sps:$4 sm:$0xff]   ;;  %v10495_v62 = vld [vmem:[#allocation7 + $0x1064] ss:$16 sps:$4 sm:$0xff]  }
 0x5fc   :  { %4794 = vmatpush1.bf16.msra.mxu0 %v10403_v0  ;;  %4880 = vmatpush1.bf16.msra.mxu1 %v10406_v1  ;;  %v10498_v0 = vld [vmem:[#allocation7 + $0x106c] ss:$16 sps:$4 sm:$0xff]   ;;  %v10493_v1 = vld [vmem:[#allocation7 + $0x1060] ss:$16 sps:$4 sm:$0xff]  }
 0x5fd   :  { %4795 = vmatprep.subr.bf16.mxu0 %v10411_v2  ;;  %4881 = vmatprep.subr.bf16.mxu1 %v10414_v3  ;;  %v10501_v2 = vld [vmem:[#allocation7 + $0x1084] ss:$16 sps:$4 sm:$0xff]   ;;  %v10504_v3 = vld [vmem:[#allocation7 + $0x108c] ss:$16 sps:$4 sm:$0xff]  }
 0x600   :  { %4796 = vmatpush1.bf16.msra.mxu0 %v10409_v4  ;;  %4882 = vmatpush1.bf16.msra.mxu1 %v10412_v5  ;;  %v10499_v4 = vld [vmem:[#allocation7 + $0x1080] ss:$16 sps:$4 sm:$0xff]   ;;  %v10502_v5 = vld [vmem:[#allocation7 + $0x1088] ss:$16 sps:$4 sm:$0xff]  }
 0x601   :  { %4797 = vmatprep.subr.bf16.mxu0 %v10417_v6  ;;  %4883 = vmatprep.subr.bf16.mxu1 %v10420_v8  ;;  %v10507_v6 = vld [vmem:[#allocation7 + $0x10a4] ss:$16 sps:$4 sm:$0xff]   ;;  %v10510_v8 = vld [vmem:[#allocation7 + $0x10ac] ss:$16 sps:$4 sm:$0xff]  }
 0x604   :  { %4798 = vmatpush1.bf16.msra.mxu0 %v10415_v10  ;;  %4884 = vmatpush1.bf16.msra.mxu1 %v10418_v11  ;;  %v10505_v10 = vld [vmem:[#allocation7 + $0x10a0] ss:$16 sps:$4 sm:$0xff]   ;;  %v10508_v11 = vld [vmem:[#allocation7 + $0x10a8] ss:$16 sps:$4 sm:$0xff]  }
 0x605   :  { %4799 = vmatprep.subr.bf16.mxu0 %v10423_v12  ;;  %4885 = vmatprep.subr.bf16.mxu1 %v10426_v13  ;;  %v10513_v12 = vld [vmem:[#allocation7 + $0x10c4] ss:$16 sps:$4 sm:$0xff]   ;;  %v10516_v13 = vld [vmem:[#allocation7 + $0x10cc] ss:$16 sps:$4 sm:$0xff]  }
 0x608   :  { %4800 = vmatpush1.bf16.msra.mxu0 %v10421_v14  ;;  %4886 = vmatpush1.bf16.msra.mxu1 %v10424_v16  ;;  %v10511_v14 = vld [vmem:[#allocation7 + $0x10c0] ss:$16 sps:$4 sm:$0xff]   ;;  %v10514_v16 = vld [vmem:[#allocation7 + $0x10c8] ss:$16 sps:$4 sm:$0xff]  }
 0x609   :  { %4801 = vmatprep.subr.bf16.mxu0 %v10429_v17  ;;  %4887 = vmatprep.subr.bf16.mxu1 %v10432_v19  ;;  %v10519_v17 = vld [vmem:[#allocation7 + $0x10e4] ss:$16 sps:$4 sm:$0xff]   ;;  %v10522_v19 = vld [vmem:[#allocation7 + $0x10ec] ss:$16 sps:$4 sm:$0xff]  }
 0x60c   :  { %4802 = vmatpush1.bf16.msra.mxu0 %v10427_v20  ;;  %4888 = vmatpush1.bf16.msra.mxu1 %v10430_v21  ;;  %v10517_v20 = vld [vmem:[#allocation7 + $0x10e0] ss:$16 sps:$4 sm:$0xff]   ;;  %v10520_v21 = vld [vmem:[#allocation7 + $0x10e8] ss:$16 sps:$4 sm:$0xff]  }
 0x60d   :  { %4803 = vmatprep.subr.bf16.mxu0 %v10435_v23  ;;  %4889 = vmatprep.subr.bf16.mxu1 %v10438_v24  ;;  %v10525_v23 = vld [vmem:[#allocation7 + $0x1104] ss:$16 sps:$4 sm:$0xff]   ;;  %v10528_v24 = vld [vmem:[#allocation7 + $0x110c] ss:$16 sps:$4 sm:$0xff]  }
 0x610   :  { %4804 = vmatpush1.bf16.msra.mxu0 %v10433_v63  ;;  %4890 = vmatpush1.bf16.msra.mxu1 %v10436_v25  ;;  %v10523_v63 = vld [vmem:[#allocation7 + $0x1100] ss:$16 sps:$4 sm:$0xff]   ;;  %v10526_v25 = vld [vmem:[#allocation7 + $0x1108] ss:$16 sps:$4 sm:$0xff]  }
 0x611   :  { %4805 = vmatprep.subr.bf16.mxu0 %v10441_v26  ;;  %4891 = vmatprep.subr.bf16.mxu1 %v10444_v27  ;;  %v10531_v26 = vld [vmem:[#allocation7 + $0x1124] ss:$16 sps:$4 sm:$0xff]   ;;  %v10534_v27 = vld [vmem:[#allocation7 + $0x112c] ss:$16 sps:$4 sm:$0xff]  }
 0x614   :  { %4806 = vmatpush1.bf16.msra.mxu0 %v10439_v29  ;;  %4892 = vmatpush1.bf16.msra.mxu1 %v10442_v30  ;;  %v10529_v29 = vld [vmem:[#allocation7 + $0x1120] ss:$16 sps:$4 sm:$0xff]   ;;  %v10532_v30 = vld [vmem:[#allocation7 + $0x1128] ss:$16 sps:$4 sm:$0xff]  }
 0x615   :  { %4807 = vmatprep.subr.bf16.mxu0 %v10447_v31  ;;  %4893 = vmatprep.subr.bf16.mxu1 %v10450_v32  ;;  %v10537_v31 = vld [vmem:[#allocation7 + $0x1144] ss:$16 sps:$4 sm:$0xff]   ;;  %v10540_v32 = vld [vmem:[#allocation7 + $0x114c] ss:$16 sps:$4 sm:$0xff]  }
 0x618   :  { %4808 = vmatpush1.bf16.msra.mxu0 %v10445_v33  ;;  %4894 = vmatpush1.bf16.msra.mxu1 %v10448_v34  ;;  %v10535_v33 = vld [vmem:[#allocation7 + $0x1140] ss:$16 sps:$4 sm:$0xff]   ;;  %v10538_v34 = vld [vmem:[#allocation7 + $0x1148] ss:$16 sps:$4 sm:$0xff]  }
 0x619   :  { %4809 = vmatprep.subr.bf16.mxu0 %v10453_v35  ;;  %4895 = vmatprep.subr.bf16.mxu1 %v10456_v36  ;;  %v10543_v35 = vld [vmem:[#allocation7 + $0x1164] ss:$16 sps:$4 sm:$0xff]   ;;  %v10546_v36 = vld [vmem:[#allocation7 + $0x116c] ss:$16 sps:$4 sm:$0xff]  }
 0x61c   :  { %4810 = vmatpush1.bf16.msra.mxu0 %v10451_v37  ;;  %4896 = vmatpush1.bf16.msra.mxu1 %v10454_v38  ;;  %v10541_v37 = vld [vmem:[#allocation7 + $0x1160] ss:$16 sps:$4 sm:$0xff]   ;;  %v10544_v38 = vld [vmem:[#allocation7 + $0x1168] ss:$16 sps:$4 sm:$0xff]  }
 0x61d   :  { %4811 = vmatprep.subr.bf16.mxu0 %v10459_v39  ;;  %4897 = vmatprep.subr.bf16.mxu1 %v10462_v40  ;;  %v10549_v39 = vld [vmem:[#allocation7 + $0x1184] ss:$16 sps:$4 sm:$0xff]   ;;  %v10552_v40 = vld [vmem:[#allocation7 + $0x118c] ss:$16 sps:$4 sm:$0xff]  }
 0x620   :  { %4812 = vmatpush1.bf16.msra.mxu0 %v10457_v28  ;;  %4898 = vmatpush1.bf16.msra.mxu1 %v10460_v41  ;;  %v10547_v28 = vld [vmem:[#allocation7 + $0x1180] ss:$16 sps:$4 sm:$0xff]   ;;  %v10550_v41 = vld [vmem:[#allocation7 + $0x1188] ss:$16 sps:$4 sm:$0xff]  }
 0x621   :  { %4813 = vmatprep.subr.bf16.mxu0 %v10465_v42  ;;  %4899 = vmatprep.subr.bf16.mxu1 %v10468_v22  ;;  %v10555_v42 = vld [vmem:[#allocation7 + $0x11a4] ss:$16 sps:$4 sm:$0xff]   ;;  %v10558_v22 = vld [vmem:[#allocation7 + $0x11ac] ss:$16 sps:$4 sm:$0xff]  }
 0x624   :  { %4814 = vmatpush1.bf16.msra.mxu0 %v10463_v43  ;;  %4900 = vmatpush1.bf16.msra.mxu1 %v10466_v45  ;;  %v10553_v43 = vld [vmem:[#allocation7 + $0x11a0] ss:$16 sps:$4 sm:$0xff]   ;;  %v10556_v45 = vld [vmem:[#allocation7 + $0x11a8] ss:$16 sps:$4 sm:$0xff]  }
 0x625   :  { %4815 = vmatprep.subr.bf16.mxu0 %v10471_v46  ;;  %4901 = vmatprep.subr.bf16.mxu1 %v10474_v47  ;;  %v10561_v46 = vld [vmem:[#allocation7 + $0x11c4] ss:$16 sps:$4 sm:$0xff]   ;;  %v10564_v47 = vld [vmem:[#allocation7 + $0x11cc] ss:$16 sps:$4 sm:$0xff]  }
 0x628   :  { %4816 = vmatpush1.bf16.msra.mxu0 %v10469_v48  ;;  %4902 = vmatpush1.bf16.msra.mxu1 %v10472_v49  ;;  %v10559_v48 = vld [vmem:[#allocation7 + $0x11c0] ss:$16 sps:$4 sm:$0xff]   ;;  %v10562_v49 = vld [vmem:[#allocation7 + $0x11c8] ss:$16 sps:$4 sm:$0xff]  }
 0x629   :  { %5718 = vmatprep.subr.bf16.mxu0 %v10477_v51  ;;  %5804 = vmatprep.subr.bf16.mxu1 %v10480_v52  ;;  %v10567_v51 = vld [vmem:[#allocation7 + $0x11e4] ss:$16 sps:$4 sm:$0xff]   ;;  %v10570_v52 = vld [vmem:[#allocation7 + $0x11ec] ss:$16 sps:$4 sm:$0xff]  }
 0x62b   :  { %4818 = vmatmul.mubr.bf16.vlgmr.msra.gmra.mrb[20].mxu0 %v11762_v44  ;;  %4904 = vmatmul.mubr.bf16.vlgmr.msra.gmra.mrb[28].mxu1 %v11762_v44  ;;  %v10496_v44 = vld [vmem:[#allocation7 + $0x1068] ss:$16 sps:$4 sm:$0xff]  }
 0x62c   :  { %5719 = vmatpush1.bf16.msra.mxu0 %v10475_v53  ;;  %5805 = vmatpush1.bf16.msra.mxu1 %v10478_v54  ;;  %v10565_v53 = vld [vmem:[#allocation7 + $0x11e0] ss:$16 sps:$4 sm:$0xff]   ;;  %v10568_v54 = vld [vmem:[#allocation7 + $0x11e8] ss:$16 sps:$4 sm:$0xff]  }
 0x62d   :  { %5720 = vmatprep.subr.bf16.mxu0 %v10483_v55  ;;  %5806 = vmatprep.subr.bf16.mxu1 %v10486_v56  ;;  %v10573_v55 = vld [vmem:[#allocation7 + $0x1204] ss:$16 sps:$4 sm:$0xff]   ;;  %v10576_v56 = vld [vmem:[#allocation7 + $0x120c] ss:$16 sps:$4 sm:$0xff]  }
 0x630   :  { %5721 = vmatpush1.bf16.msra.mxu0 %v10481_v57  ;;  %5807 = vmatpush1.bf16.msra.mxu1 %v10484_v58  ;;  %v4080_v57 = vld [vmem:[#allocation9 + $0xc] sm:$0xf] }
 0x631   :  { %5722 = vmatprep.subr.bf16.mxu0 %v10489_v59  ;;  %5808 = vmatprep.subr.bf16.mxu1 %v10492_v60  ;;  %v4085_v58 = vrot.slane %v4080_v57, %v11726_v7  ;;  %v4093_v59 = vrot.slane %v4080_v57, %v11732_v15  ;;  %v4089_v60 = vrot.slane %v4080_v57, %v11728_v9 }
 0x634   :  { %5723 = vmatpush1.bf16.msra.mxu0 %v10487_v61  ;;  %5809 = vmatpush1.bf16.msra.mxu1 %v10490_v50  ;;  %v4097_v61 = vrot.slane %v4080_v57, %v11734_v18  ;;  %v10618_v57 = vld [vmem:[#allocation7 + $0x12ec] ss:$16 sps:$4 sm:$0xff]  }
 0x635   :  { %5724 = vmatprep.subr.bf16.mxu0 %v10495_v62  ;;  %5810 = vmatprep.subr.bf16.mxu1 %v10498_v0 }
 0x638   :  { %5725 = vmatpush1.bf16.msra.mxu0 %v10493_v1  ;;  %5811 = vmatpush1.bf16.msra.mxu1 %v10496_v44 }
 0x639   :  { %5726 = vmatprep.subr.bf16.mxu0 %v10501_v2  ;;  %5812 = vmatprep.subr.bf16.mxu1 %v10504_v3 }
 0x63c   :  { %5727 = vmatpush1.bf16.msra.mxu0 %v10499_v4  ;;  %5813 = vmatpush1.bf16.msra.mxu1 %v10502_v5 }
 0x63d   :  { %5728 = vmatprep.subr.bf16.mxu0 %v10507_v6  ;;  %5814 = vmatprep.subr.bf16.mxu1 %v10510_v8 }
 0x640   :  { %5729 = vmatpush1.bf16.msra.mxu0 %v10505_v10  ;;  %5815 = vmatpush1.bf16.msra.mxu1 %v10508_v11 }
 0x641   :  { %5730 = vmatprep.subr.bf16.mxu0 %v10513_v12  ;;  %5816 = vmatprep.subr.bf16.mxu1 %v10516_v13 }
 0x644   :  { %5731 = vmatpush1.bf16.msra.mxu0 %v10511_v14  ;;  %5817 = vmatpush1.bf16.msra.mxu1 %v10514_v16 }
 0x645   :  { %5732 = vmatprep.subr.bf16.mxu0 %v10519_v17  ;;  %5818 = vmatprep.subr.bf16.mxu1 %v10522_v19 }
 0x648   :  { %5733 = vmatpush1.bf16.msra.mxu0 %v10517_v20  ;;  %5819 = vmatpush1.bf16.msra.mxu1 %v10520_v21 }
 0x649   :  { %5734 = vmatprep.subr.bf16.mxu0 %v10525_v23  ;;  %5820 = vmatprep.subr.bf16.mxu1 %v10528_v24 }
 0x64c   :  { %5735 = vmatpush1.bf16.msra.mxu0 %v10523_v63  ;;  %5821 = vmatpush1.bf16.msra.mxu1 %v10526_v25 }
 0x64d   :  { %5736 = vmatprep.subr.bf16.mxu0 %v10531_v26  ;;  %5822 = vmatprep.subr.bf16.mxu1 %v10534_v27 }
 0x650   :  { %5737 = vmatpush1.bf16.msra.mxu0 %v10529_v29  ;;  %5823 = vmatpush1.bf16.msra.mxu1 %v10532_v30  ;;  %v10571_v30 = vld [vmem:[#allocation7 + $0x1200] ss:$16 sps:$4 sm:$0xff]  }
 0x651   :  { %5738 = vmatprep.subr.bf16.mxu0 %v10537_v31  ;;  %5824 = vmatprep.subr.bf16.mxu1 %v10540_v32  ;;  %v10574_v31 = vld [vmem:[#allocation7 + $0x1208] ss:$16 sps:$4 sm:$0xff]   ;;  %v10579_v32 = vld [vmem:[#allocation7 + $0x1224] ss:$16 sps:$4 sm:$0xff]  }
 0x654   :  { %5739 = vmatpush1.bf16.msra.mxu0 %v10535_v33  ;;  %5825 = vmatpush1.bf16.msra.mxu1 %v10538_v34  ;;  %v10582_v33 = vld [vmem:[#allocation7 + $0x122c] ss:$16 sps:$4 sm:$0xff]   ;;  %v10577_v34 = vld [vmem:[#allocation7 + $0x1220] ss:$16 sps:$4 sm:$0xff]  }
 0x655   :  { %5740 = vmatprep.subr.bf16.mxu0 %v10543_v35  ;;  %5826 = vmatprep.subr.bf16.mxu1 %v10546_v36  ;;  %v10580_v35 = vld [vmem:[#allocation7 + $0x1228] ss:$16 sps:$4 sm:$0xff]   ;;  %v10585_v36 = vld [vmem:[#allocation7 + $0x1244] ss:$16 sps:$4 sm:$0xff]  }
 0x658   :  { %5741 = vmatpush1.bf16.msra.mxu0 %v10541_v37  ;;  %5827 = vmatpush1.bf16.msra.mxu1 %v10544_v38  ;;  %v10588_v37 = vld [vmem:[#allocation7 + $0x124c] ss:$16 sps:$4 sm:$0xff]   ;;  %v10583_v38 = vld [vmem:[#allocation7 + $0x1240] ss:$16 sps:$4 sm:$0xff]  }
 0x659   :  { %5742 = vmatprep.subr.bf16.mxu0 %v10549_v39  ;;  %5828 = vmatprep.subr.bf16.mxu1 %v10552_v40  ;;  %v10586_v39 = vld [vmem:[#allocation7 + $0x1248] ss:$16 sps:$4 sm:$0xff]   ;;  %v10591_v40 = vld [vmem:[#allocation7 + $0x1264] ss:$16 sps:$4 sm:$0xff]  }
 0x65c   :  { %5743 = vmatpush1.bf16.msra.mxu0 %v10547_v28  ;;  %5829 = vmatpush1.bf16.msra.mxu1 %v10550_v41  ;;  %v10594_v28 = vld [vmem:[#allocation7 + $0x126c] ss:$16 sps:$4 sm:$0xff]   ;;  %v10589_v41 = vld [vmem:[#allocation7 + $0x1260] ss:$16 sps:$4 sm:$0xff]  }
 0x65d   :  { %5744 = vmatprep.subr.bf16.mxu0 %v10555_v42  ;;  %5830 = vmatprep.subr.bf16.mxu1 %v10558_v22  ;;  %v10592_v42 = vld [vmem:[#allocation7 + $0x1268] ss:$16 sps:$4 sm:$0xff]   ;;  %v10597_v22 = vld [vmem:[#allocation7 + $0x1284] ss:$16 sps:$4 sm:$0xff]  }
 0x660   :  { %5745 = vmatpush1.bf16.msra.mxu0 %v10553_v43  ;;  %5831 = vmatpush1.bf16.msra.mxu1 %v10556_v45  ;;  %v10600_v43 = vld [vmem:[#allocation7 + $0x128c] ss:$16 sps:$4 sm:$0xff]   ;;  %v10595_v45 = vld [vmem:[#allocation7 + $0x1280] ss:$16 sps:$4 sm:$0xff]  }
 0x661   :  { %5746 = vmatprep.subr.bf16.mxu0 %v10561_v46  ;;  %5832 = vmatprep.subr.bf16.mxu1 %v10564_v47  ;;  %v10598_v46 = vld [vmem:[#allocation7 + $0x1288] ss:$16 sps:$4 sm:$0xff]   ;;  %v10603_v47 = vld [vmem:[#allocation7 + $0x12a4] ss:$16 sps:$4 sm:$0xff]  }
 0x664   :  { %5747 = vmatpush1.bf16.msra.mxu0 %v10559_v48  ;;  %5833 = vmatpush1.bf16.msra.mxu1 %v10562_v49  ;;  %v10606_v48 = vld [vmem:[#allocation7 + $0x12ac] ss:$16 sps:$4 sm:$0xff]   ;;  %v10601_v49 = vld [vmem:[#allocation7 + $0x12a0] ss:$16 sps:$4 sm:$0xff]  }
 0x665   :  { %5748 = vmatprep.subr.bf16.mxu0 %v10567_v51  ;;  %5834 = vmatprep.subr.bf16.mxu1 %v10570_v52  ;;  %v10604_v51 = vld [vmem:[#allocation7 + $0x12a8] ss:$16 sps:$4 sm:$0xff]   ;;  %v10609_v52 = vld [vmem:[#allocation7 + $0x12c4] ss:$16 sps:$4 sm:$0xff]  }
 0x668   :  { %5749 = vmatpush1.bf16.msra.mxu0 %v10565_v53  ;;  %5835 = vmatpush1.bf16.msra.mxu1 %v10568_v54  ;;  %v10612_v53 = vld [vmem:[#allocation7 + $0x12cc] ss:$16 sps:$4 sm:$0xff]   ;;  %v10607_v54 = vld [vmem:[#allocation7 + $0x12c0] ss:$16 sps:$4 sm:$0xff]  }
 0x669   :  { %5761 = vmatprep.subr.bf16.mxu0 %v10573_v55  ;;  %5847 = vmatprep.subr.bf16.mxu1 %v10576_v56  ;;  %v10610_v55 = vld [vmem:[#allocation7 + $0x12c8] ss:$16 sps:$4 sm:$0xff]   ;;  %v10615_v56 = vld [vmem:[#allocation7 + $0x12e4] ss:$16 sps:$4 sm:$0xff]  }
 0x6fe   :  { %v4819_v50 = vpop.f32.mrb[20].mxu0  ;;  %v4905_v62 = vpop.f32.mrb[28].mxu1 }
 0x6ff   :  { %v9528_v0 = vadd.f32 %v4819_v50, %v4085_v58  ;;  %v9532_v1 = vadd.f32 %v4905_v62, %v4093_v59  ;;  %v4821_v44 = vpop.f32.mrb[21].mxu0  ;;  %v4907_v2 = vpop.f32.mrb[29].mxu1  ;;  %v10619_v50 = vld [vmem:[#allocation7 + $0x1300] ss:$16 sps:$4 sm:$0xff]   ;;  %v10622_v62 = vld [vmem:[#allocation7 + $0x1308] ss:$16 sps:$4 sm:$0xff]  }
 0x700   :  { %v9529_v3 = vadd.f32 %v4821_v44, %v4089_v60  ;;  %v9533_v4 = vadd.f32 %v4907_v2, %v4097_v61  ;;  %v4823_v5 = vpop.f32.mrb[22].mxu0  ;;  %v4909_v6 = vpop.f32.mrb[30].mxu1  ;;  %v10625_v44 = vld [vmem:[#allocation7 + $0x1320] ss:$16 sps:$4 sm:$0xff]   ;;  %v10628_v2 = vld [vmem:[#allocation7 + $0x1328] ss:$16 sps:$4 sm:$0xff]  }
 0x701   :  { %v9530_v8 = vadd.f32 %v4823_v5, %v4085_v58  ;;  %v9534_v10 = vadd.f32 %v4909_v6, %v4093_v59  ;;  %v4825_v11 = vpop.f32.mrb[23].mxu0  ;;  %v4911_v12 = vpop.f32.mrb[31].mxu1  ;;  %v4914_v16 = vmax.f32 %v9528_v0, 0.0  ;;  %v4916_v17 = vmax.f32 %v9532_v1, 0.0  ;;  %v10613_v58 = vld [vmem:[#allocation7 + $0x12e0] ss:$16 sps:$4 sm:$0xff]  }
 0x702   :  { %v9531_v13 = vadd.f32 %v4825_v11, %v4089_v60  ;;  %v9535_v14 = vadd.f32 %v4911_v12, %v4097_v61  ;;  %v4915_v21 = vmax.f32 %v9529_v3, 0.0  ;;  %v4917_v23 = vmax.f32 %v9533_v4, 0.0  ;;  %v10616_v59 = vld [vmem:[#allocation7 + $0x12e8] ss:$16 sps:$4 sm:$0xff]   ;;  %v10621_v60 = vld [vmem:[#allocation7 + $0x1304] ss:$16 sps:$4 sm:$0xff]  }
 0x703   :  { %v4918_v19 = vmax.f32 %v9530_v8, 0.0  ;;  %v4920_v20 = vmax.f32 %v9534_v10, 0.0  ;;  %v10624_v61 = vld [vmem:[#allocation7 + $0x130c] ss:$16 sps:$4 sm:$0xff]   ;;  %v10627_v0 = vld [vmem:[#allocation7 + $0x1324] ss:$16 sps:$4 sm:$0xff]  }
 0x704   :  { %v4919_v24 = vmax.f32 %v9531_v13, 0.0  ;;  %v4921_v63 = vmax.f32 %v9535_v14, 0.0  ;;  %v10630_v1 = vld [vmem:[#allocation7 + $0x132c] ss:$16 sps:$4 sm:$0xff]   ;;  %v10633_v3 = vld [vmem:[#allocation7 + $0x1344] ss:$16 sps:$4 sm:$0xff]  }
 0x705   :  { %v4922_v25 = vpack.c.bf16 %v4918_v19, %v4914_v16  ;;  %v11770_v26 = vpack.c.bf16 %v4920_v20, %v4916_v17  ;;  %v10636_v4 = vld [vmem:[#allocation7 + $0x134c] ss:$16 sps:$4 sm:$0xff]   ;;  %v10631_v5 = vld [vmem:[#allocation7 + $0x1340] ss:$16 sps:$4 sm:$0xff]   ;;  %v10634_v6 = vld [vmem:[#allocation7 + $0x1348] ss:$16 sps:$4 sm:$0xff]  }
 0x706   :  { %v4923_v27 = vpack.c.bf16 %v4919_v24, %v4915_v21  ;;  %v4925_v29 = vpack.c.bf16 %v4921_v63, %v4917_v23  ;;  %v10639_v8 = vld [vmem:[#allocation7 + $0x1364] ss:$16 sps:$4 sm:$0xff]   ;;  %v10642_v10 = vld [vmem:[#allocation7 + $0x136c] ss:$16 sps:$4 sm:$0xff]   ;;  %v10637_v11 = vld [vmem:[#allocation7 + $0x1360] ss:$16 sps:$4 sm:$0xff]  }
 0x707   :  { %v10640_v12 = vld [vmem:[#allocation7 + $0x1368] ss:$16 sps:$4 sm:$0xff]   ;;  %v10645_v13 = vld [vmem:[#allocation7 + $0x1384] ss:$16 sps:$4 sm:$0xff]   ;;  %v10648_v14 = vld [vmem:[#allocation7 + $0x138c] ss:$16 sps:$4 sm:$0xff]  }
 0x708   :  { %5750 = vmatprep.mubr.bf16.mxu0 %v4923_v27  ;;  %5836 = vmatprep.mubr.bf16.mxu1 %v4923_v27  ;;  %v10643_v16 = vld [vmem:[#allocation7 + $0x1380] ss:$16 sps:$4 sm:$0xff]   ;;  %v10646_v17 = vld [vmem:[#allocation7 + $0x1388] ss:$16 sps:$4 sm:$0xff]   ;;  %v10651_v19 = vld [vmem:[#allocation7 + $0x13a4] ss:$16 sps:$4 sm:$0xff]  }
 0x709   :  { %5751 = vmatmul.mubr.bf16.vlgmr.msra.gmra.mrb[24].mxu0 %v4922_v25  ;;  %5837 = vmatmul.mubr.bf16.vlgmr.msra.gmra.mrb[32].mxu1 %v4922_v25  ;;  %v10654_v20 = vld [vmem:[#allocation7 + $0x13ac] ss:$16 sps:$4 sm:$0xff]   ;;  %v10649_v21 = vld [vmem:[#allocation7 + $0x13a0] ss:$16 sps:$4 sm:$0xff]   ;;  %v10652_v23 = vld [vmem:[#allocation7 + $0x13a8] ss:$16 sps:$4 sm:$0xff]  }
 0x70a   :  { %5762 = vmatpush1.bf16.msra.mxu0 %v10571_v30  ;;  %5848 = vmatpush1.bf16.msra.mxu1 %v10574_v31  ;;  %v10657_v24 = vld [vmem:[#allocation7 + $0x13c4] ss:$16 sps:$4 sm:$0xff]   ;;  %v10660_v63 = vld [vmem:[#allocation7 + $0x13cc] ss:$16 sps:$4 sm:$0xff]   ;;  %v10655_v25 = vld [vmem:[#allocation7 + $0x13c0] ss:$16 sps:$4 sm:$0xff]  }
 0x70b   :  { %5793 = vmatprep.mubr.bf16.mxu0 %v4925_v29  ;;  %5879 = vmatprep.mubr.bf16.mxu1 %v4925_v29  ;;  %v10658_v27 = vld [vmem:[#allocation7 + $0x13c8] ss:$16 sps:$4 sm:$0xff]   ;;  %v10663_v29 = vld [vmem:[#allocation7 + $0x13e4] ss:$16 sps:$4 sm:$0xff]   ;;  %v10666_v30 = vld [vmem:[#allocation7 + $0x13ec] ss:$16 sps:$4 sm:$0xff]  }
 0x70c   :  { %5763 = vmatprep.subr.bf16.mxu0 %v10579_v32  ;;  %5849 = vmatprep.subr.bf16.mxu1 %v10582_v33  ;;  %v10661_v31 = vld [vmem:[#allocation7 + $0x13e0] ss:$16 sps:$4 sm:$0xff]   ;;  %v10664_v32 = vld [vmem:[#allocation7 + $0x13e8] ss:$16 sps:$4 sm:$0xff]   ;;  %v10669_v33 = vld [vmem:[#allocation7 + $0x1404] ss:$16 sps:$4 sm:$0xff]  }
 0x70e   :  { %5764 = vmatpush1.bf16.msra.mxu0 %v10577_v34  ;;  %5850 = vmatpush1.bf16.msra.mxu1 %v10580_v35  ;;  %v10672_v34 = vld [vmem:[#allocation7 + $0x140c] ss:$16 sps:$4 sm:$0xff]   ;;  %v10667_v35 = vld [vmem:[#allocation7 + $0x1400] ss:$16 sps:$4 sm:$0xff]  }
 0x70f   :  { %5765 = vmatprep.subr.bf16.mxu0 %v10585_v36  ;;  %5851 = vmatprep.subr.bf16.mxu1 %v10588_v37  ;;  %v10670_v36 = vld [vmem:[#allocation7 + $0x1408] ss:$16 sps:$4 sm:$0xff]   ;;  %v10675_v37 = vld [vmem:[#allocation7 + $0x1424] ss:$16 sps:$4 sm:$0xff]  }
 0x712   :  { %5766 = vmatpush1.bf16.msra.mxu0 %v10583_v38  ;;  %5852 = vmatpush1.bf16.msra.mxu1 %v10586_v39  ;;  %v10678_v38 = vld [vmem:[#allocation7 + $0x142c] ss:$16 sps:$4 sm:$0xff]   ;;  %v10673_v39 = vld [vmem:[#allocation7 + $0x1420] ss:$16 sps:$4 sm:$0xff]  }
 0x713   :  { %5767 = vmatprep.subr.bf16.mxu0 %v10591_v40  ;;  %5853 = vmatprep.subr.bf16.mxu1 %v10594_v28  ;;  %v10676_v40 = vld [vmem:[#allocation7 + $0x1428] ss:$16 sps:$4 sm:$0xff]   ;;  %v10681_v28 = vld [vmem:[#allocation7 + $0x1444] ss:$16 sps:$4 sm:$0xff]  }
 0x716   :  { %5768 = vmatpush1.bf16.msra.mxu0 %v10589_v41  ;;  %5854 = vmatpush1.bf16.msra.mxu1 %v10592_v42  ;;  %v10684_v41 = vld [vmem:[#allocation7 + $0x144c] ss:$16 sps:$4 sm:$0xff]   ;;  %v10679_v42 = vld [vmem:[#allocation7 + $0x1440] ss:$16 sps:$4 sm:$0xff]  }
 0x717   :  { %5769 = vmatprep.subr.bf16.mxu0 %v10597_v22  ;;  %5855 = vmatprep.subr.bf16.mxu1 %v10600_v43  ;;  %v10682_v22 = vld [vmem:[#allocation7 + $0x1448] ss:$16 sps:$4 sm:$0xff]   ;;  %v10687_v43 = vld [vmem:[#allocation7 + $0x1464] ss:$16 sps:$4 sm:$0xff]  }
 0x71a   :  { %5770 = vmatpush1.bf16.msra.mxu0 %v10595_v45  ;;  %5856 = vmatpush1.bf16.msra.mxu1 %v10598_v46  ;;  %v10690_v45 = vld [vmem:[#allocation7 + $0x146c] ss:$16 sps:$4 sm:$0xff]   ;;  %v10685_v46 = vld [vmem:[#allocation7 + $0x1460] ss:$16 sps:$4 sm:$0xff]  }
 0x71b   :  { %5771 = vmatprep.subr.bf16.mxu0 %v10603_v47  ;;  %5857 = vmatprep.subr.bf16.mxu1 %v10606_v48  ;;  %v10693_v47 = vld [vmem:[#allocation7 + $0x1484] ss:$16 sps:$4 sm:$0xff]   ;;  %v10696_v48 = vld [vmem:[#allocation7 + $0x148c] ss:$16 sps:$4 sm:$0xff]  }
 0x71e   :  { %5772 = vmatpush1.bf16.msra.mxu0 %v10601_v49  ;;  %5858 = vmatpush1.bf16.msra.mxu1 %v10604_v51  ;;  %v10691_v49 = vld [vmem:[#allocation7 + $0x1480] ss:$16 sps:$4 sm:$0xff]   ;;  %v10694_v51 = vld [vmem:[#allocation7 + $0x1488] ss:$16 sps:$4 sm:$0xff]  }
 0x71f   :  { %5773 = vmatprep.subr.bf16.mxu0 %v10609_v52  ;;  %5859 = vmatprep.subr.bf16.mxu1 %v10612_v53  ;;  %v10699_v52 = vld [vmem:[#allocation7 + $0x14a4] ss:$16 sps:$4 sm:$0xff]   ;;  %v10702_v53 = vld [vmem:[#allocation7 + $0x14ac] ss:$16 sps:$4 sm:$0xff]  }
 0x722   :  { %5774 = vmatpush1.bf16.msra.mxu0 %v10607_v54  ;;  %5860 = vmatpush1.bf16.msra.mxu1 %v10610_v55  ;;  %v10697_v54 = vld [vmem:[#allocation7 + $0x14a0] ss:$16 sps:$4 sm:$0xff]   ;;  %v10700_v55 = vld [vmem:[#allocation7 + $0x14a8] ss:$16 sps:$4 sm:$0xff]  }
 0x723   :  { %5775 = vmatprep.subr.bf16.mxu0 %v10615_v56  ;;  %5861 = vmatprep.subr.bf16.mxu1 %v10618_v57  ;;  %v10705_v56 = vld [vmem:[#allocation7 + $0x14c4] ss:$16 sps:$4 sm:$0xff]   ;;  %v10708_v57 = vld [vmem:[#allocation7 + $0x14cc] ss:$16 sps:$4 sm:$0xff]  }
 0x726   :  { %5776 = vmatpush1.bf16.msra.mxu0 %v10613_v58  ;;  %5862 = vmatpush1.bf16.msra.mxu1 %v10616_v59  ;;  %v10703_v58 = vld [vmem:[#allocation7 + $0x14c0] ss:$16 sps:$4 sm:$0xff]   ;;  %v10706_v59 = vld [vmem:[#allocation7 + $0x14c8] ss:$16 sps:$4 sm:$0xff]  }
 0x727   :  { %5777 = vmatprep.subr.bf16.mxu0 %v10621_v60  ;;  %5863 = vmatprep.subr.bf16.mxu1 %v10624_v61  ;;  %v10711_v60 = vld [vmem:[#allocation7 + $0x14e4] ss:$16 sps:$4 sm:$0xff]   ;;  %v10714_v61 = vld [vmem:[#allocation7 + $0x14ec] ss:$16 sps:$4 sm:$0xff]  }
 0x72a   :  { %5778 = vmatpush1.bf16.msra.mxu0 %v10619_v50  ;;  %5864 = vmatpush1.bf16.msra.mxu1 %v10622_v62  ;;  %v10709_v50 = vld [vmem:[#allocation7 + $0x14e0] ss:$16 sps:$4 sm:$0xff]   ;;  %v10712_v62 = vld [vmem:[#allocation7 + $0x14e8] ss:$16 sps:$4 sm:$0xff]  }
 0x72b   :  { %5779 = vmatprep.subr.bf16.mxu0 %v10627_v0  ;;  %5865 = vmatprep.subr.bf16.mxu1 %v10630_v1  ;;  %v10717_v0 = vld [vmem:[#allocation7 + $0x1504] ss:$16 sps:$4 sm:$0xff]   ;;  %v10720_v1 = vld [vmem:[#allocation7 + $0x150c] ss:$16 sps:$4 sm:$0xff]  }
 0x72e   :  { %5780 = vmatpush1.bf16.msra.mxu0 %v10625_v44  ;;  %5866 = vmatpush1.bf16.msra.mxu1 %v10628_v2  ;;  %v10715_v44 = vld [vmem:[#allocation7 + $0x1500] ss:$16 sps:$4 sm:$0xff]   ;;  %v10718_v2 = vld [vmem:[#allocation7 + $0x1508] ss:$16 sps:$4 sm:$0xff]  }
 0x72f   :  { %5781 = vmatprep.subr.bf16.mxu0 %v10633_v3  ;;  %5867 = vmatprep.subr.bf16.mxu1 %v10636_v4  ;;  %v10723_v3 = vld [vmem:[#allocation7 + $0x1524] ss:$16 sps:$4 sm:$0xff]   ;;  %v10726_v4 = vld [vmem:[#allocation7 + $0x152c] ss:$16 sps:$4 sm:$0xff]  }
 0x732   :  { %5782 = vmatpush1.bf16.msra.mxu0 %v10631_v5  ;;  %5868 = vmatpush1.bf16.msra.mxu1 %v10634_v6  ;;  %v10721_v5 = vld [vmem:[#allocation7 + $0x1520] ss:$16 sps:$4 sm:$0xff]   ;;  %v10724_v6 = vld [vmem:[#allocation7 + $0x1528] ss:$16 sps:$4 sm:$0xff]  }
 0x733   :  { %5783 = vmatprep.subr.bf16.mxu0 %v10639_v8  ;;  %5869 = vmatprep.subr.bf16.mxu1 %v10642_v10  ;;  %v10729_v8 = vld [vmem:[#allocation7 + $0x1544] ss:$16 sps:$4 sm:$0xff]   ;;  %v10732_v10 = vld [vmem:[#allocation7 + $0x154c] ss:$16 sps:$4 sm:$0xff]  }
 0x736   :  { %5784 = vmatpush1.bf16.msra.mxu0 %v10637_v11  ;;  %5870 = vmatpush1.bf16.msra.mxu1 %v10640_v12  ;;  %v10727_v11 = vld [vmem:[#allocation7 + $0x1540] ss:$16 sps:$4 sm:$0xff]   ;;  %v10730_v12 = vld [vmem:[#allocation7 + $0x1548] ss:$16 sps:$4 sm:$0xff]  }
 0x737   :  { %5785 = vmatprep.subr.bf16.mxu0 %v10645_v13  ;;  %5871 = vmatprep.subr.bf16.mxu1 %v10648_v14  ;;  %v10735_v13 = vld [vmem:[#allocation7 + $0x1564] ss:$16 sps:$4 sm:$0xff]   ;;  %v10738_v14 = vld [vmem:[#allocation7 + $0x156c] ss:$16 sps:$4 sm:$0xff]  }
 0x73a   :  { %5786 = vmatpush1.bf16.msra.mxu0 %v10643_v16  ;;  %5872 = vmatpush1.bf16.msra.mxu1 %v10646_v17  ;;  %v10733_v16 = vld [vmem:[#allocation7 + $0x1560] ss:$16 sps:$4 sm:$0xff]   ;;  %v10736_v17 = vld [vmem:[#allocation7 + $0x1568] ss:$16 sps:$4 sm:$0xff]  }
 0x73b   :  { %5787 = vmatprep.subr.bf16.mxu0 %v10651_v19  ;;  %5873 = vmatprep.subr.bf16.mxu1 %v10654_v20  ;;  %v10741_v19 = vld [vmem:[#allocation7 + $0x1584] ss:$16 sps:$4 sm:$0xff]   ;;  %v10744_v20 = vld [vmem:[#allocation7 + $0x158c] ss:$16 sps:$4 sm:$0xff]  }
 0x73e   :  { %5788 = vmatpush1.bf16.msra.mxu0 %v10649_v21  ;;  %5874 = vmatpush1.bf16.msra.mxu1 %v10652_v23  ;;  %v10739_v21 = vld [vmem:[#allocation7 + $0x1580] ss:$16 sps:$4 sm:$0xff]   ;;  %v10742_v23 = vld [vmem:[#allocation7 + $0x1588] ss:$16 sps:$4 sm:$0xff]  }
 0x73f   :  { %5789 = vmatprep.subr.bf16.mxu0 %v10657_v24  ;;  %5875 = vmatprep.subr.bf16.mxu1 %v10660_v63  ;;  %v10747_v24 = vld [vmem:[#allocation7 + $0x15a4] ss:$16 sps:$4 sm:$0xff]   ;;  %v10750_v63 = vld [vmem:[#allocation7 + $0x15ac] ss:$16 sps:$4 sm:$0xff]  }
 0x742   :  { %5790 = vmatpush1.bf16.msra.mxu0 %v10655_v25  ;;  %5876 = vmatpush1.bf16.msra.mxu1 %v10658_v27  ;;  %v10745_v25 = vld [vmem:[#allocation7 + $0x15a0] ss:$16 sps:$4 sm:$0xff]   ;;  %v10748_v27 = vld [vmem:[#allocation7 + $0x15a8] ss:$16 sps:$4 sm:$0xff]  }
 0x743   :  { %5791 = vmatprep.subr.bf16.mxu0 %v10663_v29  ;;  %5877 = vmatprep.subr.bf16.mxu1 %v10666_v30  ;;  %v10753_v29 = vld [vmem:[#allocation7 + $0x15c4] ss:$16 sps:$4 sm:$0xff]   ;;  %v10756_v30 = vld [vmem:[#allocation7 + $0x15cc] ss:$16 sps:$4 sm:$0xff]  }
 0x746   :  { %5792 = vmatpush1.bf16.msra.mxu0 %v10661_v31  ;;  %5878 = vmatpush1.bf16.msra.mxu1 %v10664_v32  ;;  %v10751_v31 = vld [vmem:[#allocation7 + $0x15c0] ss:$16 sps:$4 sm:$0xff]   ;;  %v10754_v32 = vld [vmem:[#allocation7 + $0x15c8] ss:$16 sps:$4 sm:$0xff]  }
 0x747   :  { %6694 = vmatprep.subr.bf16.mxu0 %v10669_v33  ;;  %6780 = vmatprep.subr.bf16.mxu1 %v10672_v34  ;;  %v10759_v33 = vld [vmem:[#allocation7 + $0x15e4] ss:$16 sps:$4 sm:$0xff]   ;;  %v10762_v34 = vld [vmem:[#allocation7 + $0x15ec] ss:$16 sps:$4 sm:$0xff]  }
 0x749   :  { %5794 = vmatmul.mubr.bf16.vlgmr.msra.gmra.mrb[24].mxu0 %v11770_v26  ;;  %5880 = vmatmul.mubr.bf16.vlgmr.msra.gmra.mrb[32].mxu1 %v11770_v26  ;;  %v10688_v26 = vld [vmem:[#allocation7 + $0x1468] ss:$16 sps:$4 sm:$0xff]  }
 0x74a   :  { %6695 = vmatpush1.bf16.msra.mxu0 %v10667_v35  ;;  %6781 = vmatpush1.bf16.msra.mxu1 %v10670_v36  ;;  %v10757_v35 = vld [vmem:[#allocation7 + $0x15e0] ss:$16 sps:$4 sm:$0xff]   ;;  %v10760_v36 = vld [vmem:[#allocation7 + $0x15e8] ss:$16 sps:$4 sm:$0xff]  }
 0x74b   :  { %6696 = vmatprep.subr.bf16.mxu0 %v10675_v37  ;;  %6782 = vmatprep.subr.bf16.mxu1 %v10678_v38  ;;  %v10765_v37 = vld [vmem:[#allocation7 + $0x1604] ss:$16 sps:$4 sm:$0xff]   ;;  %v10768_v38 = vld [vmem:[#allocation7 + $0x160c] ss:$16 sps:$4 sm:$0xff]  }
 0x74e   :  { %6697 = vmatpush1.bf16.msra.mxu0 %v10673_v39  ;;  %6783 = vmatpush1.bf16.msra.mxu1 %v10676_v40  ;;  %v5056_v39 = vld [vmem:[#allocation9 + $0x10] sm:$0xf] }
 0x74f   :  { %6698 = vmatprep.subr.bf16.mxu0 %v10681_v28  ;;  %6784 = vmatprep.subr.bf16.mxu1 %v10684_v41  ;;  %v5061_v40 = vrot.slane %v5056_v39, %v11726_v7  ;;  %v5069_v28 = vrot.slane %v5056_v39, %v11732_v15  ;;  %v5065_v41 = vrot.slane %v5056_v39, %v11728_v9 }
 0x752   :  { %6699 = vmatpush1.bf16.msra.mxu0 %v10679_v42  ;;  %6785 = vmatpush1.bf16.msra.mxu1 %v10682_v22  ;;  %v5073_v42 = vrot.slane %v5056_v39, %v11734_v18  ;;  %v10810_v39 = vld [vmem:[#allocation7 + $0x16ec] ss:$16 sps:$4 sm:$0xff]  }
 0x753   :  { %6700 = vmatprep.subr.bf16.mxu0 %v10687_v43  ;;  %6786 = vmatprep.subr.bf16.mxu1 %v10690_v45 }
 0x756   :  { %6701 = vmatpush1.bf16.msra.mxu0 %v10685_v46  ;;  %6787 = vmatpush1.bf16.msra.mxu1 %v10688_v26 }
 0x757   :  { %6702 = vmatprep.subr.bf16.mxu0 %v10693_v47  ;;  %6788 = vmatprep.subr.bf16.mxu1 %v10696_v48 }
 0x75a   :  { %6703 = vmatpush1.bf16.msra.mxu0 %v10691_v49  ;;  %6789 = vmatpush1.bf16.msra.mxu1 %v10694_v51 }
 0x75b   :  { %6704 = vmatprep.subr.bf16.mxu0 %v10699_v52  ;;  %6790 = vmatprep.subr.bf16.mxu1 %v10702_v53 }
 0x75e   :  { %6705 = vmatpush1.bf16.msra.mxu0 %v10697_v54  ;;  %6791 = vmatpush1.bf16.msra.mxu1 %v10700_v55 }
 0x75f   :  { %6706 = vmatprep.subr.bf16.mxu0 %v10705_v56  ;;  %6792 = vmatprep.subr.bf16.mxu1 %v10708_v57 }
 0x762   :  { %6707 = vmatpush1.bf16.msra.mxu0 %v10703_v58  ;;  %6793 = vmatpush1.bf16.msra.mxu1 %v10706_v59 }
 0x763   :  { %6708 = vmatprep.subr.bf16.mxu0 %v10711_v60  ;;  %6794 = vmatprep.subr.bf16.mxu1 %v10714_v61 }
 0x766   :  { %6709 = vmatpush1.bf16.msra.mxu0 %v10709_v50  ;;  %6795 = vmatpush1.bf16.msra.mxu1 %v10712_v62 }
 0x767   :  { %6710 = vmatprep.subr.bf16.mxu0 %v10717_v0  ;;  %6796 = vmatprep.subr.bf16.mxu1 %v10720_v1 }
 0x76a   :  { %6711 = vmatpush1.bf16.msra.mxu0 %v10715_v44  ;;  %6797 = vmatpush1.bf16.msra.mxu1 %v10718_v2 }
 0x76b   :  { %6712 = vmatprep.subr.bf16.mxu0 %v10723_v3  ;;  %6798 = vmatprep.subr.bf16.mxu1 %v10726_v4 }
 0x76e   :  { %6713 = vmatpush1.bf16.msra.mxu0 %v10721_v5  ;;  %6799 = vmatpush1.bf16.msra.mxu1 %v10724_v6  ;;  %v10763_v6 = vld [vmem:[#allocation7 + $0x1600] ss:$16 sps:$4 sm:$0xff]  }
 0x76f   :  { %6714 = vmatprep.subr.bf16.mxu0 %v10729_v8  ;;  %6800 = vmatprep.subr.bf16.mxu1 %v10732_v10  ;;  %v10766_v8 = vld [vmem:[#allocation7 + $0x1608] ss:$16 sps:$4 sm:$0xff]   ;;  %v10771_v10 = vld [vmem:[#allocation7 + $0x1624] ss:$16 sps:$4 sm:$0xff]  }
 0x772   :  { %6715 = vmatpush1.bf16.msra.mxu0 %v10727_v11  ;;  %6801 = vmatpush1.bf16.msra.mxu1 %v10730_v12  ;;  %v10774_v11 = vld [vmem:[#allocation7 + $0x162c] ss:$16 sps:$4 sm:$0xff]   ;;  %v10769_v12 = vld [vmem:[#allocation7 + $0x1620] ss:$16 sps:$4 sm:$0xff]  }
 0x773   :  { %6716 = vmatprep.subr.bf16.mxu0 %v10735_v13  ;;  %6802 = vmatprep.subr.bf16.mxu1 %v10738_v14  ;;  %v10772_v13 = vld [vmem:[#allocation7 + $0x1628] ss:$16 sps:$4 sm:$0xff]   ;;  %v10777_v14 = vld [vmem:[#allocation7 + $0x1644] ss:$16 sps:$4 sm:$0xff]  }
 0x776   :  { %6717 = vmatpush1.bf16.msra.mxu0 %v10733_v16  ;;  %6803 = vmatpush1.bf16.msra.mxu1 %v10736_v17  ;;  %v10780_v16 = vld [vmem:[#allocation7 + $0x164c] ss:$16 sps:$4 sm:$0xff]   ;;  %v10775_v17 = vld [vmem:[#allocation7 + $0x1640] ss:$16 sps:$4 sm:$0xff]  }
 0x777   :  { %6718 = vmatprep.subr.bf16.mxu0 %v10741_v19  ;;  %6804 = vmatprep.subr.bf16.mxu1 %v10744_v20  ;;  %v10778_v19 = vld [vmem:[#allocation7 + $0x1648] ss:$16 sps:$4 sm:$0xff]   ;;  %v10783_v20 = vld [vmem:[#allocation7 + $0x1664] ss:$16 sps:$4 sm:$0xff]  }
 0x77a   :  { %6719 = vmatpush1.bf16.msra.mxu0 %v10739_v21  ;;  %6805 = vmatpush1.bf16.msra.mxu1 %v10742_v23  ;;  %v10786_v21 = vld [vmem:[#allocation7 + $0x166c] ss:$16 sps:$4 sm:$0xff]   ;;  %v10781_v23 = vld [vmem:[#allocation7 + $0x1660] ss:$16 sps:$4 sm:$0xff]  }
 0x77b   :  { %6720 = vmatprep.subr.bf16.mxu0 %v10747_v24  ;;  %6806 = vmatprep.subr.bf16.mxu1 %v10750_v63  ;;  %v10784_v24 = vld [vmem:[#allocation7 + $0x1668] ss:$16 sps:$4 sm:$0xff]   ;;  %v10789_v63 = vld [vmem:[#allocation7 + $0x1684] ss:$16 sps:$4 sm:$0xff]  }
 0x77e   :  { %6721 = vmatpush1.bf16.msra.mxu0 %v10745_v25  ;;  %6807 = vmatpush1.bf16.msra.mxu1 %v10748_v27  ;;  %v10792_v25 = vld [vmem:[#allocation7 + $0x168c] ss:$16 sps:$4 sm:$0xff]   ;;  %v10787_v27 = vld [vmem:[#allocation7 + $0x1680] ss:$16 sps:$4 sm:$0xff]  }
 0x77f   :  { %6722 = vmatprep.subr.bf16.mxu0 %v10753_v29  ;;  %6808 = vmatprep.subr.bf16.mxu1 %v10756_v30  ;;  %v10790_v29 = vld [vmem:[#allocation7 + $0x1688] ss:$16 sps:$4 sm:$0xff]   ;;  %v10795_v30 = vld [vmem:[#allocation7 + $0x16a4] ss:$16 sps:$4 sm:$0xff]  }
 0x782   :  { %6723 = vmatpush1.bf16.msra.mxu0 %v10751_v31  ;;  %6809 = vmatpush1.bf16.msra.mxu1 %v10754_v32  ;;  %v10798_v31 = vld [vmem:[#allocation7 + $0x16ac] ss:$16 sps:$4 sm:$0xff]   ;;  %v10793_v32 = vld [vmem:[#allocation7 + $0x16a0] ss:$16 sps:$4 sm:$0xff]  }
 0x783   :  { %6724 = vmatprep.subr.bf16.mxu0 %v10759_v33  ;;  %6810 = vmatprep.subr.bf16.mxu1 %v10762_v34  ;;  %v10796_v33 = vld [vmem:[#allocation7 + $0x16a8] ss:$16 sps:$4 sm:$0xff]   ;;  %v10801_v34 = vld [vmem:[#allocation7 + $0x16c4] ss:$16 sps:$4 sm:$0xff]  }
 0x786   :  { %6725 = vmatpush1.bf16.msra.mxu0 %v10757_v35  ;;  %6811 = vmatpush1.bf16.msra.mxu1 %v10760_v36  ;;  %v10804_v35 = vld [vmem:[#allocation7 + $0x16cc] ss:$16 sps:$4 sm:$0xff]   ;;  %v10799_v36 = vld [vmem:[#allocation7 + $0x16c0] ss:$16 sps:$4 sm:$0xff]  }
 0x787   :  { %6737 = vmatprep.subr.bf16.mxu0 %v10765_v37  ;;  %6823 = vmatprep.subr.bf16.mxu1 %v10768_v38  ;;  %v10802_v37 = vld [vmem:[#allocation7 + $0x16c8] ss:$16 sps:$4 sm:$0xff]   ;;  %v10807_v38 = vld [vmem:[#allocation7 + $0x16e4] ss:$16 sps:$4 sm:$0xff]  }
 0x81c   :  { %v5795_v22 = vpop.f32.mrb[24].mxu0  ;;  %v5881_v43 = vpop.f32.mrb[32].mxu1 }
 0x81d   :  { %v9536_v45 = vadd.f32 %v5795_v22, %v5061_v40  ;;  %v9540_v46 = vadd.f32 %v5881_v43, %v5069_v28  ;;  %v5797_v26 = vpop.f32.mrb[25].mxu0  ;;  %v5883_v47 = vpop.f32.mrb[33].mxu1  ;;  %v10811_v22 = vld [vmem:[#allocation7 + $0x1700] ss:$16 sps:$4 sm:$0xff]   ;;  %v10814_v43 = vld [vmem:[#allocation7 + $0x1708] ss:$16 sps:$4 sm:$0xff]  }
 0x81e   :  { %v9537_v48 = vadd.f32 %v5797_v26, %v5065_v41  ;;  %v9541_v49 = vadd.f32 %v5883_v47, %v5073_v42  ;;  %v5799_v51 = vpop.f32.mrb[26].mxu0  ;;  %v5885_v52 = vpop.f32.mrb[34].mxu1  ;;  %v10817_v26 = vld [vmem:[#allocation7 + $0x1720] ss:$16 sps:$4 sm:$0xff]   ;;  %v10820_v47 = vld [vmem:[#allocation7 + $0x1728] ss:$16 sps:$4 sm:$0xff]  }
 0x81f   :  { %v9538_v53 = vadd.f32 %v5799_v51, %v5061_v40  ;;  %v9542_v54 = vadd.f32 %v5885_v52, %v5069_v28  ;;  %v5801_v55 = vpop.f32.mrb[27].mxu0  ;;  %v5887_v56 = vpop.f32.mrb[35].mxu1  ;;  %v5890_v59 = vmax.f32 %v9536_v45, 0.0  ;;  %v5892_v60 = vmax.f32 %v9540_v46, 0.0  ;;  %v10805_v40 = vld [vmem:[#allocation7 + $0x16e0] ss:$16 sps:$4 sm:$0xff]  }
 0x820   :  { %v9539_v57 = vadd.f32 %v5801_v55, %v5065_v41  ;;  %v9543_v58 = vadd.f32 %v5887_v56, %v5073_v42  ;;  %v5891_v62 = vmax.f32 %v9537_v48, 0.0  ;;  %v5893_v0 = vmax.f32 %v9541_v49, 0.0  ;;  %v10808_v28 = vld [vmem:[#allocation7 + $0x16e8] ss:$16 sps:$4 sm:$0xff]   ;;  %v10813_v41 = vld [vmem:[#allocation7 + $0x1704] ss:$16 sps:$4 sm:$0xff]  }
 0x821   :  { %v5894_v61 = vmax.f32 %v9538_v53, 0.0  ;;  %v5896_v50 = vmax.f32 %v9542_v54, 0.0  ;;  %v10816_v42 = vld [vmem:[#allocation7 + $0x170c] ss:$16 sps:$4 sm:$0xff]   ;;  %v10819_v45 = vld [vmem:[#allocation7 + $0x1724] ss:$16 sps:$4 sm:$0xff]  }
 0x822   :  { %v5895_v1 = vmax.f32 %v9539_v57, 0.0  ;;  %v5897_v44 = vmax.f32 %v9543_v58, 0.0  ;;  %v10822_v46 = vld [vmem:[#allocation7 + $0x172c] ss:$16 sps:$4 sm:$0xff]   ;;  %v10825_v48 = vld [vmem:[#allocation7 + $0x1744] ss:$16 sps:$4 sm:$0xff]  }
 0x823   :  { %v5898_v2 = vpack.c.bf16 %v5894_v61, %v5890_v59  ;;  %v11778_v3 = vpack.c.bf16 %v5896_v50, %v5892_v60  ;;  %v10828_v49 = vld [vmem:[#allocation7 + $0x174c] ss:$16 sps:$4 sm:$0xff]   ;;  %v10823_v51 = vld [vmem:[#allocation7 + $0x1740] ss:$16 sps:$4 sm:$0xff]   ;;  %v10826_v52 = vld [vmem:[#allocation7 + $0x1748] ss:$16 sps:$4 sm:$0xff]  }
 0x824   :  { %v5899_v4 = vpack.c.bf16 %v5895_v1, %v5891_v62  ;;  %v5901_v5 = vpack.c.bf16 %v5897_v44, %v5893_v0  ;;  %v10831_v53 = vld [vmem:[#allocation7 + $0x1764] ss:$16 sps:$4 sm:$0xff]   ;;  %v10834_v54 = vld [vmem:[#allocation7 + $0x176c] ss:$16 sps:$4 sm:$0xff]   ;;  %v10829_v55 = vld [vmem:[#allocation7 + $0x1760] ss:$16 sps:$4 sm:$0xff]  }
 0x825   :  { %v10832_v56 = vld [vmem:[#allocation7 + $0x1768] ss:$16 sps:$4 sm:$0xff]   ;;  %v10837_v57 = vld [vmem:[#allocation7 + $0x1784] ss:$16 sps:$4 sm:$0xff]   ;;  %v10840_v58 = vld [vmem:[#allocation7 + $0x178c] ss:$16 sps:$4 sm:$0xff]  }
 0x826   :  { %6726 = vmatprep.mubr.bf16.mxu0 %v5899_v4  ;;  %6812 = vmatprep.mubr.bf16.mxu1 %v5899_v4  ;;  %v10835_v59 = vld [vmem:[#allocation7 + $0x1780] ss:$16 sps:$4 sm:$0xff]   ;;  %v10838_v60 = vld [vmem:[#allocation7 + $0x1788] ss:$16 sps:$4 sm:$0xff]   ;;  %v10843_v61 = vld [vmem:[#allocation7 + $0x17a4] ss:$16 sps:$4 sm:$0xff]  }
 0x827   :  { %6727 = vmatmul.mubr.bf16.vlgmr.msra.gmra.mrb[28].mxu0 %v5898_v2  ;;  %6813 = vmatmul.mubr.bf16.vlgmr.msra.gmra.mrb[36].mxu1 %v5898_v2  ;;  %v10846_v50 = vld [vmem:[#allocation7 + $0x17ac] ss:$16 sps:$4 sm:$0xff]   ;;  %v10841_v62 = vld [vmem:[#allocation7 + $0x17a0] ss:$16 sps:$4 sm:$0xff]   ;;  %v10844_v0 = vld [vmem:[#allocation7 + $0x17a8] ss:$16 sps:$4 sm:$0xff]  }
 0x828   :  { %6738 = vmatpush1.bf16.msra.mxu0 %v10763_v6  ;;  %6824 = vmatpush1.bf16.msra.mxu1 %v10766_v8  ;;  %v10849_v1 = vld [vmem:[#allocation7 + $0x17c4] ss:$16 sps:$4 sm:$0xff]   ;;  %v10852_v44 = vld [vmem:[#allocation7 + $0x17cc] ss:$16 sps:$4 sm:$0xff]   ;;  %v10847_v2 = vld [vmem:[#allocation7 + $0x17c0] ss:$16 sps:$4 sm:$0xff]  }
 0x829   :  { %6769 = vmatprep.mubr.bf16.mxu0 %v5901_v5  ;;  %6855 = vmatprep.mubr.bf16.mxu1 %v5901_v5  ;;  %v10850_v4 = vld [vmem:[#allocation7 + $0x17c8] ss:$16 sps:$4 sm:$0xff]   ;;  %v10855_v5 = vld [vmem:[#allocation7 + $0x17e4] ss:$16 sps:$4 sm:$0xff]   ;;  %v10858_v6 = vld [vmem:[#allocation7 + $0x17ec] ss:$16 sps:$4 sm:$0xff]  }
 0x82a   :  { %6739 = vmatprep.subr.bf16.mxu0 %v10771_v10  ;;  %6825 = vmatprep.subr.bf16.mxu1 %v10774_v11  ;;  %v10853_v8 = vld [vmem:[#allocation7 + $0x17e0] ss:$16 sps:$4 sm:$0xff]   ;;  %v10856_v10 = vld [vmem:[#allocation7 + $0x17e8] ss:$16 sps:$4 sm:$0xff]   ;;  %v10861_v11 = vld [vmem:[#allocation7 + $0x1804] ss:$16 sps:$4 sm:$0xff]  }
 0x82c   :  { %6740 = vmatpush1.bf16.msra.mxu0 %v10769_v12  ;;  %6826 = vmatpush1.bf16.msra.mxu1 %v10772_v13  ;;  %v10864_v12 = vld [vmem:[#allocation7 + $0x180c] ss:$16 sps:$4 sm:$0xff]   ;;  %v10859_v13 = vld [vmem:[#allocation7 + $0x1800] ss:$16 sps:$4 sm:$0xff]  }
 0x82d   :  { %6741 = vmatprep.subr.bf16.mxu0 %v10777_v14  ;;  %6827 = vmatprep.subr.bf16.mxu1 %v10780_v16  ;;  %v10862_v14 = vld [vmem:[#allocation7 + $0x1808] ss:$16 sps:$4 sm:$0xff]   ;;  %v10867_v16 = vld [vmem:[#allocation7 + $0x1824] ss:$16 sps:$4 sm:$0xff]  }
 0x830   :  { %6742 = vmatpush1.bf16.msra.mxu0 %v10775_v17  ;;  %6828 = vmatpush1.bf16.msra.mxu1 %v10778_v19  ;;  %v10870_v17 = vld [vmem:[#allocation7 + $0x182c] ss:$16 sps:$4 sm:$0xff]   ;;  %v10865_v19 = vld [vmem:[#allocation7 + $0x1820] ss:$16 sps:$4 sm:$0xff]  }
 0x831   :  { %6743 = vmatprep.subr.bf16.mxu0 %v10783_v20  ;;  %6829 = vmatprep.subr.bf16.mxu1 %v10786_v21  ;;  %v10868_v20 = vld [vmem:[#allocation7 + $0x1828] ss:$16 sps:$4 sm:$0xff]   ;;  %v10873_v21 = vld [vmem:[#allocation7 + $0x1844] ss:$16 sps:$4 sm:$0xff]  }
 0x834   :  { %6744 = vmatpush1.bf16.msra.mxu0 %v10781_v23  ;;  %6830 = vmatpush1.bf16.msra.mxu1 %v10784_v24  ;;  %v10876_v23 = vld [vmem:[#allocation7 + $0x184c] ss:$16 sps:$4 sm:$0xff]   ;;  %v10871_v24 = vld [vmem:[#allocation7 + $0x1840] ss:$16 sps:$4 sm:$0xff]  }
 0x835   :  { %6745 = vmatprep.subr.bf16.mxu0 %v10789_v63  ;;  %6831 = vmatprep.subr.bf16.mxu1 %v10792_v25  ;;  %v10874_v63 = vld [vmem:[#allocation7 + $0x1848] ss:$16 sps:$4 sm:$0xff]   ;;  %v10879_v25 = vld [vmem:[#allocation7 + $0x1864] ss:$16 sps:$4 sm:$0xff]  }
 0x838   :  { %6746 = vmatpush1.bf16.msra.mxu0 %v10787_v27  ;;  %6832 = vmatpush1.bf16.msra.mxu1 %v10790_v29  ;;  %v10882_v27 = vld [vmem:[#allocation7 + $0x186c] ss:$16 sps:$4 sm:$0xff]   ;;  %v10877_v29 = vld [vmem:[#allocation7 + $0x1860] ss:$16 sps:$4 sm:$0xff]  }
 0x839   :  { %6747 = vmatprep.subr.bf16.mxu0 %v10795_v30  ;;  %6833 = vmatprep.subr.bf16.mxu1 %v10798_v31  ;;  %v10885_v30 = vld [vmem:[#allocation7 + $0x1884] ss:$16 sps:$4 sm:$0xff]   ;;  %v10888_v31 = vld [vmem:[#allocation7 + $0x188c] ss:$16 sps:$4 sm:$0xff]  }
 0x83c   :  { %6748 = vmatpush1.bf16.msra.mxu0 %v10793_v32  ;;  %6834 = vmatpush1.bf16.msra.mxu1 %v10796_v33  ;;  %v10883_v32 = vld [vmem:[#allocation7 + $0x1880] ss:$16 sps:$4 sm:$0xff]   ;;  %v10886_v33 = vld [vmem:[#allocation7 + $0x1888] ss:$16 sps:$4 sm:$0xff]  }
 0x83d   :  { %6749 = vmatprep.subr.bf16.mxu0 %v10801_v34  ;;  %6835 = vmatprep.subr.bf16.mxu1 %v10804_v35  ;;  %v10891_v34 = vld [vmem:[#allocation7 + $0x18a4] ss:$16 sps:$4 sm:$0xff]   ;;  %v10894_v35 = vld [vmem:[#allocation7 + $0x18ac] ss:$16 sps:$4 sm:$0xff]  }
 0x840   :  { %6750 = vmatpush1.bf16.msra.mxu0 %v10799_v36  ;;  %6836 = vmatpush1.bf16.msra.mxu1 %v10802_v37  ;;  %v10889_v36 = vld [vmem:[#allocation7 + $0x18a0] ss:$16 sps:$4 sm:$0xff]   ;;  %v10892_v37 = vld [vmem:[#allocation7 + $0x18a8] ss:$16 sps:$4 sm:$0xff]  }
 0x841   :  { %6751 = vmatprep.subr.bf16.mxu0 %v10807_v38  ;;  %6837 = vmatprep.subr.bf16.mxu1 %v10810_v39  ;;  %v10897_v38 = vld [vmem:[#allocation7 + $0x18c4] ss:$16 sps:$4 sm:$0xff]   ;;  %v10900_v39 = vld [vmem:[#allocation7 + $0x18cc] ss:$16 sps:$4 sm:$0xff]  }
 0x844   :  { %6752 = vmatpush1.bf16.msra.mxu0 %v10805_v40  ;;  %6838 = vmatpush1.bf16.msra.mxu1 %v10808_v28  ;;  %v10895_v40 = vld [vmem:[#allocation7 + $0x18c0] ss:$16 sps:$4 sm:$0xff]   ;;  %v10898_v28 = vld [vmem:[#allocation7 + $0x18c8] ss:$16 sps:$4 sm:$0xff]  }
 0x845   :  { %6753 = vmatprep.subr.bf16.mxu0 %v10813_v41  ;;  %6839 = vmatprep.subr.bf16.mxu1 %v10816_v42  ;;  %v10903_v41 = vld [vmem:[#allocation7 + $0x18e4] ss:$16 sps:$4 sm:$0xff]   ;;  %v10906_v42 = vld [vmem:[#allocation7 + $0x18ec] ss:$16 sps:$4 sm:$0xff]  }
 0x848   :  { %6754 = vmatpush1.bf16.msra.mxu0 %v10811_v22  ;;  %6840 = vmatpush1.bf16.msra.mxu1 %v10814_v43  ;;  %v10901_v22 = vld [vmem:[#allocation7 + $0x18e0] ss:$16 sps:$4 sm:$0xff]   ;;  %v10904_v43 = vld [vmem:[#allocation7 + $0x18e8] ss:$16 sps:$4 sm:$0xff]  }
 0x849   :  { %6755 = vmatprep.subr.bf16.mxu0 %v10819_v45  ;;  %6841 = vmatprep.subr.bf16.mxu1 %v10822_v46  ;;  %v10909_v45 = vld [vmem:[#allocation7 + $0x1904] ss:$16 sps:$4 sm:$0xff]   ;;  %v10912_v46 = vld [vmem:[#allocation7 + $0x190c] ss:$16 sps:$4 sm:$0xff]  }
 0x84c   :  { %6756 = vmatpush1.bf16.msra.mxu0 %v10817_v26  ;;  %6842 = vmatpush1.bf16.msra.mxu1 %v10820_v47  ;;  %v10907_v26 = vld [vmem:[#allocation7 + $0x1900] ss:$16 sps:$4 sm:$0xff]   ;;  %v10910_v47 = vld [vmem:[#allocation7 + $0x1908] ss:$16 sps:$4 sm:$0xff]  }
 0x84d   :  { %6757 = vmatprep.subr.bf16.mxu0 %v10825_v48  ;;  %6843 = vmatprep.subr.bf16.mxu1 %v10828_v49  ;;  %v10915_v48 = vld [vmem:[#allocation7 + $0x1924] ss:$16 sps:$4 sm:$0xff]   ;;  %v10918_v49 = vld [vmem:[#allocation7 + $0x192c] ss:$16 sps:$4 sm:$0xff]  }
 0x850   :  { %6758 = vmatpush1.bf16.msra.mxu0 %v10823_v51  ;;  %6844 = vmatpush1.bf16.msra.mxu1 %v10826_v52  ;;  %v10913_v51 = vld [vmem:[#allocation7 + $0x1920] ss:$16 sps:$4 sm:$0xff]   ;;  %v10916_v52 = vld [vmem:[#allocation7 + $0x1928] ss:$16 sps:$4 sm:$0xff]  }
 0x851   :  { %6759 = vmatprep.subr.bf16.mxu0 %v10831_v53  ;;  %6845 = vmatprep.subr.bf16.mxu1 %v10834_v54  ;;  %v10921_v53 = vld [vmem:[#allocation7 + $0x1944] ss:$16 sps:$4 sm:$0xff]   ;;  %v10924_v54 = vld [vmem:[#allocation7 + $0x194c] ss:$16 sps:$4 sm:$0xff]  }
 0x854   :  { %6760 = vmatpush1.bf16.msra.mxu0 %v10829_v55  ;;  %6846 = vmatpush1.bf16.msra.mxu1 %v10832_v56  ;;  %v10919_v55 = vld [vmem:[#allocation7 + $0x1940] ss:$16 sps:$4 sm:$0xff]   ;;  %v10922_v56 = vld [vmem:[#allocation7 + $0x1948] ss:$16 sps:$4 sm:$0xff]  }
 0x855   :  { %6761 = vmatprep.subr.bf16.mxu0 %v10837_v57  ;;  %6847 = vmatprep.subr.bf16.mxu1 %v10840_v58  ;;  %v10927_v57 = vld [vmem:[#allocation7 + $0x1964] ss:$16 sps:$4 sm:$0xff]   ;;  %v10930_v58 = vld [vmem:[#allocation7 + $0x196c] ss:$16 sps:$4 sm:$0xff]  }
 0x858   :  { %6762 = vmatpush1.bf16.msra.mxu0 %v10835_v59  ;;  %6848 = vmatpush1.bf16.msra.mxu1 %v10838_v60  ;;  %v10925_v59 = vld [vmem:[#allocation7 + $0x1960] ss:$16 sps:$4 sm:$0xff]   ;;  %v10928_v60 = vld [vmem:[#allocation7 + $0x1968] ss:$16 sps:$4 sm:$0xff]  }
 0x859   :  { %6763 = vmatprep.subr.bf16.mxu0 %v10843_v61  ;;  %6849 = vmatprep.subr.bf16.mxu1 %v10846_v50  ;;  %v10933_v61 = vld [vmem:[#allocation7 + $0x1984] ss:$16 sps:$4 sm:$0xff]   ;;  %v10936_v50 = vld [vmem:[#allocation7 + $0x198c] ss:$16 sps:$4 sm:$0xff]  }
 0x85c   :  { %6764 = vmatpush1.bf16.msra.mxu0 %v10841_v62  ;;  %6850 = vmatpush1.bf16.msra.mxu1 %v10844_v0  ;;  %v10931_v62 = vld [vmem:[#allocation7 + $0x1980] ss:$16 sps:$4 sm:$0xff]   ;;  %v10934_v0 = vld [vmem:[#allocation7 + $0x1988] ss:$16 sps:$4 sm:$0xff]  }
 0x85d   :  { %6765 = vmatprep.subr.bf16.mxu0 %v10849_v1  ;;  %6851 = vmatprep.subr.bf16.mxu1 %v10852_v44  ;;  %v10939_v1 = vld [vmem:[#allocation7 + $0x19a4] ss:$16 sps:$4 sm:$0xff]   ;;  %v10942_v44 = vld [vmem:[#allocation7 + $0x19ac] ss:$16 sps:$4 sm:$0xff]  }
 0x860   :  { %6766 = vmatpush1.bf16.msra.mxu0 %v10847_v2  ;;  %6852 = vmatpush1.bf16.msra.mxu1 %v10850_v4  ;;  %v10937_v2 = vld [vmem:[#allocation7 + $0x19a0] ss:$16 sps:$4 sm:$0xff]   ;;  %v10940_v4 = vld [vmem:[#allocation7 + $0x19a8] ss:$16 sps:$4 sm:$0xff]  }
 0x861   :  { %6767 = vmatprep.subr.bf16.mxu0 %v10855_v5  ;;  %6853 = vmatprep.subr.bf16.mxu1 %v10858_v6  ;;  %v10945_v5 = vld [vmem:[#allocation7 + $0x19c4] ss:$16 sps:$4 sm:$0xff]   ;;  %v10948_v6 = vld [vmem:[#allocation7 + $0x19cc] ss:$16 sps:$4 sm:$0xff]  }
 0x864   :  { %6768 = vmatpush1.bf16.msra.mxu0 %v10853_v8  ;;  %6854 = vmatpush1.bf16.msra.mxu1 %v10856_v10  ;;  %v10943_v8 = vld [vmem:[#allocation7 + $0x19c0] ss:$16 sps:$4 sm:$0xff]   ;;  %v10946_v10 = vld [vmem:[#allocation7 + $0x19c8] ss:$16 sps:$4 sm:$0xff]  }
 0x865   :  { %7670 = vmatprep.subr.bf16.mxu0 %v10861_v11  ;;  %7756 = vmatprep.subr.bf16.mxu1 %v10864_v12  ;;  %v10951_v11 = vld [vmem:[#allocation7 + $0x19e4] ss:$16 sps:$4 sm:$0xff]   ;;  %v10954_v12 = vld [vmem:[#allocation7 + $0x19ec] ss:$16 sps:$4 sm:$0xff]  }
 0x867   :  { %6770 = vmatmul.mubr.bf16.vlgmr.msra.gmra.mrb[28].mxu0 %v11778_v3  ;;  %6856 = vmatmul.mubr.bf16.vlgmr.msra.gmra.mrb[36].mxu1 %v11778_v3  ;;  %v10880_v3 = vld [vmem:[#allocation7 + $0x1868] ss:$16 sps:$4 sm:$0xff]  }
 0x868   :  { %7671 = vmatpush1.bf16.msra.mxu0 %v10859_v13  ;;  %7757 = vmatpush1.bf16.msra.mxu1 %v10862_v14  ;;  %v10949_v13 = vld [vmem:[#allocation7 + $0x19e0] ss:$16 sps:$4 sm:$0xff]   ;;  %v10952_v14 = vld [vmem:[#allocation7 + $0x19e8] ss:$16 sps:$4 sm:$0xff]  }
 0x869   :  { %7672 = vmatprep.subr.bf16.mxu0 %v10867_v16  ;;  %7758 = vmatprep.subr.bf16.mxu1 %v10870_v17  ;;  %v10957_v16 = vld [vmem:[#allocation7 + $0x1a04] ss:$16 sps:$4 sm:$0xff]   ;;  %v10960_v17 = vld [vmem:[#allocation7 + $0x1a0c] ss:$16 sps:$4 sm:$0xff]  }
 0x86c   :  { %7673 = vmatpush1.bf16.msra.mxu0 %v10865_v19  ;;  %7759 = vmatpush1.bf16.msra.mxu1 %v10868_v20  ;;  %v6032_v19 = vld [vmem:[#allocation9 + $0x14] sm:$0xf] }
 0x86d   :  { %7674 = vmatprep.subr.bf16.mxu0 %v10873_v21  ;;  %7760 = vmatprep.subr.bf16.mxu1 %v10876_v23  ;;  %v6037_v20 = vrot.slane %v6032_v19, %v11726_v7  ;;  %v6045_v21 = vrot.slane %v6032_v19, %v11732_v15  ;;  %v6041_v23 = vrot.slane %v6032_v19, %v11728_v9 }
 0x870   :  { %7675 = vmatpush1.bf16.msra.mxu0 %v10871_v24  ;;  %7761 = vmatpush1.bf16.msra.mxu1 %v10874_v63  ;;  %v6049_v24 = vrot.slane %v6032_v19, %v11734_v18  ;;  %v11002_v19 = vld [vmem:[#allocation7 + $0x1aec] ss:$16 sps:$4 sm:$0xff]  }
 0x871   :  { %7676 = vmatprep.subr.bf16.mxu0 %v10879_v25  ;;  %7762 = vmatprep.subr.bf16.mxu1 %v10882_v27 }
 0x874   :  { %7677 = vmatpush1.bf16.msra.mxu0 %v10877_v29  ;;  %7763 = vmatpush1.bf16.msra.mxu1 %v10880_v3 }
 0x875   :  { %7678 = vmatprep.subr.bf16.mxu0 %v10885_v30  ;;  %7764 = vmatprep.subr.bf16.mxu1 %v10888_v31 }
 0x878   :  { %7679 = vmatpush1.bf16.msra.mxu0 %v10883_v32  ;;  %7765 = vmatpush1.bf16.msra.mxu1 %v10886_v33 }
 0x879   :  { %7680 = vmatprep.subr.bf16.mxu0 %v10891_v34  ;;  %7766 = vmatprep.subr.bf16.mxu1 %v10894_v35 }
 0x87c   :  { %7681 = vmatpush1.bf16.msra.mxu0 %v10889_v36  ;;  %7767 = vmatpush1.bf16.msra.mxu1 %v10892_v37 }
 0x87d   :  { %7682 = vmatprep.subr.bf16.mxu0 %v10897_v38  ;;  %7768 = vmatprep.subr.bf16.mxu1 %v10900_v39 }
 0x880   :  { %7683 = vmatpush1.bf16.msra.mxu0 %v10895_v40  ;;  %7769 = vmatpush1.bf16.msra.mxu1 %v10898_v28 }
 0x881   :  { %7684 = vmatprep.subr.bf16.mxu0 %v10903_v41  ;;  %7770 = vmatprep.subr.bf16.mxu1 %v10906_v42 }
 0x884   :  { %7685 = vmatpush1.bf16.msra.mxu0 %v10901_v22  ;;  %7771 = vmatpush1.bf16.msra.mxu1 %v10904_v43 }
 0x885   :  { %7686 = vmatprep.subr.bf16.mxu0 %v10909_v45  ;;  %7772 = vmatprep.subr.bf16.mxu1 %v10912_v46 }
 0x888   :  { %7687 = vmatpush1.bf16.msra.mxu0 %v10907_v26  ;;  %7773 = vmatpush1.bf16.msra.mxu1 %v10910_v47 }
 0x889   :  { %7688 = vmatprep.subr.bf16.mxu0 %v10915_v48  ;;  %7774 = vmatprep.subr.bf16.mxu1 %v10918_v49 }
 0x88c   :  { %7689 = vmatpush1.bf16.msra.mxu0 %v10913_v51  ;;  %7775 = vmatpush1.bf16.msra.mxu1 %v10916_v52  ;;  %v10955_v52 = vld [vmem:[#allocation7 + $0x1a00] ss:$16 sps:$4 sm:$0xff]  }
 0x88d   :  { %7690 = vmatprep.subr.bf16.mxu0 %v10921_v53  ;;  %7776 = vmatprep.subr.bf16.mxu1 %v10924_v54  ;;  %v10958_v53 = vld [vmem:[#allocation7 + $0x1a08] ss:$16 sps:$4 sm:$0xff]   ;;  %v10963_v54 = vld [vmem:[#allocation7 + $0x1a24] ss:$16 sps:$4 sm:$0xff]  }
 0x890   :  { %7691 = vmatpush1.bf16.msra.mxu0 %v10919_v55  ;;  %7777 = vmatpush1.bf16.msra.mxu1 %v10922_v56  ;;  %v10966_v55 = vld [vmem:[#allocation7 + $0x1a2c] ss:$16 sps:$4 sm:$0xff]   ;;  %v10961_v56 = vld [vmem:[#allocation7 + $0x1a20] ss:$16 sps:$4 sm:$0xff]  }
 0x891   :  { %7692 = vmatprep.subr.bf16.mxu0 %v10927_v57  ;;  %7778 = vmatprep.subr.bf16.mxu1 %v10930_v58  ;;  %v10964_v57 = vld [vmem:[#allocation7 + $0x1a28] ss:$16 sps:$4 sm:$0xff]   ;;  %v10969_v58 = vld [vmem:[#allocation7 + $0x1a44] ss:$16 sps:$4 sm:$0xff]  }
 0x894   :  { %7693 = vmatpush1.bf16.msra.mxu0 %v10925_v59  ;;  %7779 = vmatpush1.bf16.msra.mxu1 %v10928_v60  ;;  %v10972_v59 = vld [vmem:[#allocation7 + $0x1a4c] ss:$16 sps:$4 sm:$0xff]   ;;  %v10967_v60 = vld [vmem:[#allocation7 + $0x1a40] ss:$16 sps:$4 sm:$0xff]  }
 0x895   :  { %7694 = vmatprep.subr.bf16.mxu0 %v10933_v61  ;;  %7780 = vmatprep.subr.bf16.mxu1 %v10936_v50  ;;  %v10970_v61 = vld [vmem:[#allocation7 + $0x1a48] ss:$16 sps:$4 sm:$0xff]   ;;  %v10975_v50 = vld [vmem:[#allocation7 + $0x1a64] ss:$16 sps:$4 sm:$0xff]  }
 0x898   :  { %7695 = vmatpush1.bf16.msra.mxu0 %v10931_v62  ;;  %7781 = vmatpush1.bf16.msra.mxu1 %v10934_v0  ;;  %v10978_v62 = vld [vmem:[#allocation7 + $0x1a6c] ss:$16 sps:$4 sm:$0xff]   ;;  %v10973_v0 = vld [vmem:[#allocation7 + $0x1a60] ss:$16 sps:$4 sm:$0xff]  }
 0x899   :  { %7696 = vmatprep.subr.bf16.mxu0 %v10939_v1  ;;  %7782 = vmatprep.subr.bf16.mxu1 %v10942_v44  ;;  %v10976_v1 = vld [vmem:[#allocation7 + $0x1a68] ss:$16 sps:$4 sm:$0xff]   ;;  %v10981_v44 = vld [vmem:[#allocation7 + $0x1a84] ss:$16 sps:$4 sm:$0xff]  }
 0x89c   :  { %7697 = vmatpush1.bf16.msra.mxu0 %v10937_v2  ;;  %7783 = vmatpush1.bf16.msra.mxu1 %v10940_v4  ;;  %v10984_v2 = vld [vmem:[#allocation7 + $0x1a8c] ss:$16 sps:$4 sm:$0xff]   ;;  %v10979_v4 = vld [vmem:[#allocation7 + $0x1a80] ss:$16 sps:$4 sm:$0xff]  }
 0x89d   :  { %7698 = vmatprep.subr.bf16.mxu0 %v10945_v5  ;;  %7784 = vmatprep.subr.bf16.mxu1 %v10948_v6  ;;  %v10982_v5 = vld [vmem:[#allocation7 + $0x1a88] ss:$16 sps:$4 sm:$0xff]   ;;  %v10987_v6 = vld [vmem:[#allocation7 + $0x1aa4] ss:$16 sps:$4 sm:$0xff]  }
 0x8a0   :  { %7699 = vmatpush1.bf16.msra.mxu0 %v10943_v8  ;;  %7785 = vmatpush1.bf16.msra.mxu1 %v10946_v10  ;;  %v10990_v8 = vld [vmem:[#allocation7 + $0x1aac] ss:$16 sps:$4 sm:$0xff]   ;;  %v10985_v10 = vld [vmem:[#allocation7 + $0x1aa0] ss:$16 sps:$4 sm:$0xff]  }
 0x8a1   :  { %7700 = vmatprep.subr.bf16.mxu0 %v10951_v11  ;;  %7786 = vmatprep.subr.bf16.mxu1 %v10954_v12  ;;  %v10988_v11 = vld [vmem:[#allocation7 + $0x1aa8] ss:$16 sps:$4 sm:$0xff]   ;;  %v10993_v12 = vld [vmem:[#allocation7 + $0x1ac4] ss:$16 sps:$4 sm:$0xff]  }
 0x8a4   :  { %7701 = vmatpush1.bf16.msra.mxu0 %v10949_v13  ;;  %7787 = vmatpush1.bf16.msra.mxu1 %v10952_v14  ;;  %v10996_v13 = vld [vmem:[#allocation7 + $0x1acc] ss:$16 sps:$4 sm:$0xff]   ;;  %v10991_v14 = vld [vmem:[#allocation7 + $0x1ac0] ss:$16 sps:$4 sm:$0xff]  }
 0x8a5   :  { %7713 = vmatprep.subr.bf16.mxu0 %v10957_v16  ;;  %7799 = vmatprep.subr.bf16.mxu1 %v10960_v17  ;;  %v10994_v16 = vld [vmem:[#allocation7 + $0x1ac8] ss:$16 sps:$4 sm:$0xff]   ;;  %v10999_v17 = vld [vmem:[#allocation7 + $0x1ae4] ss:$16 sps:$4 sm:$0xff]  }
 0x93a   :  { %v6771_v63 = vpop.f32.mrb[28].mxu0  ;;  %v6857_v25 = vpop.f32.mrb[36].mxu1 }
 0x93b   :  { %v9544_v27 = vadd.f32 %v6771_v63, %v6037_v20  ;;  %v9548_v29 = vadd.f32 %v6857_v25, %v6045_v21  ;;  %v6773_v3 = vpop.f32.mrb[29].mxu0  ;;  %v6859_v30 = vpop.f32.mrb[37].mxu1  ;;  %v11003_v63 = vld [vmem:[#allocation7 + $0x1b00] ss:$16 sps:$4 sm:$0xff]   ;;  %v11006_v25 = vld [vmem:[#allocation7 + $0x1b08] ss:$16 sps:$4 sm:$0xff]  }
 0x93c   :  { %v9545_v31 = vadd.f32 %v6773_v3, %v6041_v23  ;;  %v9549_v32 = vadd.f32 %v6859_v30, %v6049_v24  ;;  %v6775_v33 = vpop.f32.mrb[30].mxu0  ;;  %v6861_v34 = vpop.f32.mrb[38].mxu1  ;;  %v11009_v3 = vld [vmem:[#allocation7 + $0x1b20] ss:$16 sps:$4 sm:$0xff]   ;;  %v11012_v30 = vld [vmem:[#allocation7 + $0x1b28] ss:$16 sps:$4 sm:$0xff]  }
 0x93d   :  { %v9546_v35 = vadd.f32 %v6775_v33, %v6037_v20  ;;  %v9550_v36 = vadd.f32 %v6861_v34, %v6045_v21  ;;  %v6777_v37 = vpop.f32.mrb[31].mxu0  ;;  %v6863_v38 = vpop.f32.mrb[39].mxu1  ;;  %v6866_v28 = vmax.f32 %v9544_v27, 0.0  ;;  %v6868_v41 = vmax.f32 %v9548_v29, 0.0  ;;  %v10997_v20 = vld [vmem:[#allocation7 + $0x1ae0] ss:$16 sps:$4 sm:$0xff]  }
 0x93e   :  { %v9547_v39 = vadd.f32 %v6777_v37, %v6041_v23  ;;  %v9551_v40 = vadd.f32 %v6863_v38, %v6049_v24  ;;  %v6867_v43 = vmax.f32 %v9545_v31, 0.0  ;;  %v6869_v45 = vmax.f32 %v9549_v32, 0.0  ;;  %v11000_v21 = vld [vmem:[#allocation7 + $0x1ae8] ss:$16 sps:$4 sm:$0xff]   ;;  %v11005_v23 = vld [vmem:[#allocation7 + $0x1b04] ss:$16 sps:$4 sm:$0xff]  }
 0x93f   :  { %v6870_v42 = vmax.f32 %v9546_v35, 0.0  ;;  %v6872_v22 = vmax.f32 %v9550_v36, 0.0  ;;  %v11008_v24 = vld [vmem:[#allocation7 + $0x1b0c] ss:$16 sps:$4 sm:$0xff]   ;;  %v11011_v27 = vld [vmem:[#allocation7 + $0x1b24] ss:$16 sps:$4 sm:$0xff]  }
 0x940   :  { %v6871_v46 = vmax.f32 %v9547_v39, 0.0  ;;  %v6873_v26 = vmax.f32 %v9551_v40, 0.0  ;;  %v11014_v29 = vld [vmem:[#allocation7 + $0x1b2c] ss:$16 sps:$4 sm:$0xff]   ;;  %v11017_v31 = vld [vmem:[#allocation7 + $0x1b44] ss:$16 sps:$4 sm:$0xff]  }
 0x941   :  { %v6874_v47 = vpack.c.bf16 %v6870_v42, %v6866_v28  ;;  %v11786_v48 = vpack.c.bf16 %v6872_v22, %v6868_v41  ;;  %v11020_v32 = vld [vmem:[#allocation7 + $0x1b4c] ss:$16 sps:$4 sm:$0xff]   ;;  %v11015_v33 = vld [vmem:[#allocation7 + $0x1b40] ss:$16 sps:$4 sm:$0xff]   ;;  %v11018_v34 = vld [vmem:[#allocation7 + $0x1b48] ss:$16 sps:$4 sm:$0xff]  }
 0x942   :  { %v6875_v49 = vpack.c.bf16 %v6871_v46, %v6867_v43  ;;  %v6877_v51 = vpack.c.bf16 %v6873_v26, %v6869_v45  ;;  %v11023_v35 = vld [vmem:[#allocation7 + $0x1b64] ss:$16 sps:$4 sm:$0xff]   ;;  %v11026_v36 = vld [vmem:[#allocation7 + $0x1b6c] ss:$16 sps:$4 sm:$0xff]   ;;  %v11021_v37 = vld [vmem:[#allocation7 + $0x1b60] ss:$16 sps:$4 sm:$0xff]  }
 0x943   :  { %v11024_v38 = vld [vmem:[#allocation7 + $0x1b68] ss:$16 sps:$4 sm:$0xff]   ;;  %v11029_v39 = vld [vmem:[#allocation7 + $0x1b84] ss:$16 sps:$4 sm:$0xff]   ;;  %v11032_v40 = vld [vmem:[#allocation7 + $0x1b8c] ss:$16 sps:$4 sm:$0xff]  }
 0x944   :  { %7702 = vmatprep.mubr.bf16.mxu0 %v6875_v49  ;;  %7788 = vmatprep.mubr.bf16.mxu1 %v6875_v49  ;;  %v11027_v28 = vld [vmem:[#allocation7 + $0x1b80] ss:$16 sps:$4 sm:$0xff]   ;;  %v11030_v41 = vld [vmem:[#allocation7 + $0x1b88] ss:$16 sps:$4 sm:$0xff]   ;;  %v11035_v42 = vld [vmem:[#allocation7 + $0x1ba4] ss:$16 sps:$4 sm:$0xff]  }
 0x945   :  { %7703 = vmatmul.mubr.bf16.vlgmr.msra.gmra.mrb[32].mxu0 %v6874_v47  ;;  %7789 = vmatmul.mubr.bf16.vlgmr.msra.gmra.mrb[40].mxu1 %v6874_v47  ;;  %v11038_v22 = vld [vmem:[#allocation7 + $0x1bac] ss:$16 sps:$4 sm:$0xff]   ;;  %v11033_v43 = vld [vmem:[#allocation7 + $0x1ba0] ss:$16 sps:$4 sm:$0xff]   ;;  %v11036_v45 = vld [vmem:[#allocation7 + $0x1ba8] ss:$16 sps:$4 sm:$0xff]  }
 0x946   :  { %7714 = vmatpush1.bf16.msra.mxu0 %v10955_v52  ;;  %7800 = vmatpush1.bf16.msra.mxu1 %v10958_v53  ;;  %v11041_v46 = vld [vmem:[#allocation7 + $0x1bc4] ss:$16 sps:$4 sm:$0xff]   ;;  %v11044_v26 = vld [vmem:[#allocation7 + $0x1bcc] ss:$16 sps:$4 sm:$0xff]   ;;  %v11039_v47 = vld [vmem:[#allocation7 + $0x1bc0] ss:$16 sps:$4 sm:$0xff]  }
 0x947   :  { %7745 = vmatprep.mubr.bf16.mxu0 %v6877_v51  ;;  %7831 = vmatprep.mubr.bf16.mxu1 %v6877_v51  ;;  %v11042_v49 = vld [vmem:[#allocation7 + $0x1bc8] ss:$16 sps:$4 sm:$0xff]   ;;  %v11047_v51 = vld [vmem:[#allocation7 + $0x1be4] ss:$16 sps:$4 sm:$0xff]   ;;  %v11050_v52 = vld [vmem:[#allocation7 + $0x1bec] ss:$16 sps:$4 sm:$0xff]  }
 0x948   :  { %7715 = vmatprep.subr.bf16.mxu0 %v10963_v54  ;;  %7801 = vmatprep.subr.bf16.mxu1 %v10966_v55  ;;  %v11045_v53 = vld [vmem:[#allocation7 + $0x1be0] ss:$16 sps:$4 sm:$0xff]   ;;  %v11048_v54 = vld [vmem:[#allocation7 + $0x1be8] ss:$16 sps:$4 sm:$0xff]  }
 0x949   :  { %v11051_v55 = vld [vmem:[#allocation10 + $0x40] sm:$0xff]  }
 0x94a   :  { %7716 = vmatpush1.bf16.msra.mxu0 %v10961_v56  ;;  %7802 = vmatpush1.bf16.msra.mxu1 %v10964_v57  ;;  %v11052_v56 = vld [vmem:[#allocation10 + $0xc0] sm:$0xff]  }
 0x94b   :  { %7717 = vmatprep.subr.bf16.mxu0 %v10969_v58  ;;  %7803 = vmatprep.subr.bf16.mxu1 %v10972_v59  ;;  %v11053_v57 = vld [vmem:[#allocation10] sm:$0xff]   ;;  %v11055_v59 = vld [vmem:[#allocation10 + $0x48] sm:$0xff]  }
 0x94c   :  { %v11054_v58 = vld [vmem:[#allocation10 + $0x80] sm:$0xff]  }
 0x94e   :  { %7718 = vmatpush1.bf16.msra.mxu0 %v10967_v60  ;;  %7804 = vmatpush1.bf16.msra.mxu1 %v10970_v61  ;;  %v11056_v60 = vld [vmem:[#allocation10 + $0xc8] sm:$0xff]  }
 0x94f   :  { %7719 = vmatprep.subr.bf16.mxu0 %v10975_v50  ;;  %7805 = vmatprep.subr.bf16.mxu1 %v10978_v62  ;;  %v11057_v61 = vld [vmem:[#allocation10 + $0x8] sm:$0xff]   ;;  %v11059_v62 = vld [vmem:[#allocation10 + $0x50] sm:$0xff]  }
 0x950   :  { %v11058_v50 = vld [vmem:[#allocation10 + $0x88] sm:$0xff]  }
 0x952   :  { %7720 = vmatpush1.bf16.msra.mxu0 %v10973_v0  ;;  %7806 = vmatpush1.bf16.msra.mxu1 %v10976_v1  ;;  %v11060_v0 = vld [vmem:[#allocation10 + $0xd0] sm:$0xff]  }
 0x953   :  { %7721 = vmatprep.subr.bf16.mxu0 %v10981_v44  ;;  %7807 = vmatprep.subr.bf16.mxu1 %v10984_v2  ;;  %v11061_v1 = vld [vmem:[#allocation10 + $0x10] sm:$0xff]   ;;  %v11063_v2 = vld [vmem:[#allocation10 + $0x58] sm:$0xff]  }
 0x954   :  { %v11062_v44 = vld [vmem:[#allocation10 + $0x90] sm:$0xff]  }
 0x956   :  { %7722 = vmatpush1.bf16.msra.mxu0 %v10979_v4  ;;  %7808 = vmatpush1.bf16.msra.mxu1 %v10982_v5  ;;  %v11064_v4 = vld [vmem:[#allocation10 + $0xd8] sm:$0xff]  }
 0x957   :  { %7723 = vmatprep.subr.bf16.mxu0 %v10987_v6  ;;  %7809 = vmatprep.subr.bf16.mxu1 %v10990_v8  ;;  %v11065_v5 = vld [vmem:[#allocation10 + $0x18] sm:$0xff]   ;;  %v11067_v6 = vld [vmem:[#allocation10 + $0x60] sm:$0xff]  }
 0x958   :  { %v11068_v8 = vld [vmem:[#allocation10 + $0xe0] sm:$0xff]  }
 0x95a   :  { %7724 = vmatpush1.bf16.msra.mxu0 %v10985_v10  ;;  %7810 = vmatpush1.bf16.msra.mxu1 %v10988_v11  ;;  %v11069_v10 = vld [vmem:[#allocation10 + $0x20] sm:$0xff]  }
 0x95b   :  { %7725 = vmatprep.subr.bf16.mxu0 %v10993_v12  ;;  %7811 = vmatprep.subr.bf16.mxu1 %v10996_v13  ;;  %v11070_v11 = vld [vmem:[#allocation10 + $0xa0] sm:$0xff]   ;;  %v11071_v12 = vld [vmem:[#allocation10 + $0x68] sm:$0xff]  }
 0x95c   :  { %v11072_v13 = vld [vmem:[#allocation10 + $0xe8] sm:$0xff]  }
 0x95e   :  { %7726 = vmatpush1.bf16.msra.mxu0 %v10991_v14  ;;  %7812 = vmatpush1.bf16.msra.mxu1 %v10994_v16  ;;  %v11073_v14 = vld [vmem:[#allocation10 + $0x28] sm:$0xff]  }
 0x95f   :  { %7727 = vmatprep.subr.bf16.mxu0 %v10999_v17  ;;  %7813 = vmatprep.subr.bf16.mxu1 %v11002_v19  ;;  %v11074_v16 = vld [vmem:[#allocation10 + $0xa8] sm:$0xff]   ;;  %v11075_v17 = vld [vmem:[#allocation10 + $0x70] sm:$0xff]  }
 0x960   :  { %v11076_v19 = vld [vmem:[#allocation10 + $0xf0] sm:$0xff]  }
 0x962   :  { %7728 = vmatpush1.bf16.msra.mxu0 %v10997_v20  ;;  %7814 = vmatpush1.bf16.msra.mxu1 %v11000_v21  ;;  %v11077_v20 = vld [vmem:[#allocation10 + $0x30] sm:$0xff]  }
 0x963   :  { %7729 = vmatprep.subr.bf16.mxu0 %v11005_v23  ;;  %7815 = vmatprep.subr.bf16.mxu1 %v11008_v24  ;;  %v11078_v21 = vld [vmem:[#allocation10 + $0xb0] sm:$0xff]   ;;  %v11079_v23 = vld [vmem:[#allocation10 + $0x78] sm:$0xff]  }
 0x964   :  { %v11080_v24 = vld [vmem:[#allocation10 + $0xf8] sm:$0xff]  }
 0x966   :  { %7730 = vmatpush1.bf16.msra.mxu0 %v11003_v63  ;;  %7816 = vmatpush1.bf16.msra.mxu1 %v11006_v25  ;;  %v11081_v63 = vld [vmem:[#allocation10 + $0x38] sm:$0xff]  }
 0x967   :  { %7731 = vmatprep.subr.bf16.mxu0 %v11011_v27  ;;  %7817 = vmatprep.subr.bf16.mxu1 %v11014_v29  ;;  %v11082_v25 = vld [vmem:[#allocation10 + $0xb8] sm:$0xff]   ;;  %v11290_v27 = vmov 0.0  }
 0x968   :  { %v7008_v29 = vld [vmem:[#allocation9 + $0x18] sm:$0xf] }
 0x96a   :  { %7732 = vmatpush1.bf16.msra.mxu0 %v11009_v3  ;;  %7818 = vmatpush1.bf16.msra.mxu1 %v11012_v30  ;;  %v7013_v3 = vrot.slane %v7008_v29, %v11726_v7  ;;  %v7021_v30 = vrot.slane %v7008_v29, %v11732_v15 }
 0x96b   :  { %7733 = vmatprep.subr.bf16.mxu0 %v11017_v31  ;;  %7819 = vmatprep.subr.bf16.mxu1 %v11020_v32  ;;  %v7017_v31 = vrot.slane %v7008_v29, %v11728_v9  ;;  %v7025_v32 = vrot.slane %v7008_v29, %v11734_v18 }
 0x96e   :  { %7734 = vmatpush1.bf16.msra.mxu0 %v11015_v33  ;;  %7820 = vmatpush1.bf16.msra.mxu1 %v11018_v34 }
 0x96f   :  { %7735 = vmatprep.subr.bf16.mxu0 %v11023_v35  ;;  %7821 = vmatprep.subr.bf16.mxu1 %v11026_v36 }
 0x972   :  { %7736 = vmatpush1.bf16.msra.mxu0 %v11021_v37  ;;  %7822 = vmatpush1.bf16.msra.mxu1 %v11024_v38 }
 0x973   :  { %7737 = vmatprep.subr.bf16.mxu0 %v11029_v39  ;;  %7823 = vmatprep.subr.bf16.mxu1 %v11032_v40 }
 0x976   :  { %7738 = vmatpush1.bf16.msra.mxu0 %v11027_v28  ;;  %7824 = vmatpush1.bf16.msra.mxu1 %v11030_v41 }
 0x977   :  { %7739 = vmatprep.subr.bf16.mxu0 %v11035_v42  ;;  %7825 = vmatprep.subr.bf16.mxu1 %v11038_v22 }
 0x97a   :  { %7740 = vmatpush1.bf16.msra.mxu0 %v11033_v43  ;;  %7826 = vmatpush1.bf16.msra.mxu1 %v11036_v45 }
 0x97b   :  { %7741 = vmatprep.subr.bf16.mxu0 %v11041_v46  ;;  %7827 = vmatprep.subr.bf16.mxu1 %v11044_v26 }
 0x97e   :  { %7742 = vmatpush1.bf16.msra.mxu0 %v11039_v47  ;;  %7828 = vmatpush1.bf16.msra.mxu1 %v11042_v49 }
 0x97f   :  { %7743 = vmatprep.subr.bf16.mxu0 %v11047_v51  ;;  %7829 = vmatprep.subr.bf16.mxu1 %v11050_v52 }
 0x982   :  { %7744 = vmatpush1.bf16.msra.mxu0 %v11045_v53  ;;  %7830 = vmatpush1.bf16.msra.mxu1 %v11048_v54 }
 0x983   :  { %9431 = vmatprep.subr.bf16.mxu0 %v11051_v55  ;;  %9453 = vmatprep.subr.bf16.mxu1 %v11052_v56 }
 0x985   :  { %7746 = vmatmul.mubr.bf16.vlgmr.msra.gmra.mrb[32].mxu0 %v11786_v48  ;;  %7832 = vmatmul.mubr.bf16.vlgmr.msra.gmra.mrb[40].mxu1 %v11786_v48  ;;  %v11066_v48 = vld [vmem:[#allocation10 + $0x98] sm:$0xff]  }
 0x986   :  { %9432 = vmatpush3.bf16.msra.mxu0 %v11053_v57  ;;  %9454 = vmatpush3.bf16.msra.mxu1 %v11054_v58  ;;  %v11083_v57 = vld [vmem:[%s11842_s9] sm:$0xff]   ;;  %v11084_v58 = vld [vmem:[%s11842_s9 + $0x8] sm:$0xff]  }
 0x987   :  { %9433 = vmatprep.subr.bf16.mxu0 %v11055_v59  ;;  %9455 = vmatprep.subr.bf16.mxu1 %v11056_v60  ;;  %v11085_v59 = vld [vmem:[%s11842_s9 + $0x10] sm:$0xff]   ;;  %v11086_v60 = vld [vmem:[%s11842_s9 + $0x18] sm:$0xff]  }
 0x98a   :  { %9434 = vmatpush3.bf16.msra.mxu0 %v11057_v61  ;;  %9456 = vmatpush3.bf16.msra.mxu1 %v11058_v50  ;;  %v11087_v61 = vld [vmem:[%s11842_s9 + $0x20] sm:$0xff]   ;;  %v11088_v50 = vld [vmem:[%s11842_s9 + $0x28] sm:$0xff]  }
 0x98b   :  { %9435 = vmatprep.subr.bf16.mxu0 %v11059_v62  ;;  %9457 = vmatprep.subr.bf16.mxu1 %v11060_v0  ;;  %v11089_v62 = vld [vmem:[%s11842_s9 + $0x30] sm:$0xff]   ;;  %v11090_v0 = vld [vmem:[%s11842_s9 + $0x38] sm:$0xff]  }
 0x98e   :  { %9436 = vmatpush3.bf16.msra.mxu0 %v11061_v1  ;;  %9458 = vmatpush3.bf16.msra.mxu1 %v11062_v44 }
 0x98f   :  { %9437 = vmatprep.subr.bf16.mxu0 %v11063_v2  ;;  %9459 = vmatprep.subr.bf16.mxu1 %v11064_v4  ;;  %v9301_v2 = vld [vmem:[#allocation12] ss:$0 sm:$0xff] }
 0x992   :  { %9438 = vmatpush3.bf16.msra.mxu0 %v11065_v5  ;;  %9460 = vmatpush3.bf16.msra.mxu1 %v11066_v48 }
 0x993   :  { %9439 = vmatprep.subr.bf16.mxu0 %v11067_v6  ;;  %9461 = vmatprep.subr.bf16.mxu1 %v11068_v8 }
 0x996   :  { %9440 = vmatpush3.bf16.msra.mxu0 %v11069_v10  ;;  %9462 = vmatpush3.bf16.msra.mxu1 %v11070_v11 }
 0x997   :  { %9441 = vmatprep.subr.bf16.mxu0 %v11071_v12  ;;  %9463 = vmatprep.subr.bf16.mxu1 %v11072_v13 }
 0x99a   :  { %9442 = vmatpush3.bf16.msra.mxu0 %v11073_v14  ;;  %9464 = vmatpush3.bf16.msra.mxu1 %v11074_v16 }
 0x99b   :  { %9443 = vmatprep.subr.bf16.mxu0 %v11075_v17  ;;  %9465 = vmatprep.subr.bf16.mxu1 %v11076_v19 }
 0x99e   :  { %9444 = vmatpush3.bf16.msra.mxu0 %v11077_v20  ;;  %9466 = vmatpush3.bf16.msra.mxu1 %v11078_v21 }
 0x99f   :  { %9445 = vmatprep.subr.bf16.mxu0 %v11079_v23  ;;  %9467 = vmatprep.subr.bf16.mxu1 %v11080_v24 }
 0x9a2   :  { %9446 = vmatpush3.bf16.msra.mxu0 %v11081_v63  ;;  %9468 = vmatpush3.bf16.msra.mxu1 %v11082_v25  ;;  %v9334_v63 = vld [vmem:[#allocation13] ss:$0 sm:$0xff] }
 0x9a3   :  { %9484 = vmatprep.subr.bf16.mxu0 %v11290_v27 }
 0xa58   :  { %v7747_v33 = vpop.f32.mrb[32].mxu0  ;;  %v7833_v34 = vpop.f32.mrb[40].mxu1 }
 0xa59   :  { %v9552_v35 = vadd.f32 %v7747_v33, %v7013_v3  ;;  %v9556_v36 = vadd.f32 %v7833_v34, %v7021_v30  ;;  %v7749_v37 = vpop.f32.mrb[33].mxu0  ;;  %v7835_v38 = vpop.f32.mrb[41].mxu1 }
 0xa5a   :  { %v9553_v39 = vadd.f32 %v7749_v37, %v7017_v31  ;;  %v9557_v40 = vadd.f32 %v7835_v38, %v7025_v32  ;;  %v7751_v28 = vpop.f32.mrb[34].mxu0  ;;  %v7837_v41 = vpop.f32.mrb[42].mxu1 }
 0xa5b   :  { %v9554_v42 = vadd.f32 %v7751_v28, %v7013_v3  ;;  %v9558_v22 = vadd.f32 %v7837_v41, %v7021_v30  ;;  %v7753_v43 = vpop.f32.mrb[35].mxu0  ;;  %v7839_v7 = vpop.f32.mrb[43].mxu1  ;;  %v7842_v46 = vmax.f32 %v9552_v35, 0.0  ;;  %v7844_v9 = vmax.f32 %v9556_v36, 0.0 }
 0xa5c   :  { %v9555_v45 = vadd.f32 %v7753_v43, %v7017_v31  ;;  %v9559_v15 = vadd.f32 %v7839_v7, %v7025_v32  ;;  %v7843_v47 = vmax.f32 %v9553_v39, 0.0  ;;  %v7845_v49 = vmax.f32 %v9557_v40, 0.0 }
 0xa5d   :  { %v7846_v26 = vmax.f32 %v9554_v42, 0.0  ;;  %v7848_v18 = vmax.f32 %v9558_v22, 0.0 }
 0xa5e   :  { %v7847_v51 = vmax.f32 %v9555_v45, 0.0  ;;  %v7849_v52 = vmax.f32 %v9559_v15, 0.0 }
 0xa5f   :  { %v7850_v53 = vpack.c.bf16 %v7846_v26, %v7842_v46  ;;  %v7852_v54 = vpack.c.bf16 %v7848_v18, %v7844_v9 }
 0xa60   :  { %v7851_v55 = vpack.c.bf16 %v7847_v51, %v7843_v47  ;;  %v7853_v56 = vpack.c.bf16 %v7849_v52, %v7845_v49 }
 0xa62   :  { %8149 = vmatprep.mubr.bf16.mxu0 %v7851_v55  ;;  %8190 = vmatprep.mubr.bf16.mxu1 %v7853_v56 }
 0xa63   :  { %8150 = vmatmul.mubr.bf16.vlgmr.msra.gmra.mrb[36].mxu0 %v7850_v53  ;;  %8191 = vmatmul.mubr.bf16.vlgmr.msra.gmra.mrb[44].mxu1 %v7852_v54 }
 0xa64   :  { %9485 = vmatpush3.bf16.msra.mxu0 %v11083_v57  ;;  %9500 = vmatprep.mubr.msk.bf16.mxu0 %vm11291_vm1, %v11290_v27 }
 0xa65   :  { %9486 = vmatprep.subr.bf16.mxu0 %v11290_v27 }
 0xa68   :  { %9487 = vmatpush3.bf16.msra.mxu0 %v11084_v58 }
 0xa69   :  { %9488 = vmatprep.subr.bf16.mxu0 %v11290_v27 }
 0xa6c   :  { %9489 = vmatpush3.bf16.msra.mxu0 %v11085_v59 }
 0xa6d   :  { %9490 = vmatprep.subr.bf16.mxu0 %v11290_v27 }
 0xa70   :  { %9491 = vmatpush3.bf16.msra.mxu0 %v11086_v60 }
 0xa71   :  { %9492 = vmatprep.subr.bf16.mxu0 %v11290_v27 }
 0xa74   :  { %9493 = vmatpush3.bf16.msra.mxu0 %v11087_v61 }
 0xa75   :  { %9494 = vmatprep.subr.bf16.mxu0 %v11290_v27 }
 0xa78   :  { %9495 = vmatpush3.bf16.msra.mxu0 %v11088_v50 }
 0xa79   :  { %9496 = vmatprep.subr.bf16.mxu0 %v11290_v27 }
 0xa7c   :  { %9497 = vmatpush3.bf16.msra.mxu0 %v11089_v62 }
 0xa7d   :  { %9498 = vmatprep.subr.bf16.mxu0 %v11290_v27 }
 0xa80   :  { %9499 = vmatpush3.bf16.msra.mxu0 %v11090_v0 }
 0xb36   :  { %v9447_v1 = vpop.f32.mrb[36].mxu0  ;;  %v9469_v44 = vpop.f32.mrb[44].mxu1 }
 0xb37   :  { %v9448_v4 = vpop.f32.mrb[37].mxu0  ;;  %v9470_v5 = vpop.f32.mrb[45].mxu1 }
 0xb38   :  { %v9449_v48 = vadd.f32 %v9448_v4, %v9447_v1  ;;  %v9471_v6 = vadd.f32 %v9470_v5, %v9469_v44  ;;  %v9450_v8 = vpop.f32.mrb[38].mxu0  ;;  %v9472_v10 = vpop.f32.mrb[46].mxu1 }
 0xb39   :  { %v9451_v11 = vpop.f32.mrb[39].mxu0  ;;  %v9473_v12 = vpop.f32.mrb[47].mxu1 }
 0xb3a   :  { %v8152_v13 = vadd.f32 %v9449_v48, %v9301_v2  ;;  %v9452_v14 = vadd.f32 %v9451_v11, %v9450_v8  ;;  %v9474_v16 = vadd.f32 %v9473_v12, %v9472_v10 }
 0xb3c   :  { %v8193_v17 = vadd.f32 %v9471_v6, %v8152_v13  ;;  %v8155_v19 = vadd.f32 %v9452_v14, %v9301_v2 }
 0xb3e   :  { %v8196_v20 = vadd.f32 %v9474_v16, %v8155_v19  ;;  %v8199_v21 = vmax.f32 %v8193_v17, 0.0 }
 0xb40   :  { %v8200_v23 = vmax.f32 %v8196_v20, 0.0 }
 0xb42   :  { %v8201_v24 = vpack.c.bf16 %v8200_v23, %v8199_v21 }
 0xb44   :  { %9501 = vmatmul.mubr.bf16.vlgmr.msra.gmra.mrb[40].mxu0 %v8201_v24 }
 0xc17   :  { %v8307_v25 = vpop.f32.mrb[40].mxu0 }
 0xc18   :  { %v8308_v27 = vadd.f32 %v9334_v63, %v8307_v25  ;;  %v9502_v29 = vpop.f32.mrb[41].mxu0 }
 0xc19   :  { %v8310_v3 = vpop.f32.mrb[42].mxu0 }
 0xc1a   :  { %8315 = vst.msk [vmem:[%s11845_s12] sm:$0xff] %vm8314_vm2, %v8308_v27  ;;  %v8311_v30 = vadd.f32 %v9334_v63, %v8310_v3  ;;  %v9503_v31 = vpop.f32.mrb[43].mxu0 }
 0xc1c   :  { %8316 = vst.msk [vmem:[%s11845_s12 + $0x8] sm:$0xff] %vm8314_vm2, %v8311_v30 }
 0xc1d   :  { %8325 = vsyncpa [#allocation3], 1 }
 0xc1e   :  { %8326 = vsyncpa [#allocation5], 1 }
 0xc1f   :  { %8327 = vsyncpa [#allocation8], 1 }
 0xc20   :  { %8328 = vsyncpa [#allocation11], 1 }
 0xc21   :  { %8329 = vsyncpa [#allocation14], 1 }

</bundles_post_ra>
